<compile_context>
chip_gen: v7x
topology: tpu7x:2x2x1
jax: 0.10.0
libtpu: 0.0.40
codegen_flags: <defaults>
</compile_context>

<pallas_src>
import functools

import jax
import jax.numpy as jnp
from jax.experimental import pallas as pl
from jax.experimental.pallas import tpu as pltpu


def _fused_upsample_conv_kernel(x_ref, w_ref, b_ref, out_ref, xpad_ref, col_ref,
                                *, F, h, w, C):
    """Fused nearest-2x upsample + 3x3 'same' conv for a block of F frames.

    x_ref   : (F, h, w, C)        low-res frames (bf16)
    w_ref   : (9*C, 4*C)          phase-folded weights (bf16)
    b_ref   : (1, 4*C)            bias replicated per phase (f32)
    out_ref : (F*h*w, 4*C)        per-pixel, per-phase conv output
    xpad_ref: (F, h+2, w+2, C)    VMEM scratch, zero halo built in VMEM
    col_ref : (F*h*w, 9*C)        VMEM im2col scratch
    """
    rows = F * h * w

    # Build the zero halo in VMEM (no padded HBM intermediate).  Re-zeroing
    # the whole scratch each step is cheap and keeps per-core scratch correct
    # when the grid axis is megacore-sharded.
    xpad_ref[...] = jnp.zeros_like(xpad_ref)
    xpad_ref[:, 1:h + 1, 1:w + 1, :] = x_ref[...]

    # im2col once per block: 9 lane-aligned column blocks of width C.
    for dy in range(3):
        for dx in range(3):
            k = dy * 3 + dx
            col_ref[:, k * C:(k + 1) * C] = (
                xpad_ref[:, dy:dy + h, dx:dx + w, :].reshape(rows, C))

    # Single MXU matmul: (rows, 9C) @ (9C, 4C), bf16 operands, f32 accumulate.
    acc = jnp.dot(col_ref[...], w_ref[...], preferred_element_type=jnp.float32)
    acc = acc + b_ref[...]
    out_ref[...] = acc.astype(out_ref.dtype)


def _pick_frames_per_block(N, h, w, c, out_itemsize=4, budget_bytes=24 << 20):
    """Choose frames-per-grid-step: big enough to amortize grid overhead and
    feed the MXU, small enough to fit a conservative (v7x-safe) VMEM budget,
    and keeping >=2 grid steps when possible (megacore sharding)."""
    per_frame = (2 * h * w * c * 2                      # input block (bf16, 2 buffers)
                 + 2 * h * w * 4 * c * out_itemsize     # output block (2 buffers)
                 + (h + 2) * (w + 2) * c * 2            # padded-frame scratch
                 + h * w * 9 * c * 2                    # im2col scratch
                 + h * w * 4 * c * 4)                   # f32 accumulator
    fixed = 2 * 9 * c * 4 * c * 2                       # folded weights (bf16)
    max_f = max(1, (budget_bytes - fixed) // per_frame)
    divs = [f for f in range(1, N + 1)
            if N % f == 0 and f <= max_f and (f * h * w) % 8 == 0]
    if not divs:
        return N  # single full-extent block is always layout-legal
    pref = [f for f in divs if N // f >= 2] or divs
    for f in pref:
        if f * h * w >= 512:
            return f
    return pref[-1]


def _plain_upsample(x, weight_oihw, bias, with_conv, size):
    # TODO(synk): non-default Upsample configs (explicit `size`, with_conv=False)
    # are not used by VideoDecoder; plain-JAX fallback, not kernelized.
    b, c, t, h, w = x.shape
    x_nhwc = jnp.transpose(x, (0, 2, 3, 4, 1)).reshape(b * t, h, w, c)
    H2, W2 = (2 * h, 2 * w) if size is None else size
    hi = (jnp.arange(H2) * h) // H2
    wi = (jnp.arange(W2) * w) // W2
    x_up = jnp.take(jnp.take(x_nhwc, hi, axis=1), wi, axis=2)
    if with_conv:
        x_up = jax.lax.conv_general_dilated(
            x_up.astype(jnp.float32),
            jnp.transpose(weight_oihw, (2, 3, 1, 0)),
            (1, 1), "SAME", dimension_numbers=("NHWC", "HWIO", "NHWC"),
        ) + bias[None, None, None, :]
    y = x_up.reshape(b, t, H2, W2, c).astype(x.dtype)
    return jnp.transpose(y, (0, 4, 1, 2, 3))


def upsample_forward(x, weight_oihw, bias, with_conv=True, size=None):
    """Forward pass of `Upsample` (NCTHW in, NCTHW out, 2x nearest + conv3x3)."""
    b, c, t, h, w = x.shape
    if (size is not None) or (not with_conv):
        return _plain_upsample(x, weight_oihw, bias, with_conv, size)

    N = b * t
    H2, W2 = 2 * h, 2 * w

    # NCTHW -> per-frame NHWC (channels on the lane axis), bf16 MXU operands.
    x_nhwc = jnp.transpose(x, (0, 2, 3, 4, 1)).reshape(N, h, w, c)
    x_bf16 = x_nhwc.astype(jnp.bfloat16)

    # Fold the nearest-2x upsample into the conv weights:
    #   out[2i+a, 2j+p] = sum_{ky,kx} Weff[a,p][ky,kx] . X_lowres[i-1+ky, j-1+kx]
    # A[a, lowres_offset, conv_tap] groups the 3 conv taps onto the 2x2->3x3
    # low-res footprint of each output phase.
    w_hwio = jnp.transpose(weight_oihw, (2, 3, 1, 0)).astype(jnp.float32)  # (3,3,ci,co)
    A = jnp.array([[[1., 0., 0.], [0., 1., 1.], [0., 0., 0.]],
                   [[0., 0., 0.], [1., 1., 0.], [0., 0., 1.]]], jnp.float32)
    w_eff = jnp.einsum('ayk,bxl,klio->yxiabo', A, A, w_hwio)   # (3,3,ci,2,2,co)
    w_mat = w_eff.reshape(9 * c, 4 * c).astype(jnp.bfloat16)   # rows=(dy,dx,ci), cols=(a,b,co)
    bias4 = jnp.tile(bias.astype(jnp.float32), 4).reshape(1, 4 * c)

    F = _pick_frames_per_block(N, h, w, c, out_itemsize=x.dtype.itemsize)
    rows_blk = F * h * w
    grid = (N // F,)

    est_vmem = (2 * F * h * w * c * 2 + 2 * rows_blk * 4 * c * x.dtype.itemsize
                + F * (h + 2) * (w + 2) * c * 2 + rows_blk * 9 * c * 2
                + rows_blk * 4 * c * 4 + 2 * 9 * c * 4 * c * 2)
    vmem_limit = int(min(96 << 20, max(32 << 20, 2 * est_vmem)))

    y = pl.pallas_call(
        functools.partial(_fused_upsample_conv_kernel, F=F, h=h, w=w, C=c),
        out_shape=jax.ShapeDtypeStruct((N * h * w, 4 * c), x.dtype),
        grid=grid,
        in_specs=[
            pl.BlockSpec((F, h, w, c), lambda n: (n, 0, 0, 0)),
            pl.BlockSpec((9 * c, 4 * c), lambda n: (0, 0)),
            pl.BlockSpec((1, 4 * c), lambda n: (0, 0)),
        ],
        out_specs=pl.BlockSpec((rows_blk, 4 * c), lambda n: (n, 0)),
        scratch_shapes=[
            pltpu.VMEM((F, h + 2, w + 2, c), jnp.bfloat16),   # padded low-res frames
            pltpu.VMEM((rows_blk, 9 * c), jnp.bfloat16),      # im2col buffer
        ],
        compiler_params=pltpu.CompilerParams(
            dimension_semantics=("parallel",),
            vmem_limit_bytes=vmem_limit),
    )(x_bf16, w_mat, bias4)

    # Depth-to-space of the 4 phases + NHWC -> NCTHW in ONE transpose
    # (this transpose is needed anyway to return to the PyTorch layout).
    y = y.reshape(b, t, h, w, 2, 2, c)               # (b, t, i, j, a, p, c)
    y = jnp.transpose(y, (0, 6, 1, 2, 4, 3, 5))      # (b, c, t, i, a, j, p)
    return y.reshape(b, c, t, H2, W2)


def _reference_forward(x, weight_oihw, bias, size=None):
    """Pure-JAX f32 reference (mirrors the PyTorch module) for validation."""
    b, c, t, h, w = x.shape
    x_nhwc = jnp.transpose(x, (0, 2, 3, 4, 1)).reshape(b * t, h, w, c)
    H2, W2 = (2 * h, 2 * w) if size is None else size
    hi = (jnp.arange(H2) * h) // H2
    wi = (jnp.arange(W2) * w) // W2
    x_up = x_nhwc[:, hi][:, :, wi]
    y = jax.lax.conv_general_dilated(
        x_up.astype(jnp.float32),
        jnp.transpose(weight_oihw, (2, 3, 1, 0)),
        window_strides=(1, 1), padding="SAME",
        dimension_numbers=("NHWC", "HWIO", "NHWC"),
    ) + bias[None, None, None, :]
    y = y.reshape(b, t, H2, W2, c)
    return jnp.transpose(y, (0, 4, 1, 2, 3)).astype(x.dtype)


if __name__ == "__main__":
    key = jax.random.PRNGKey(0)
    k_x, k_w, k_b = jax.random.split(key, 3)

    # Small shapes consistent with VideoDecoder: c=128 is one of its real
    # Upsample widths (lane-dense), b=2, t=4 frames, 8x8 -> 16x16 spatial.
    b, c, t, h, w = 2, 128, 4, 8, 8
    x = jax.random.normal(k_x, (b, c, t, h, w), dtype=jnp.float32)

    # Conv2d(in=c, out=c, k=3) default-style uniform init.
    fan_in = c * 3 * 3
    bound = 1.0 / (fan_in ** 0.5)
    weight = jax.random.uniform(k_w, (c, c, 3, 3), jnp.float32, -bound, bound)
    bias = jax.random.uniform(k_b, (c,), jnp.float32, -bound, bound)

    fwd = jax.jit(upsample_forward)
    out = jax.block_until_ready(fwd(x, weight, bias))

    ref = _reference_forward(x, weight, bias)
    assert out.shape == (b, c, t, 2 * h, 2 * w), out.shape
    max_err = float(jnp.max(jnp.abs(out - ref)))
    # bf16 MXU operands (f32 accumulation) -> relaxed tolerance.
    assert jnp.allclose(out, ref, atol=5e-2, rtol=5e-2), (
        f"mismatch vs reference, max abs err = {max_err}")

    print("KERNEL_OK")
</pallas_src>

<mosaic_0001>
module attributes {stable_mosaic.version = 11 : i64} {
  func.func @_fused_upsample_conv_kernel(%arg0: i32, %arg1: memref<4x8x8x128xbf16, #tpu.memory_space<vmem>>, %arg2: memref<1152x512xbf16, #tpu.memory_space<vmem>>, %arg3: memref<1x512xf32, #tpu.memory_space<vmem>>, %arg4: memref<256x512xf32, #tpu.memory_space<vmem>>, %arg5: memref<4x10x10x128xbf16, #tpu.memory_space<vmem>>, %arg6: memref<256x1152xbf16, #tpu.memory_space<vmem>>) attributes {dimension_semantics = [#tpu.dimension_semantics<parallel>], iteration_bounds = array<i64: 2>, scalar_prefetch = 0 : i64, scratch_operands = 2 : i64, tpu.core_type = #tpu.core_type<tc>, window_params = [{transform_indices = @transform_0, window_bounds = array<i64: 4, 8, 8, 128>}, {pipeline_mode = #tpu.pipeline_mode<synchronous>, transform_indices = @transform_1, window_bounds = array<i64: 1152, 512>}, {pipeline_mode = #tpu.pipeline_mode<synchronous>, transform_indices = @transform_2, window_bounds = array<i64: 1, 512>}, {transform_indices = @transform_3, window_bounds = array<i64: 256, 512>}]} {
    %cst = arith.constant 0.000000e+00 : bf16
    %0 = vector.broadcast %cst : bf16 to vector<4x10x10x128xbf16>
    %c0 = arith.constant 0 : index
    %c0_0 = arith.constant 0 : index
    %c0_1 = arith.constant 0 : index
    %c0_2 = arith.constant 0 : index
    %1 = vector.load %arg5[%c0, %c0_0, %c0_1, %c0_2] : memref<4x10x10x128xbf16, #tpu.memory_space<vmem>>, vector<4x10x10x128xbf16>
    tpu.vector_store %arg5[%c0, %c0_0, %c0_1, %c0_2], %0 {strides = array<i32>} : memref<4x10x10x128xbf16, #tpu.memory_space<vmem>>, vector<4x10x10x128xbf16>,
    %c0_3 = arith.constant 0 : index
    %c0_4 = arith.constant 0 : index
    %c0_5 = arith.constant 0 : index
    %c0_6 = arith.constant 0 : index
    %2 = vector.load %arg1[%c0_3, %c0_4, %c0_5, %c0_6] : memref<4x8x8x128xbf16, #tpu.memory_space<vmem>>, vector<4x8x8x128xbf16>
    %c0_7 = arith.constant 0 : index
    %c1 = arith.constant 1 : index
    %c1_8 = arith.constant 1 : index
    %c0_9 = arith.constant 0 : index
    %3 = vector.load %arg5[%c0_7, %c1, %c1_8, %c0_9] : memref<4x10x10x128xbf16, #tpu.memory_space<vmem>>, vector<4x8x8x128xbf16>
    tpu.vector_store %arg5[%c0_7, %c1, %c1_8, %c0_9], %2 {strides = array<i32>} : memref<4x10x10x128xbf16, #tpu.memory_space<vmem>>, vector<4x8x8x128xbf16>,
    %c0_10 = arith.constant 0 : index
    %c0_11 = arith.constant 0 : index
    %c0_12 = arith.constant 0 : index
    %c0_13 = arith.constant 0 : index
    %4 = vector.load %arg5[%c0_10, %c0_11, %c0_12, %c0_13] : memref<4x10x10x128xbf16, #tpu.memory_space<vmem>>, vector<4x8x8x128xbf16>
    %5 = vector.shape_cast %4 : vector<4x8x8x128xbf16> to vector<256x128xbf16>
    %c0_14 = arith.constant 0 : index
    %c0_15 = arith.constant 0 : index
    %6 = vector.load %arg6[%c0_14, %c0_15] : memref<256x1152xbf16, #tpu.memory_space<vmem>>, vector<256x128xbf16>
    tpu.vector_store %arg6[%c0_14, %c0_15], %5 {strides = array<i32>} : memref<256x1152xbf16, #tpu.memory_space<vmem>>, vector<256x128xbf16>,
    %c0_16 = arith.constant 0 : index
    %c0_17 = arith.constant 0 : index
    %c1_18 = arith.constant 1 : index
    %c0_19 = arith.constant 0 : index
    %7 = vector.load %arg5[%c0_16, %c0_17, %c1_18, %c0_19] : memref<4x10x10x128xbf16, #tpu.memory_space<vmem>>, vector<4x8x8x128xbf16>
    %8 = vector.shape_cast %7 : vector<4x8x8x128xbf16> to vector<256x128xbf16>
    %c0_20 = arith.constant 0 : index
    %c128 = arith.constant 128 : index
    %9 = vector.load %arg6[%c0_20, %c128] : memref<256x1152xbf16, #tpu.memory_space<vmem>>, vector<256x128xbf16>
    tpu.vector_store %arg6[%c0_20, %c128], %8 {strides = array<i32>} : memref<256x1152xbf16, #tpu.memory_space<vmem>>, vector<256x128xbf16>,
    %c0_21 = arith.constant 0 : index
    %c0_22 = arith.constant 0 : index
    %c2 = arith.constant 2 : index
    %c0_23 = arith.constant 0 : index
    %10 = vector.load %arg5[%c0_21, %c0_22, %c2, %c0_23] : memref<4x10x10x128xbf16, #tpu.memory_space<vmem>>, vector<4x8x8x128xbf16>
    %11 = vector.shape_cast %10 : vector<4x8x8x128xbf16> to vector<256x128xbf16>
    %c0_24 = arith.constant 0 : index
    %c256 = arith.constant 256 : index
    %12 = vector.load %arg6[%c0_24, %c256] : memref<256x1152xbf16, #tpu.memory_space<vmem>>, vector<256x128xbf16>
    tpu.vector_store %arg6[%c0_24, %c256], %11 {strides = array<i32>} : memref<256x1152xbf16, #tpu.memory_space<vmem>>, vector<256x128xbf16>,
    %c0_25 = arith.constant 0 : index
    %c1_26 = arith.constant 1 : index
    %c0_27 = arith.constant 0 : index
    %c0_28 = arith.constant 0 : index
    %13 = vector.load %arg5[%c0_25, %c1_26, %c0_27, %c0_28] : memref<4x10x10x128xbf16, #tpu.memory_space<vmem>>, vector<4x8x8x128xbf16>
    %14 = vector.shape_cast %13 : vector<4x8x8x128xbf16> to vector<256x128xbf16>
    %c0_29 = arith.constant 0 : index
    %c384 = arith.constant 384 : index
    %15 = vector.load %arg6[%c0_29, %c384] : memref<256x1152xbf16, #tpu.memory_space<vmem>>, vector<256x128xbf16>
    tpu.vector_store %arg6[%c0_29, %c384], %14 {strides = array<i32>} : memref<256x1152xbf16, #tpu.memory_space<vmem>>, vector<256x128xbf16>,
    %c0_30 = arith.constant 0 : index
    %c1_31 = arith.constant 1 : index
    %c1_32 = arith.constant 1 : index
    %c0_33 = arith.constant 0 : index
    %16 = vector.load %arg5[%c0_30, %c1_31, %c1_32, %c0_33] : memref<4x10x10x128xbf16, #tpu.memory_space<vmem>>, vector<4x8x8x128xbf16>
    %17 = vector.shape_cast %16 : vector<4x8x8x128xbf16> to vector<256x128xbf16>
    %c0_34 = arith.constant 0 : index
    %c512 = arith.constant 512 : index
    %18 = vector.load %arg6[%c0_34, %c512] : memref<256x1152xbf16, #tpu.memory_space<vmem>>, vector<256x128xbf16>
    tpu.vector_store %arg6[%c0_34, %c512], %17 {strides = array<i32>} : memref<256x1152xbf16, #tpu.memory_space<vmem>>, vector<256x128xbf16>,
    %c0_35 = arith.constant 0 : index
    %c1_36 = arith.constant 1 : index
    %c2_37 = arith.constant 2 : index
    %c0_38 = arith.constant 0 : index
    %19 = vector.load %arg5[%c0_35, %c1_36, %c2_37, %c0_38] : memref<4x10x10x128xbf16, #tpu.memory_space<vmem>>, vector<4x8x8x128xbf16>
    %20 = vector.shape_cast %19 : vector<4x8x8x128xbf16> to vector<256x128xbf16>
    %c0_39 = arith.constant 0 : index
    %c640 = arith.constant 640 : index
    %21 = vector.load %arg6[%c0_39, %c640] : memref<256x1152xbf16, #tpu.memory_space<vmem>>, vector<256x128xbf16>
    tpu.vector_store %arg6[%c0_39, %c640], %20 {strides = array<i32>} : memref<256x1152xbf16, #tpu.memory_space<vmem>>, vector<256x128xbf16>,
    %c0_40 = arith.constant 0 : index
    %c2_41 = arith.constant 2 : index
    %c0_42 = arith.constant 0 : index
    %c0_43 = arith.constant 0 : index
    %22 = vector.load %arg5[%c0_40, %c2_41, %c0_42, %c0_43] : memref<4x10x10x128xbf16, #tpu.memory_space<vmem>>, vector<4x8x8x128xbf16>
    %23 = vector.shape_cast %22 : vector<4x8x8x128xbf16> to vector<256x128xbf16>
    %c0_44 = arith.constant 0 : index
    %c768 = arith.constant 768 : index
    %24 = vector.load %arg6[%c0_44, %c768] : memref<256x1152xbf16, #tpu.memory_space<vmem>>, vector<256x128xbf16>
    tpu.vector_store %arg6[%c0_44, %c768], %23 {strides = array<i32>} : memref<256x1152xbf16, #tpu.memory_space<vmem>>, vector<256x128xbf16>,
    %c0_45 = arith.constant 0 : index
    %c2_46 = arith.constant 2 : index
    %c1_47 = arith.constant 1 : index
    %c0_48 = arith.constant 0 : index
    %25 = vector.load %arg5[%c0_45, %c2_46, %c1_47, %c0_48] : memref<4x10x10x128xbf16, #tpu.memory_space<vmem>>, vector<4x8x8x128xbf16>
    %26 = vector.shape_cast %25 : vector<4x8x8x128xbf16> to vector<256x128xbf16>
    %c0_49 = arith.constant 0 : index
    %c896 = arith.constant 896 : index
    %27 = vector.load %arg6[%c0_49, %c896] : memref<256x1152xbf16, #tpu.memory_space<vmem>>, vector<256x128xbf16>
    tpu.vector_store %arg6[%c0_49, %c896], %26 {strides = array<i32>} : memref<256x1152xbf16, #tpu.memory_space<vmem>>, vector<256x128xbf16>,
    %c0_50 = arith.constant 0 : index
    %c2_51 = arith.constant 2 : index
    %c2_52 = arith.constant 2 : index
    %c0_53 = arith.constant 0 : index
    %28 = vector.load %arg5[%c0_50, %c2_51, %c2_52, %c0_53] : memref<4x10x10x128xbf16, #tpu.memory_space<vmem>>, vector<4x8x8x128xbf16>
    %29 = vector.shape_cast %28 : vector<4x8x8x128xbf16> to vector<256x128xbf16>
    %c0_54 = arith.constant 0 : index
    %c1024 = arith.constant 1024 : index
    %30 = vector.load %arg6[%c0_54, %c1024] : memref<256x1152xbf16, #tpu.memory_space<vmem>>, vector<256x128xbf16>
    tpu.vector_store %arg6[%c0_54, %c1024], %29 {strides = array<i32>} : memref<256x1152xbf16, #tpu.memory_space<vmem>>, vector<256x128xbf16>,
    %c0_55 = arith.constant 0 : index
    %c0_56 = arith.constant 0 : index
    %31 = vector.load %arg6[%c0_55, %c0_56] : memref<256x1152xbf16, #tpu.memory_space<vmem>>, vector<256x1152xbf16>
    %c0_57 = arith.constant 0 : index
    %c0_58 = arith.constant 0 : index
    %32 = vector.load %arg2[%c0_57, %c0_58] : memref<1152x512xbf16, #tpu.memory_space<vmem>>, vector<1152x512xbf16>
    %cst_59 = arith.constant dense<0.000000e+00> : vector<256x512xf32>
    %33 = tpu.matmul %31, %32, %cst_59 {dimension_numbers = #tpu.dot_dimension_numbers<[1], [0], [0], [1], [0, 0, 1, 1], [], []>} : vector<256x1152xbf16>, vector<1152x512xbf16>, vector<256x512xf32> -> vector<256x512xf32>
    %c0_60 = arith.constant 0 : index
    %c0_61 = arith.constant 0 : index
    %34 = vector.load %arg3[%c0_60, %c0_61] : memref<1x512xf32, #tpu.memory_space<vmem>>, vector<1x512xf32>
    %35 = vector.broadcast %34 : vector<1x512xf32> to vector<256x512xf32>
    %36 = arith.addf %33, %35 : vector<256x512xf32>
    %c0_62 = arith.constant 0 : index
    %c0_63 = arith.constant 0 : index
    %37 = vector.load %arg4[%c0_62, %c0_63] : memref<256x512xf32, #tpu.memory_space<vmem>>, vector<256x512xf32>
    tpu.vector_store %arg4[%c0_62, %c0_63], %36 {strides = array<i32>} : memref<256x512xf32, #tpu.memory_space<vmem>>, vector<256x512xf32>,
    return
  }
  func.func @transform_0(%arg0: i32) -> (i32, i32, i32, i32) {
    %c0_i32 = arith.constant 0 : i32
    %c0_i32_0 = arith.constant 0 : i32
    %c0_i32_1 = arith.constant 0 : i32
    %c0_i32_2 = arith.constant 0 : i32
    return %arg0, %c0_i32, %c0_i32_0, %c0_i32_1 : i32, i32, i32, i32
  }
  func.func @transform_1(%arg0: i32) -> (i32, i32) {
    %c0_i32 = arith.constant 0 : i32
    %c0_i32_0 = arith.constant 0 : i32
    %c0_i32_1 = arith.constant 0 : i32
    return %c0_i32, %c0_i32_0 : i32, i32
  }
  func.func @transform_2(%arg0: i32) -> (i32, i32) {
    %c0_i32 = arith.constant 0 : i32
    %c0_i32_0 = arith.constant 0 : i32
    %c0_i32_1 = arith.constant 0 : i32
    return %c0_i32, %c0_i32_0 : i32, i32
  }
  func.func @transform_3(%arg0: i32) -> (i32, i32) {
    %c0_i32 = arith.constant 0 : i32
    %c0_i32_0 = arith.constant 0 : i32
    return %arg0, %c0_i32 : i32, i32
  }
}

</mosaic_0001>

<bundles_post_ra>
// kernel: tile.8
= control target key start
LH: loop header
LB: loop body
LE: loop exit
PB: predicated region body
PF: predicated region fallthrough
CT: control target
= control target key end

     0   :  { %s22_s0 = inlined_call_operand.vmem [shape: f32[128], index: 0, kind: input, shape index: {}]   ;;  %s23_s1 = inlined_call_operand.vmem [shape: f32[4,128], index: 1, kind: output, shape index: {}]  }
   0x1   :  { %v4_v0 = vld [vmem:[%s22_s0] ss:$0 sm:$0xff] }
   0x2   :  { %5 = vst [vmem:[%s23_s1] sm:$0xf] %v4_v0 }

// kernel: upsample_forward.1
= control target key start
LH: loop header
LB: loop body
LE: loop exit
PB: predicated region body
PF: predicated region fallthrough
CT: control target
= control target key end

     0   :  { %s9745_s12 = smov 0   ;;  %s11924_s0 = inlined_call_operand.vmem [shape: bf16[8,8,8,128], index: 0, kind: input, shape index: {}]   ;;  %s11925_s1 = inlined_call_operand.vmem [shape: bf16[1152,512], index: 1, kind: input, shape index: {}]   ;;  %s11926_s2 = inlined_call_operand.vmem [shape: f32[1,512], index: 2, kind: input, shape index: {}]   ;;  %s11927_s3 = inlined_call_operand.vmem [shape: f32[512,512], index: 3, kind: output, shape index: {}]  }
   0x1 LB: > { %s8044_s13 = sadd.s32 4294967295, %s9722_s12   ;;  %p8048_p0 = scmp.ge.s32.totalorder %s9722_s12, 1  ;;  %s9722_s12 = sphi %s9745_s12, %s13_s12  }
   0x2   : > { %p139_p1 = scmp.lt.s32.totalorder %s9722_s12, 3 }
   0x4   : > { %p140_p2 = pnand %p8048_p0, %p139_p1 }
   0x5   : > { %v9756_v0 = vld [vmem:[%s11925_s1 + $0x4] ss:$16 sps:$4 sm:$0xff] (!%p140_p2)   ;;  %v9761_v1 = vld [vmem:[%s11925_s1 + $0xc] ss:$16 sps:$4 sm:$0xff] (!%p140_p2)   ;;  %v9724_v2 = vmov (!%p140_p2), 0   ;;  %s8049_s24 = sshll.u32 (!%p140_p2), %s8044_s13, 2 }
   0x6   : > { %143 = sbr.rel (%p140_p2) target bundleno = 960 (0x3c0), region = 32  ;;  %180 = vst [vmem:[#allocation2] sm:$0xf] (!%p140_p2), %v9724_v2  ;;  %181 = vst [vmem:[#allocation2 + $0x4] sm:$0x1] (!%p140_p2), %v9724_v2  ;;  %5928 = vmatprep.subr.bf16.mxu0 (!%p140_p2), %v9756_v0  ;;  %6893 = vmatprep.subr.bf16.mxu1 (!%p140_p2), %v9761_v1  ;;  %p166_p3 = scmp.lt.s32.totalorder (!%p140_p2), %s8049_s24, 7 }
   0x7   : > { %182 = vst [vmem:[#allocation2 + $0x8] sm:$0xf] (!%p140_p2), %v9724_v2  ;;  %183 = vst [vmem:[#allocation2 + $0xc] sm:$0x1] (!%p140_p2), %v9724_v2  ;;  %v9240_v3 = vld [vmem:[%s11925_s1] ss:$16 sps:$4 sm:$0xff] (!%p140_p2)  }
   0x8   : > { %184 = vst [vmem:[#allocation2 + $0x10] sm:$0xf] (!%p140_p2), %v9724_v2  ;;  %185 = vst [vmem:[#allocation2 + $0x14] sm:$0x1] (!%p140_p2), %v9724_v2  ;;  %v9241_v4 = vld [vmem:[%s11925_s1 + $0x8] ss:$16 sps:$4 sm:$0xff] (!%p140_p2)   ;;  %5929 = vmatpush1.bf16.msra.mxu0 (!%p140_p2), %v9240_v3 }
   0x9   : > { %186 = vst [vmem:[#allocation2 + $0x18] sm:$0xf] (!%p140_p2), %v9724_v2  ;;  %187 = vst [vmem:[#allocation2 + $0x1c] sm:$0x1] (!%p140_p2), %v9724_v2  ;;  %v9242_v5 = vld [vmem:[%s11925_s1 + $0x24] ss:$16 sps:$4 sm:$0xff] (!%p140_p2)   ;;  %6894 = vmatpush1.bf16.msra.mxu1 (!%p140_p2), %v9241_v4 }
   0xa   : > { %188 = vst [vmem:[#allocation2 + $0x20] sm:$0xf] (!%p140_p2), %v9724_v2  ;;  %189 = vst [vmem:[#allocation2 + $0x24] sm:$0x1] (!%p140_p2), %v9724_v2  ;;  %v9244_v6 = vld [vmem:[%s11925_s1 + $0x2c] ss:$16 sps:$4 sm:$0xff] (!%p140_p2)   ;;  %5930 = vmatprep.subr.bf16.mxu0 (!%p140_p2), %v9242_v5 }
   0xb   : > { %190 = vst [vmem:[#allocation2 + $0x28] sm:$0xf] (!%p140_p2), %v9724_v2  ;;  %191 = vst [vmem:[#allocation2 + $0x2c] sm:$0x1] (!%p140_p2), %v9724_v2  ;;  %v9246_v7 = vld [vmem:[%s11925_s1 + $0x20] ss:$16 sps:$4 sm:$0xff] (!%p140_p2)   ;;  %6895 = vmatprep.subr.bf16.mxu1 (!%p140_p2), %v9244_v6 }
   0xc   : > { %192 = vst [vmem:[#allocation2 + $0x30] sm:$0xf] (!%p140_p2), %v9724_v2  ;;  %193 = vst [vmem:[#allocation2 + $0x34] sm:$0x1] (!%p140_p2), %v9724_v2  ;;  %v9247_v8 = vld [vmem:[%s11925_s1 + $0x28] ss:$16 sps:$4 sm:$0xff] (!%p140_p2)   ;;  %5931 = vmatpush1.bf16.msra.mxu0 (!%p140_p2), %v9246_v7 }
   0xd   : > { %194 = vst [vmem:[#allocation2 + $0x38] sm:$0xf] %v9724_v2  ;;  %195 = vst [vmem:[#allocation2 + $0x3c] sm:$0x1] %v9724_v2  ;;  %v9248_v9 = vld [vmem:[%s11925_s1 + $0x44] ss:$16 sps:$4 sm:$0xff]   ;;  %6896 = vmatpush1.bf16.msra.mxu1 %v9247_v8 }
   0xe   : > { %196 = vst [vmem:[#allocation2 + $0x40] sm:$0xf] %v9724_v2  ;;  %197 = vst [vmem:[#allocation2 + $0x44] sm:$0x1] %v9724_v2  ;;  %v9250_v10 = vld [vmem:[%s11925_s1 + $0x4c] ss:$16 sps:$4 sm:$0xff]   ;;  %5932 = vmatprep.subr.bf16.mxu0 %v9248_v9 }
   0xf   : > { %198 = vst [vmem:[#allocation2 + $0x48] sm:$0xf] %v9724_v2  ;;  %199 = vst [vmem:[#allocation2 + $0x4c] sm:$0x1] %v9724_v2  ;;  %v9252_v11 = vld [vmem:[%s11925_s1 + $0x40] ss:$16 sps:$4 sm:$0xff]   ;;  %6897 = vmatprep.subr.bf16.mxu1 %v9250_v10 }
  0x10   : > { %200 = vst [vmem:[#allocation2 + $0x50] sm:$0xf] %v9724_v2  ;;  %201 = vst [vmem:[#allocation2 + $0x54] sm:$0x1] %v9724_v2  ;;  %v9253_v12 = vld [vmem:[%s11925_s1 + $0x48] ss:$16 sps:$4 sm:$0xff]   ;;  %5933 = vmatpush1.bf16.msra.mxu0 %v9252_v11 }
  0x11   : > { %202 = vst [vmem:[#allocation2 + $0x58] sm:$0xf] %v9724_v2  ;;  %203 = vst [vmem:[#allocation2 + $0x5c] sm:$0x1] %v9724_v2  ;;  %v9254_v13 = vld [vmem:[%s11925_s1 + $0x64] ss:$16 sps:$4 sm:$0xff]   ;;  %6898 = vmatpush1.bf16.msra.mxu1 %v9253_v12 }
  0x12   : > { %204 = vst [vmem:[#allocation2 + $0x60] sm:$0xf] %v9724_v2  ;;  %205 = vst [vmem:[#allocation2 + $0x64] sm:$0x1] %v9724_v2  ;;  %v9256_v14 = vld [vmem:[%s11925_s1 + $0x6c] ss:$16 sps:$4 sm:$0xff]   ;;  %5934 = vmatprep.subr.bf16.mxu0 %v9254_v13 }
  0x13   : > { %206 = vst [vmem:[#allocation2 + $0x68] sm:$0xf] %v9724_v2  ;;  %207 = vst [vmem:[#allocation2 + $0x6c] sm:$0x1] %v9724_v2  ;;  %v9258_v15 = vld [vmem:[%s11925_s1 + $0x60] ss:$16 sps:$4 sm:$0xff]   ;;  %6899 = vmatprep.subr.bf16.mxu1 %v9256_v14 }
  0x14   : > { %208 = vst [vmem:[#allocation2 + $0x70] sm:$0xf] %v9724_v2  ;;  %209 = vst [vmem:[#allocation2 + $0x74] sm:$0x1] %v9724_v2  ;;  %v9259_v16 = vld [vmem:[%s11925_s1 + $0x68] ss:$16 sps:$4 sm:$0xff]   ;;  %5935 = vmatpush1.bf16.msra.mxu0 %v9258_v15 }
  0x15   : > { %210 = vst [vmem:[#allocation2 + $0x78] sm:$0xf] %v9724_v2  ;;  %211 = vst [vmem:[#allocation2 + $0x7c] sm:$0x1] %v9724_v2  ;;  %v9260_v17 = vld [vmem:[%s11925_s1 + $0x84] ss:$16 sps:$4 sm:$0xff]   ;;  %6900 = vmatpush1.bf16.msra.mxu1 %v9259_v16 }
  0x16   : > { %212 = vst [vmem:[#allocation2 + $0x80] sm:$0xf] %v9724_v2  ;;  %213 = vst [vmem:[#allocation2 + $0x84] sm:$0x1] %v9724_v2  ;;  %v9262_v18 = vld [vmem:[%s11925_s1 + $0x8c] ss:$16 sps:$4 sm:$0xff]   ;;  %5936 = vmatprep.subr.bf16.mxu0 %v9260_v17 }
  0x17   : > { %214 = vst [vmem:[#allocation2 + $0x88] sm:$0xf] %v9724_v2  ;;  %215 = vst [vmem:[#allocation2 + $0x8c] sm:$0x1] %v9724_v2  ;;  %v9264_v19 = vld [vmem:[%s11925_s1 + $0x80] ss:$16 sps:$4 sm:$0xff]   ;;  %6901 = vmatprep.subr.bf16.mxu1 %v9262_v18 }
  0x18   : > { %216 = vst [vmem:[#allocation2 + $0x90] sm:$0xf] %v9724_v2  ;;  %217 = vst [vmem:[#allocation2 + $0x94] sm:$0x1] %v9724_v2  ;;  %v9265_v20 = vld [vmem:[%s11925_s1 + $0x88] ss:$16 sps:$4 sm:$0xff]   ;;  %5937 = vmatpush1.bf16.msra.mxu0 %v9264_v19 }
  0x19   : > { %218 = vst [vmem:[#allocation2 + $0x98] sm:$0xf] %v9724_v2  ;;  %219 = vst [vmem:[#allocation2 + $0x9c] sm:$0x1] %v9724_v2  ;;  %v9266_v21 = vld [vmem:[%s11925_s1 + $0xa4] ss:$16 sps:$4 sm:$0xff]   ;;  %6902 = vmatpush1.bf16.msra.mxu1 %v9265_v20 }
  0x1a   : > { %220 = vst [vmem:[#allocation2 + $0xa0] sm:$0xf] %v9724_v2  ;;  %221 = vst [vmem:[#allocation2 + $0xa4] sm:$0x1] %v9724_v2  ;;  %v9268_v22 = vld [vmem:[%s11925_s1 + $0xac] ss:$16 sps:$4 sm:$0xff]   ;;  %5938 = vmatprep.subr.bf16.mxu0 %v9266_v21 }
  0x1b   : > { %222 = vst [vmem:[#allocation2 + $0xa8] sm:$0xf] %v9724_v2  ;;  %223 = vst [vmem:[#allocation2 + $0xac] sm:$0x1] %v9724_v2  ;;  %v9270_v23 = vld [vmem:[%s11925_s1 + $0xa0] ss:$16 sps:$4 sm:$0xff]   ;;  %6903 = vmatprep.subr.bf16.mxu1 %v9268_v22 }
  0x1c   : > { %224 = vst [vmem:[#allocation2 + $0xb0] sm:$0xf] %v9724_v2  ;;  %225 = vst [vmem:[#allocation2 + $0xb4] sm:$0x1] %v9724_v2  ;;  %v9271_v24 = vld [vmem:[%s11925_s1 + $0xa8] ss:$16 sps:$4 sm:$0xff]   ;;  %5939 = vmatpush1.bf16.msra.mxu0 %v9270_v23 }
  0x1d   : > { %226 = vst [vmem:[#allocation2 + $0xb8] sm:$0xf] %v9724_v2  ;;  %227 = vst [vmem:[#allocation2 + $0xbc] sm:$0x1] %v9724_v2  ;;  %v9272_v25 = vld [vmem:[%s11925_s1 + $0xc4] ss:$16 sps:$4 sm:$0xff]   ;;  %6904 = vmatpush1.bf16.msra.mxu1 %v9271_v24 }
  0x1e   : > { %228 = vst [vmem:[#allocation2 + $0xc0] sm:$0xf] %v9724_v2  ;;  %229 = vst [vmem:[#allocation2 + $0xc4] sm:$0x1] %v9724_v2  ;;  %v9274_v26 = vld [vmem:[%s11925_s1 + $0xcc] ss:$16 sps:$4 sm:$0xff]   ;;  %5940 = vmatprep.subr.bf16.mxu0 %v9272_v25 }
  0x1f   : > { %230 = vst [vmem:[#allocation2 + $0xc8] sm:$0xf] %v9724_v2  ;;  %231 = vst [vmem:[#allocation2 + $0xcc] sm:$0x1] %v9724_v2  ;;  %v9276_v27 = vld [vmem:[%s11925_s1 + $0xc0] ss:$16 sps:$4 sm:$0xff]   ;;  %6905 = vmatprep.subr.bf16.mxu1 %v9274_v26 }
  0x20   : > { %232 = vst [vmem:[#allocation2 + $0xd0] sm:$0xf] %v9724_v2  ;;  %233 = vst [vmem:[#allocation2 + $0xd4] sm:$0x1] %v9724_v2  ;;  %v9277_v28 = vld [vmem:[%s11925_s1 + $0xc8] ss:$16 sps:$4 sm:$0xff]   ;;  %5941 = vmatpush1.bf16.msra.mxu0 %v9276_v27 }
  0x21   : > { %234 = vst [vmem:[#allocation2 + $0xd8] sm:$0xf] %v9724_v2  ;;  %235 = vst [vmem:[#allocation2 + $0xdc] sm:$0x1] %v9724_v2  ;;  %v9278_v29 = vld [vmem:[%s11925_s1 + $0xe4] ss:$16 sps:$4 sm:$0xff]   ;;  %6906 = vmatpush1.bf16.msra.mxu1 %v9277_v28 }
  0x22   : > { %236 = vst [vmem:[#allocation2 + $0xe0] sm:$0xf] %v9724_v2  ;;  %237 = vst [vmem:[#allocation2 + $0xe4] sm:$0x1] %v9724_v2  ;;  %v9280_v30 = vld [vmem:[%s11925_s1 + $0xec] ss:$16 sps:$4 sm:$0xff]   ;;  %5942 = vmatprep.subr.bf16.mxu0 %v9278_v29 }
  0x23   : > { %238 = vst [vmem:[#allocation2 + $0xe8] sm:$0xf] %v9724_v2  ;;  %239 = vst [vmem:[#allocation2 + $0xec] sm:$0x1] %v9724_v2  ;;  %v9282_v31 = vld [vmem:[%s11925_s1 + $0xe0] ss:$16 sps:$4 sm:$0xff]   ;;  %6907 = vmatprep.subr.bf16.mxu1 %v9280_v30 }
  0x24   : > { %240 = vst [vmem:[#allocation2 + $0xf0] sm:$0xf] %v9724_v2  ;;  %241 = vst [vmem:[#allocation2 + $0xf4] sm:$0x1] %v9724_v2  ;;  %v9283_v32 = vld [vmem:[%s11925_s1 + $0xe8] ss:$16 sps:$4 sm:$0xff]   ;;  %5943 = vmatpush1.bf16.msra.mxu0 %v9282_v31 }
  0x25   : > { %242 = vst [vmem:[#allocation2 + $0xf8] sm:$0xf] %v9724_v2  ;;  %243 = vst [vmem:[#allocation2 + $0xfc] sm:$0x1] %v9724_v2  ;;  %v9284_v33 = vld [vmem:[%s11925_s1 + $0x104] ss:$16 sps:$4 sm:$0xff]   ;;  %6908 = vmatpush1.bf16.msra.mxu1 %v9283_v32 }
  0x26   : > { %244 = vst [vmem:[#allocation2 + $0x100] sm:$0xf] %v9724_v2  ;;  %245 = vst [vmem:[#allocation2 + $0x104] sm:$0x1] %v9724_v2  ;;  %v9286_v34 = vld [vmem:[%s11925_s1 + $0x10c] ss:$16 sps:$4 sm:$0xff]   ;;  %5944 = vmatprep.subr.bf16.mxu0 %v9284_v33 }
  0x27   : > { %246 = vst [vmem:[#allocation2 + $0x108] sm:$0xf] %v9724_v2  ;;  %247 = vst [vmem:[#allocation2 + $0x10c] sm:$0x1] %v9724_v2  ;;  %v9288_v35 = vld [vmem:[%s11925_s1 + $0x100] ss:$16 sps:$4 sm:$0xff]   ;;  %6909 = vmatprep.subr.bf16.mxu1 %v9286_v34 }
  0x28   : > { %248 = vst [vmem:[#allocation2 + $0x110] sm:$0xf] %v9724_v2  ;;  %249 = vst [vmem:[#allocation2 + $0x114] sm:$0x1] %v9724_v2  ;;  %v9289_v36 = vld [vmem:[%s11925_s1 + $0x108] ss:$16 sps:$4 sm:$0xff]   ;;  %5945 = vmatpush1.bf16.msra.mxu0 %v9288_v35 }
  0x29   : > { %250 = vst [vmem:[#allocation2 + $0x118] sm:$0xf] %v9724_v2  ;;  %251 = vst [vmem:[#allocation2 + $0x11c] sm:$0x1] %v9724_v2  ;;  %v9290_v37 = vld [vmem:[%s11925_s1 + $0x124] ss:$16 sps:$4 sm:$0xff]   ;;  %6910 = vmatpush1.bf16.msra.mxu1 %v9289_v36 }
  0x2a   : > { %252 = vst [vmem:[#allocation2 + $0x120] sm:$0xf] %v9724_v2  ;;  %253 = vst [vmem:[#allocation2 + $0x124] sm:$0x1] %v9724_v2  ;;  %s11937_s24 = smov (!%p166_p3, %s8049_s24), 7  ;;  %5946 = vmatprep.subr.bf16.mxu0 %v9290_v37  ;;  %vm613_vm0 = vcmask 1043456  }
  0x2b   : > { %254 = vst [vmem:[#allocation2 + $0x128] sm:$0xf] %v9724_v2  ;;  %255 = vst [vmem:[#allocation2 + $0x12c] sm:$0x1] %v9724_v2  ;;  %v9292_v38 = vld [vmem:[%s11925_s1 + $0x12c] ss:$16 sps:$4 sm:$0xff]  }
  0x2c   : > { %256 = vst [vmem:[#allocation2 + $0x130] sm:$0xf] %v9724_v2  ;;  %257 = vst [vmem:[#allocation2 + $0x134] sm:$0x1] %v9724_v2  ;;  %v9294_v39 = vld [vmem:[%s11925_s1 + $0x120] ss:$16 sps:$4 sm:$0xff]   ;;  %6911 = vmatprep.subr.bf16.mxu1 %v9292_v38 }
  0x2d   : > { %258 = vst [vmem:[#allocation2 + $0x138] sm:$0xf] %v9724_v2  ;;  %259 = vst [vmem:[#allocation2 + $0x13c] sm:$0x1] %v9724_v2  ;;  %v9295_v40 = vld [vmem:[%s11925_s1 + $0x128] ss:$16 sps:$4 sm:$0xff]   ;;  %5947 = vmatpush1.bf16.msra.mxu0 %v9294_v39 }
  0x2e   : > { %v9296_v41 = vld [vmem:[%s11925_s1 + $0x144] ss:$16 sps:$4 sm:$0xff]   ;;  %s8585_s22 = sshll.u32 %s11937_s24, 5  ;;  %v9298_v42 = vld [vmem:[%s11925_s1 + $0x14c] ss:$16 sps:$4 sm:$0xff]   ;;  %6912 = vmatpush1.bf16.msra.mxu1 %v9295_v40  ;;  %vm619_vm1 = vcmask 1040384  }
  0x2f   : > { %v9300_v43 = vld [vmem:[%s11925_s1 + $0x140] ss:$16 sps:$4 sm:$0xff]   ;;  %v9301_v44 = vld [vmem:[%s11925_s1 + $0x148] ss:$16 sps:$4 sm:$0xff]   ;;  %s9976_s5 = scalar_lea.vmem %s11924_s0, %s8585_s22  ;;  %v9302_v45 = vld [vmem:[%s11925_s1 + $0x164] ss:$16 sps:$4 sm:$0xff]   ;;  %5948 = vmatprep.subr.bf16.mxu0 %v9296_v41  ;;  %6913 = vmatprep.subr.bf16.mxu1 %v9298_v42 }
  0x30   : > { %v9304_v46 = vld [vmem:[%s11925_s1 + $0x16c] ss:$16 sps:$4 sm:$0xff]   ;;  %vm614_vm2 = vsmask.f32 7938  ;;  %v9306_v47 = vld [vmem:[%s11925_s1 + $0x160] ss:$16 sps:$4 sm:$0xff]  }
  0x31   : > { %v260_v48 = vld [vmem:[%s9976_s5] sm:$0xf]  ;;  %vm620_vm3 = vsmask.f32 256  ;;  %v9307_v49 = vld [vmem:[%s11925_s1 + $0x168] ss:$16 sps:$4 sm:$0xff]   ;;  %5949 = vmatpush1.bf16.msra.mxu0 %v9300_v43  ;;  %vm9999_vm4 = vmand %vm613_vm0, %vm614_vm2 }
  0x32   : > { %v9308_v50 = vld [vmem:[%s11925_s1 + $0x184] ss:$16 sps:$4 sm:$0xff]   ;;  %v293_v51 = vshrl.u32 %v260_v48, 16  ;;  %v296_v52 = vshll.u32 %v260_v48, 16  ;;  %6914 = vmatpush1.bf16.msra.mxu1 %v9301_v44  ;;  %v9310_v53 = vld [vmem:[%s11925_s1 + $0x18c] ss:$16 sps:$4 sm:$0xff]   ;;  %5950 = vmatprep.subr.bf16.mxu0 %v9302_v45  ;;  %vm10008_vm5 = vmand %vm619_vm1, %vm620_vm3 }
  0x33   : > { %v616_v54 = vld [vmem:[#allocation2 + $0x8] sm:$0xf]  ;;  %v955_v55 = vld [vmem:[#allocation2] sm:$0xf]  ;;  %6915 = vmatprep.subr.bf16.mxu1 %v9304_v46  ;;  %v622_v58 = vld [vmem:[#allocation2 + $0xc] sm:$0x1] }
  0x34   : > { %v295_v56 = vrot.slane %v293_v51, 7  ;;  %v9312_v59 = vld [vmem:[%s11925_s1 + $0x180] ss:$16 sps:$4 sm:$0xff]   ;;  %v9313_v61 = vld [vmem:[%s11925_s1 + $0x188] ss:$16 sps:$4 sm:$0xff]   ;;  %v1023_v0 = vshrl.u32 %v955_v55, 16 }
  0x35   : > { %v1026_v1 = vshll.u32 %v955_v55, 16  ;;  %5951 = vmatpush1.bf16.msra.mxu0 %v9306_v47  ;;  %v9314_v3 = vld [vmem:[%s11925_s1 + $0x1a4] ss:$16 sps:$4 sm:$0xff]   ;;  %v9316_v5 = vld [vmem:[%s11925_s1 + $0x1ac] ss:$16 sps:$4 sm:$0xff]   ;;  %vm1678_vm9 = vcmask 1042432  }
  0x36   : > { %v298_v62 = vor.u32 %v296_v52, %v295_v56  ;;  %v299_v63 = vrot.slane %v295_v56, 4  ;;  %6916 = vmatpush1.bf16.msra.mxu1 %v9307_v49  ;;  %v956_v4 = vld [vmem:[#allocation2 + $0x4] sm:$0x1]  ;;  %5952 = vmatprep.subr.bf16.mxu0 %v9308_v50  ;;  %v262_v9 = vld [vmem:[%s9976_s5 + $0x8] sm:$0xf]  ;;  %v1025_v18 = vrot.slane %v1023_v0, 4 }
  0x37   : > { %6917 = vmatprep.subr.bf16.mxu1 %v9310_v53  ;;  %v261_v8 = vld [vmem:[%s9976_s5 + $0x4] sm:$0xf]  ;;  %v9318_v10 = vld [vmem:[%s11925_s1 + $0x1a0] ss:$16 sps:$4 sm:$0xff]   ;;  %v9319_v11 = vld [vmem:[%s11925_s1 + $0x1a8] ss:$16 sps:$4 sm:$0xff]  }
  0x38   : > { %v617_v6 = vsel %vm9999_vm4, %v298_v62, %v616_v54  ;;  %v623_v7 = vsel %vm10008_vm5, %v299_v63, %v622_v58  ;;  %vm1019_vm6 = vsmask.f32 3328  ;;  %vm1020_vm7 = vsmask.f32 7440  ;;  %v9320_v16 = vld [vmem:[%s11925_s1 + $0x1c4] ss:$16 sps:$4 sm:$0xff]  }
  0x39   : > { %618 = vst [vmem:[#allocation2 + $0x8] sm:$0xf] %v617_v6  ;;  %624 = vst [vmem:[#allocation2 + $0xc] sm:$0x1] %v623_v7  ;;  %v301_v12 = vshrl.u32 %v261_v8, 16  ;;  %v304_v13 = vshll.u32 %v261_v8, 16  ;;  %5953 = vmatpush1.bf16.msra.mxu0 %v9312_v59 }
  0x3a   : > { %v309_v14 = vshrl.u32 %v262_v9, 16  ;;  %v312_v15 = vshll.u32 %v262_v9, 16  ;;  %v9322_v17 = vld [vmem:[%s11925_s1 + $0x1cc] ss:$16 sps:$4 sm:$0xff]   ;;  %v1028_v19 = vrot.slane %v1026_v1, 5  ;;  %v1032_v20 = vshll.u32 %v956_v4, 16  ;;  %6918 = vmatpush1.bf16.msra.mxu1 %v9313_v61  ;;  %5954 = vmatprep.subr.bf16.mxu0 %v9314_v3  ;;  %vm10071_vm8 = vmor %vm1019_vm6, %vm1020_vm7 }
  0x3b   : > { %v303_v21 = vrot.slane %v301_v12, 7  ;;  %v625_v23 = vld [vmem:[#allocation2 + $0x10] sm:$0xf]  ;;  %6919 = vmatprep.subr.bf16.mxu1 %v9316_v5  ;;  %v628_v24 = vld [vmem:[#allocation2 + $0x14] sm:$0x1]  ;;  %vm1679_vm10 = vcmask 1046532  }
  0x3c   : > { %v311_v22 = vrot.slane %v309_v14, 7  ;;  %v631_v25 = vld [vmem:[#allocation2 + $0x18] sm:$0xf]  ;;  %v9324_v26 = vld [vmem:[%s11925_s1 + $0x1c0] ss:$16 sps:$4 sm:$0xff]   ;;  %v1029_v34 = vor.u32 %v1028_v19, %v1025_v18  ;;  %v10046_v35 = vrot.slane %v1032_v20, 5  ;;  %vm10483_vm11 = vmor %vm1678_vm9, %vm1679_vm10 }
  0x3d   : > { %v9325_v27 = vld [vmem:[%s11925_s1 + $0x1c8] ss:$16 sps:$4 sm:$0xff]   ;;  %v306_v28 = vor.u32 %v304_v13, %v303_v21  ;;  %v307_v29 = vrot.slane %v303_v21, 4  ;;  %v634_v32 = vld [vmem:[#allocation2 + $0x1c] sm:$0x1]  ;;  %5955 = vmatpush1.bf16.msra.mxu0 %v9318_v10  ;;  %s8052_s24 = sshll.u32 %s8044_s13, 5 }
  0x3e   : > { %v314_v30 = vor.u32 %v312_v15, %v311_v22  ;;  %v315_v31 = vrot.slane %v311_v22, 4  ;;  %v263_v33 = vld [vmem:[%s9976_s5 + $0xc] sm:$0xf]  ;;  %v264_v36 = vld [vmem:[%s9976_s5 + $0x10] sm:$0xf]  ;;  %6920 = vmatpush1.bf16.msra.mxu1 %v9319_v11  ;;  %5956 = vmatprep.subr.bf16.mxu0 %v9320_v16  ;;  %v1030_v61 = vrot.slane %v1029_v34, 4 }
  0x3f   : > { %v317_v37 = vshrl.u32 %v263_v33, 16  ;;  %v320_v38 = vshll.u32 %v263_v33, 16  ;;  %v9326_v39 = vld [vmem:[%s11925_s1 + $0x1e4] ss:$16 sps:$4 sm:$0xff]   ;;  %v9328_v40 = vld [vmem:[%s11925_s1 + $0x1ec] ss:$16 sps:$4 sm:$0xff]   ;;  %v626_v41 = vsel %vm9999_vm4, %v306_v28, %v625_v23  ;;  %v629_v42 = vsel %vm10008_vm5, %v307_v29, %v628_v24  ;;  %6921 = vmatprep.subr.bf16.mxu1 %v9322_v17 }
  0x40   : > { %v632_v43 = vsel %vm9999_vm4, %v314_v30, %v631_v25  ;;  %v325_v44 = vshrl.u32 %v264_v36, 16  ;;  %v957_v45 = vld [vmem:[#allocation2 + $0x8] sm:$0xf]  ;;  %v958_v46 = vld [vmem:[#allocation2 + $0xc] sm:$0x1]  ;;  %v635_v47 = vsel %vm10008_vm5, %v315_v31, %v634_v32  ;;  %v328_v58 = vshll.u32 %v264_v36, 16 }
  0x41   : > { %627 = vst [vmem:[#allocation2 + $0x10] sm:$0xf] %v626_v41  ;;  %630 = vst [vmem:[#allocation2 + $0x14] sm:$0x1] %v629_v42  ;;  %v637_v48 = vld [vmem:[#allocation2 + $0x20] sm:$0xf]  ;;  %5957 = vmatpush1.bf16.msra.mxu0 %v9324_v26  ;;  %v1035_v17 = vsel %vm10071_vm8, %v1030_v61, %v10046_v35 }
  0x42   : > { %633 = vst [vmem:[#allocation2 + $0x18] sm:$0xf] %v632_v43  ;;  %v9330_v49 = vld [vmem:[%s11925_s1 + $0x1e0] ss:$16 sps:$4 sm:$0xff]   ;;  %v9331_v50 = vld [vmem:[%s11925_s1 + $0x1e8] ss:$16 sps:$4 sm:$0xff]   ;;  %6922 = vmatpush1.bf16.msra.mxu1 %v9325_v27  ;;  %5958 = vmatprep.subr.bf16.mxu0 %v9326_v39 }
  0x43   : > { %v1037_v51 = vshrl.u32 %v957_v45, 16  ;;  %v1040_v52 = vshll.u32 %v957_v45, 16  ;;  %v1046_v53 = vshll.u32 %v958_v46, 16  ;;  %636 = vst [vmem:[#allocation2 + $0x1c] sm:$0x1] %v635_v47  ;;  %v319_v54 = vrot.slane %v317_v37, 7  ;;  %6923 = vmatprep.subr.bf16.mxu1 %v9328_v40 }
  0x44   : > { %v640_v55 = vld [vmem:[#allocation2 + $0x24] sm:$0x1]  ;;  %v327_v56 = vrot.slane %v325_v44, 7  ;;  %v643_v59 = vld [vmem:[#allocation2 + $0x28] sm:$0xf]  ;;  %p173_p4 = scmp.lt.s32.totalorder %s8052_s24, 63 }
  0x45   : > { %v1039_v62 = vrot.slane %v1037_v51, 4  ;;  %v1042_v63 = vrot.slane %v1040_v52, 5  ;;  %v322_v0 = vor.u32 %v320_v38, %v319_v54  ;;  %v646_v1 = vld [vmem:[#allocation2 + $0x2c] sm:$0x1]  ;;  %v9335_v4 = vld [vmem:[%s11925_s1 + $0x204] ss:$16 sps:$4 sm:$0xff]   ;;  %5959 = vmatpush1.bf16.msra.mxu0 %v9330_v49 }
  0x46   : > { %v9338_v5 = vld [vmem:[%s11925_s1 + $0x20c] ss:$16 sps:$4 sm:$0xff]   ;;  %v323_v6 = vrot.slane %v319_v54, 4  ;;  %v330_v7 = vor.u32 %v328_v58, %v327_v56  ;;  %v331_v8 = vrot.slane %v327_v56, 4  ;;  %v1048_v10 = vrot.slane %v1046_v53, 5  ;;  %6924 = vmatpush1.bf16.msra.mxu1 %v9331_v50  ;;  %6121 = vmatprep.subr.bf16.mxu0 %v9335_v4  ;;  %s11939_s24 = smov (!%p173_p4, %s8052_s24), 63 }
  0x47   : > { %v1043_v9 = vor.u32 %v1042_v63, %v1039_v62  ;;  %v638_v11 = vsel %vm9999_vm4, %v322_v0, %v637_v48  ;;  %v265_v12 = vld [vmem:[%s9976_s5 + $0x14] sm:$0xf]  ;;  %v9332_v19 = vld [vmem:[#allocation2] ss:$8 sps:$4 sm:$0xff]   ;;  %v10094_v22 = vld [vmem:[%s9976_s5 + $0x18] sm:$0xf]  ;;  %7086 = vmatprep.subr.bf16.mxu1 %v9338_v5 }
  0x48   : > { %639 = vst [vmem:[#allocation2 + $0x20] sm:$0xf] %v638_v11  ;;  %v641_v13 = vsel %vm10008_vm5, %v323_v6, %v640_v55  ;;  %v644_v14 = vsel %vm9999_vm4, %v330_v7, %v643_v59  ;;  %v647_v15 = vsel %vm10008_vm5, %v331_v8, %v646_v1  ;;  %v333_v16 = vshrl.u32 %v265_v12, 16  ;;  %v959_v20 = vld [vmem:[#allocation2 + $0x10] sm:$0xf]  ;;  %s8586_s7 = sshll.u32 %s11939_s24, 5 }
  0x49   : > { %v1044_v18 = vrot.slane %v1043_v9, 4  ;;  %v960_v21 = vld [vmem:[#allocation2 + $0x14] sm:$0x1]  ;;  %642 = vst [vmem:[#allocation2 + $0x24] sm:$0x1] %v641_v13  ;;  %v336_v23 = vshll.u32 %v265_v12, 16  ;;  %s11663_s9 = scalar_lea.vmem %s11927_s3, %s8586_s7 }
  0x4a   : > { %645 = vst [vmem:[#allocation2 + $0x28] sm:$0xf] %v644_v14  ;;  %648 = vst [vmem:[#allocation2 + $0x2c] sm:$0x1] %v647_v15  ;;  %v9333_v24 = vld [vmem:[%s11925_s1 + $0x200] ss:$16 sps:$4 sm:$0xff]  }
  0x4b   : > { %v9336_v25 = vld [vmem:[%s11925_s1 + $0x208] ss:$16 sps:$4 sm:$0xff]   ;;  %v962_v27 = vld [vmem:[#allocation2 + $0x1c] sm:$0x1]  ;;  %v1051_v28 = vshrl.u32 %v959_v20, 16  ;;  %v1054_v29 = vshll.u32 %v959_v20, 16  ;;  %v1049_v30 = vsel %vm10071_vm8, %v1044_v18, %v1048_v10 }
  0x4c   : > { %v961_v26 = vld [vmem:[#allocation2 + $0x18] sm:$0xf]  ;;  %v1060_v31 = vshll.u32 %v960_v21, 16  ;;  %v9342_v34 = vld [vmem:[%s11925_s1 + $0x224] ss:$16 sps:$4 sm:$0xff]   ;;  %v8071_v35 = vcombine.low %v1035_v17, %v1049_v30  ;;  %v1074_v38 = vshll.u32 %v962_v27, 16 }
  0x4d   : > { %v1065_v32 = vshrl.u32 %v961_v26, 16  ;;  %v1068_v33 = vshll.u32 %v961_v26, 16  ;;  %v1053_v36 = vrot.slane %v1051_v28, 4  ;;  %v1056_v37 = vrot.slane %v1054_v29, 5  ;;  %v9345_v42 = vld [vmem:[%s11925_s1 + $0x22c] ss:$16 sps:$4 sm:$0xff]  }
  0x4e   : > { %v1062_v39 = vrot.slane %v1060_v31, 5  ;;  %v335_v43 = vrot.slane %v333_v16, 7  ;;  %5960 = vmatprep.mubr.bf16.mxu0 %v8071_v35  ;;  %6925 = vmatprep.mubr.bf16.mxu1 %v8071_v35  ;;  %v1076_v45 = vrot.slane %v1074_v38, 5  ;;  %v9340_v46 = vld [vmem:[%s11925_s1 + $0x220] ss:$16 sps:$4 sm:$0xff]   ;;  %v341_v48 = vshrl.u32 %v10094_v22, 16 }
  0x4f   : > { %v1067_v40 = vrot.slane %v1065_v32, 4  ;;  %v1070_v41 = vrot.slane %v1068_v33, 5  ;;  %v1057_v44 = vor.u32 %v1056_v37, %v1053_v36  ;;  %v9343_v47 = vld [vmem:[%s11925_s1 + $0x228] ss:$16 sps:$4 sm:$0xff]   ;;  %v344_v49 = vshll.u32 %v10094_v22, 16  ;;  %5961 = vmatmul.mubr.bf16.vlgmr.msra.gmra.mrb[0].mxu0 %v9332_v19  ;;  %6926 = vmatmul.mubr.bf16.vlgmr.msra.gmra.mrb[0].mxu1 %v9332_v19 }
  0x50   : > { %v963_v51 = vld [vmem:[#allocation2 + $0x20] sm:$0xf]  ;;  %v9349_v52 = vld [vmem:[%s11925_s1 + $0x244] ss:$16 sps:$4 sm:$0xff]   ;;  %v9352_v53 = vld [vmem:[%s11925_s1 + $0x24c] ss:$16 sps:$4 sm:$0xff]   ;;  %6122 = vmatpush1.bf16.msra.mxu0 %v9333_v24  ;;  %7087 = vmatpush1.bf16.msra.mxu1 %v9336_v25  ;;  %v338_v61 = vor.u32 %v336_v23, %v335_v43 }
  0x51   : > { %v1071_v50 = vor.u32 %v1070_v41, %v1067_v40  ;;  %v339_v54 = vrot.slane %v335_v43, 4  ;;  %v1058_v55 = vrot.slane %v1057_v44, 4  ;;  %v964_v56 = vld [vmem:[#allocation2 + $0x24] sm:$0x1]  ;;  %v965_v58 = vld [vmem:[#allocation2 + $0x28] sm:$0xf]  ;;  %6123 = vmatprep.subr.bf16.mxu0 %v9342_v34  ;;  %7088 = vmatprep.subr.bf16.mxu1 %v9345_v42 }
  0x52   : > { %v1079_v59 = vshrl.u32 %v963_v51, 16  ;;  %v649_v62 = vld [vmem:[#allocation2 + $0x30] sm:$0xf]  ;;  %v652_v63 = vld [vmem:[#allocation2 + $0x34] sm:$0x1]  ;;  %v1082_v4 = vshll.u32 %v963_v51, 16 }
  0x53   : > { %v1072_v0 = vrot.slane %v1071_v50, 4  ;;  %v966_v1 = vld [vmem:[#allocation2 + $0x2c] sm:$0x1]  ;;  %v1088_v5 = vshll.u32 %v964_v56, 16  ;;  %v1093_v6 = vshrl.u32 %v965_v58, 16  ;;  %v1063_v7 = vsel %vm10071_vm8, %v1058_v55, %v1062_v39 }
  0x54   : > { %v1081_v8 = vrot.slane %v1079_v59, 4  ;;  %v1096_v9 = vshll.u32 %v965_v58, 16  ;;  %v1102_v10 = vshll.u32 %v966_v1, 16  ;;  %v9347_v11 = vld [vmem:[%s11925_s1 + $0x240] ss:$16 sps:$4 sm:$0xff]   ;;  %v1084_v15 = vrot.slane %v1082_v4, 5  ;;  %6124 = vmatpush1.bf16.msra.mxu0 %v9340_v46  ;;  %7089 = vmatpush1.bf16.msra.mxu1 %v9343_v47 }
  0x55   : > { %v9350_v12 = vld [vmem:[%s11925_s1 + $0x248] ss:$16 sps:$4 sm:$0xff]   ;;  %v1077_v13 = vsel %vm10071_vm8, %v1072_v0, %v1076_v45  ;;  %v1095_v16 = vrot.slane %v1093_v6, 4  ;;  %v1090_v18 = vrot.slane %v1088_v5, 5  ;;  %v343_v20 = vrot.slane %v341_v48, 7  ;;  %6125 = vmatprep.subr.bf16.mxu0 %v9349_v52  ;;  %7090 = vmatprep.subr.bf16.mxu1 %v9352_v53 }
  0x56   : > { %v9339_v14 = vld [vmem:[#allocation2 + $0x10] ss:$8 sps:$4 sm:$0xff]   ;;  %v8072_v17 = vcombine.low %v1063_v7, %v1077_v13  ;;  %v1098_v19 = vrot.slane %v1096_v9, 5  ;;  %v1085_v22 = vor.u32 %v1084_v15, %v1081_v8  ;;  %v1104_v23 = vrot.slane %v1102_v10, 5  ;;  %v658_v26 = vld [vmem:[#allocation2 + $0x3c] sm:$0x1] }
  0x57   : > { %v655_v21 = vld [vmem:[#allocation2 + $0x38] sm:$0xf]  ;;  %v650_v24 = vsel %vm9999_vm4, %v338_v61, %v649_v62  ;;  %v653_v25 = vsel %vm10008_vm5, %v339_v54, %v652_v63  ;;  %v9356_v27 = vld [vmem:[%s11925_s1 + $0x264] ss:$16 sps:$4 sm:$0xff]   ;;  %v346_v29 = vor.u32 %v344_v49, %v343_v20  ;;  %v347_v30 = vrot.slane %v343_v20, 4 }
  0x58   : > { %5970 = vmatprep.mubr.bf16.mxu0 %v8072_v17  ;;  %6935 = vmatprep.mubr.bf16.mxu1 %v8072_v17  ;;  %v1099_v28 = vor.u32 %v1098_v19, %v1095_v16  ;;  %651 = vst [vmem:[#allocation2 + $0x30] sm:$0xf] %v650_v24  ;;  %654 = vst [vmem:[#allocation2 + $0x34] sm:$0x1] %v653_v25  ;;  %v9354_v31 = vld [vmem:[%s11925_s1 + $0x260] ss:$16 sps:$4 sm:$0xff]  }
  0x59   : > { %v9359_v32 = vld [vmem:[%s11925_s1 + $0x26c] ss:$16 sps:$4 sm:$0xff]   ;;  %v268_v33 = vld [vmem:[%s9976_s5 + $0x20] sm:$0xf]  ;;  %5971 = vmatmul.mubr.bf16.gmra.mrb[4].mxu0 %v9339_v14  ;;  %6936 = vmatmul.mubr.bf16.gmra.mrb[4].mxu1 %v9339_v14  ;;  %v1086_v34 = vrot.slane %v1085_v22, 4  ;;  %v656_v39 = vsel %vm9999_vm4, %v346_v29, %v655_v21  ;;  %v659_v40 = vsel %vm10008_vm5, %v347_v30, %v658_v26 }
  0x5a   : > { %v9357_v35 = vld [vmem:[%s11925_s1 + $0x268] ss:$16 sps:$4 sm:$0xff]   ;;  %v357_v36 = vshrl.u32 %v268_v33, 16  ;;  %v360_v37 = vshll.u32 %v268_v33, 16  ;;  %v1100_v38 = vrot.slane %v1099_v28, 4  ;;  %6126 = vmatpush1.bf16.msra.mxu0 %v9347_v11  ;;  %7091 = vmatpush1.bf16.msra.mxu1 %v9350_v12 }
  0x5b   : > { %v667_v41 = vld [vmem:[#allocation2 + $0x58] sm:$0xf]  ;;  %v670_v42 = vld [vmem:[#allocation2 + $0x5c] sm:$0x1]  ;;  %v971_v43 = vld [vmem:[#allocation2 + $0x50] sm:$0xf]  ;;  %v1091_v44 = vsel %vm10071_vm8, %v1086_v34, %v1090_v18  ;;  %6127 = vmatprep.subr.bf16.mxu0 %v9356_v27  ;;  %7092 = vmatprep.subr.bf16.mxu1 %v9359_v32 }
  0x5c   : > { %v9346_v45 = vld [vmem:[#allocation2 + $0x20] ss:$8 sps:$4 sm:$0xff]   ;;  %657 = vst [vmem:[#allocation2 + $0x38] sm:$0xf] %v656_v39  ;;  %660 = vst [vmem:[#allocation2 + $0x3c] sm:$0x1] %v659_v40  ;;  %v1105_v50 = vsel %vm10071_vm8, %v1100_v38, %v1104_v23 }
  0x5d   : > { %v359_v46 = vrot.slane %v357_v36, 7  ;;  %v972_v47 = vld [vmem:[#allocation2 + $0x54] sm:$0x1]  ;;  %v1135_v48 = vshrl.u32 %v971_v43, 16  ;;  %v1138_v49 = vshll.u32 %v971_v43, 16  ;;  %v8073_v53 = vcombine.low %v1091_v44, %v1105_v50 }
  0x5e   : > { %v1144_v51 = vshll.u32 %v972_v47, 16  ;;  %v9361_v52 = vld [vmem:[%s11925_s1 + $0x280] ss:$16 sps:$4 sm:$0xff]   ;;  %v9363_v58 = vld [vmem:[%s11925_s1 + $0x284] ss:$16 sps:$4 sm:$0xff]   ;;  %6128 = vmatpush1.bf16.msra.mxu0 %v9354_v31  ;;  %7093 = vmatpush1.bf16.msra.mxu1 %v9357_v35 }
  0x5f   : > { %v362_v54 = vor.u32 %v360_v37, %v359_v46  ;;  %v363_v55 = vrot.slane %v359_v46, 4  ;;  %v1137_v56 = vrot.slane %v1135_v48, 4  ;;  %v9364_v59 = vld [vmem:[%s11925_s1 + $0x288] ss:$16 sps:$4 sm:$0xff]   ;;  %v1140_v61 = vrot.slane %v1138_v49, 5  ;;  %5980 = vmatprep.mubr.bf16.mxu0 %v8073_v53  ;;  %6945 = vmatprep.mubr.bf16.mxu1 %v8073_v53 }
  0x60   : > { %v10168_v62 = vrot.slane %v1144_v51, 5  ;;  %v9366_v63 = vld [vmem:[%s11925_s1 + $0x28c] ss:$16 sps:$4 sm:$0xff]   ;;  %v269_v0 = vld [vmem:[%s9976_s5 + $0x24] sm:$0xf]  ;;  %6129 = vmatprep.subr.bf16.mxu0 %v9363_v58 }
  0x61   : > { %v967_v1 = vld [vmem:[#allocation2 + $0x30] sm:$0xf]  ;;  %v968_v4 = vld [vmem:[#allocation2 + $0x34] sm:$0x1]  ;;  %v668_v5 = vsel %vm9999_vm4, %v362_v54, %v667_v41  ;;  %v671_v6 = vsel %vm10008_vm5, %v363_v55, %v670_v42  ;;  %7094 = vmatprep.subr.bf16.mxu1 %v9366_v63  ;;  %v270_v10 = vld [vmem:[%s9976_s5 + $0x28] sm:$0xf]  ;;  %5981 = vmatmul.mubr.bf16.gmra.mrb[8].mxu0 %v9346_v45  ;;  %v1141_v11 = vor.u32 %v1140_v61, %v1137_v56 }
  0x62   : > { %v1107_v7 = vshrl.u32 %v967_v1, 16  ;;  %v1110_v8 = vshll.u32 %v967_v1, 16  ;;  %v1116_v9 = vshll.u32 %v968_v4, 16  ;;  %669 = vst [vmem:[#allocation2 + $0x58] sm:$0xf] %v668_v5  ;;  %6946 = vmatmul.mubr.bf16.gmra.mrb[8].mxu1 %v9346_v45  ;;  %v365_v12 = vshrl.u32 %v269_v0, 16  ;;  %6130 = vmatpush1.bf16.msra.mxu0 %v9361_v52 }
  0x63   : > { %672 = vst [vmem:[#allocation2 + $0x5c] sm:$0x1] %v671_v6  ;;  %v368_v13 = vshll.u32 %v269_v0, 16  ;;  %v373_v14 = vshrl.u32 %v270_v10, 16  ;;  %v969_v15 = vld [vmem:[#allocation2 + $0x38] sm:$0xf]  ;;  %7095 = vmatpush1.bf16.msra.mxu1 %v9364_v59 }
  0x64   : > { %v970_v16 = vld [vmem:[#allocation2 + $0x3c] sm:$0x1]  ;;  %v1109_v17 = vrot.slane %v1107_v7, 4  ;;  %v1112_v18 = vrot.slane %v1110_v8, 5  ;;  %v1121_v19 = vshrl.u32 %v969_v15, 16  ;;  %v1124_v20 = vshll.u32 %v969_v15, 16 }
  0x65   : > { %v1130_v21 = vshll.u32 %v970_v16, 16  ;;  %v376_v22 = vshll.u32 %v270_v10, 16  ;;  %v1118_v24 = vrot.slane %v1116_v9, 5  ;;  %v367_v25 = vrot.slane %v365_v12, 7  ;;  %v673_v27 = vld [vmem:[#allocation2 + $0x60] sm:$0xf] }
  0x66   : > { %v1113_v23 = vor.u32 %v1112_v18, %v1109_v17  ;;  %v375_v26 = vrot.slane %v373_v14, 7  ;;  %v1123_v28 = vrot.slane %v1121_v19, 4  ;;  %v1126_v29 = vrot.slane %v1124_v20, 5  ;;  %v676_v35 = vld [vmem:[#allocation2 + $0x64] sm:$0x1] }
  0x67   : > { %v1132_v30 = vrot.slane %v1130_v21, 5  ;;  %v10179_v31 = vrot.slane %v1141_v11, 4  ;;  %v370_v33 = vor.u32 %v368_v13, %v367_v25  ;;  %v371_v34 = vrot.slane %v367_v25, 4  ;;  %v679_v36 = vld [vmem:[#allocation2 + $0x68] sm:$0xf] }
  0x68   : > { %v1114_v32 = vrot.slane %v1113_v23, 4  ;;  %v1127_v37 = vor.u32 %v1126_v29, %v1123_v28  ;;  %v378_v40 = vor.u32 %v376_v22, %v375_v26  ;;  %v682_v45 = vld [vmem:[#allocation2 + $0x6c] sm:$0x1]  ;;  %v379_v47 = vrot.slane %v375_v26, 4  ;;  %v9368_v50 = vld [vmem:[%s11925_s1 + $0x2a0] ss:$16 sps:$4 sm:$0xff]  }
  0x69   : > { %v973_v38 = vld [vmem:[#allocation2 + $0x58] sm:$0xf]  ;;  %v674_v48 = vsel %vm9999_vm4, %v370_v33, %v673_v27  ;;  %v677_v49 = vsel %vm10008_vm5, %v371_v34, %v676_v35  ;;  %v9370_v51 = vld [vmem:[%s11925_s1 + $0x2a4] ss:$16 sps:$4 sm:$0xff]   ;;  %v9373_v61 = vld [vmem:[%s11925_s1 + $0x2ac] ss:$16 sps:$4 sm:$0xff]   ;;  %v1147_v10 = vsel %vm10071_vm8, %v10179_v31, %v10168_v62 }
  0x6a   : > { %v974_v39 = vld [vmem:[#allocation2 + $0x5c] sm:$0x1]  ;;  %v1119_v41 = vsel %vm10071_vm8, %v1114_v32, %v1118_v24  ;;  %v1149_v42 = vshrl.u32 %v973_v38, 16  ;;  %v1152_v43 = vshll.u32 %v973_v38, 16  ;;  %v1128_v46 = vrot.slane %v1127_v37, 4  ;;  %6131 = vmatprep.subr.bf16.mxu0 %v9370_v51  ;;  %7096 = vmatprep.subr.bf16.mxu1 %v9373_v61 }
  0x6b   : > { %v1158_v44 = vshll.u32 %v974_v39, 16  ;;  %v9353_v52 = vld [vmem:[#allocation2 + $0x30] ss:$8 sps:$4 sm:$0xff]   ;;  %675 = vst [vmem:[#allocation2 + $0x60] sm:$0xf] %v674_v48  ;;  %v680_v56 = vsel %vm9999_vm4, %v378_v40, %v679_v36  ;;  %v683_v59 = vsel %vm10008_vm5, %v379_v47, %v682_v45  ;;  %6132 = vmatpush1.bf16.msra.mxu0 %v9368_v50 }
  0x6c   : > { %v1151_v53 = vrot.slane %v1149_v42, 4  ;;  %v1154_v54 = vrot.slane %v1152_v43, 5  ;;  %678 = vst [vmem:[#allocation2 + $0x64] sm:$0x1] %v677_v49  ;;  %v1133_v58 = vsel %vm10071_vm8, %v1128_v46, %v1132_v30  ;;  %681 = vst [vmem:[#allocation2 + $0x68] sm:$0xf] %v680_v56 }
  0x6d   : > { %v1160_v55 = vrot.slane %v1158_v44, 5  ;;  %v271_v63 = vld [vmem:[%s9976_s5 + $0x2c] sm:$0xf]  ;;  %v272_v0 = vld [vmem:[%s9976_s5 + $0x30] sm:$0xf]  ;;  %v8074_v1 = vcombine.low %v1119_v41, %v1133_v58 }
  0x6e   : > { %v1155_v4 = vor.u32 %v1154_v54, %v1151_v53  ;;  %684 = vst [vmem:[#allocation2 + $0x6c] sm:$0x1] %v683_v59  ;;  %v9371_v5 = vld [vmem:[%s11925_s1 + $0x2a8] ss:$16 sps:$4 sm:$0xff]   ;;  %v381_v6 = vshrl.u32 %v271_v63, 16  ;;  %v384_v7 = vshll.u32 %v271_v63, 16 }
  0x6f   : > { %v389_v8 = vshrl.u32 %v272_v0, 16  ;;  %v392_v9 = vshll.u32 %v272_v0, 16  ;;  %5990 = vmatprep.mubr.bf16.mxu0 %v8074_v1  ;;  %6955 = vmatprep.mubr.bf16.mxu1 %v8074_v1  ;;  %v685_v13 = vld [vmem:[#allocation2 + $0x70] sm:$0xf]  ;;  %v9377_v15 = vld [vmem:[%s11925_s1 + $0x2c4] ss:$16 sps:$4 sm:$0xff]  }
  0x70   : > { %v1156_v11 = vrot.slane %v1155_v4, 4  ;;  %v383_v12 = vrot.slane %v381_v6, 7  ;;  %v9375_v14 = vld [vmem:[%s11925_s1 + $0x2c0] ss:$16 sps:$4 sm:$0xff]   ;;  %5991 = vmatmul.mubr.bf16.gmra.mrb[12].mxu0 %v9353_v52  ;;  %6956 = vmatmul.mubr.bf16.gmra.mrb[12].mxu1 %v9353_v52  ;;  %v688_v17 = vld [vmem:[#allocation2 + $0x74] sm:$0x1] }
  0x71   : > { %v391_v16 = vrot.slane %v389_v8, 7  ;;  %v9380_v18 = vld [vmem:[%s11925_s1 + $0x2cc] ss:$16 sps:$4 sm:$0xff]   ;;  %7097 = vmatpush1.bf16.msra.mxu1 %v9371_v5  ;;  %v691_v21 = vld [vmem:[#allocation2 + $0x78] sm:$0xf]  ;;  %6133 = vmatprep.subr.bf16.mxu0 %v9377_v15 }
  0x72   : > { %v1161_v62 = vsel %vm10071_vm8, %v1156_v11, %v1160_v55  ;;  %v386_v19 = vor.u32 %v384_v7, %v383_v12  ;;  %v387_v20 = vrot.slane %v383_v12, 4  ;;  %v694_v22 = vld [vmem:[#allocation2 + $0x7c] sm:$0x1]  ;;  %v9378_v23 = vld [vmem:[%s11925_s1 + $0x2c8] ss:$16 sps:$4 sm:$0xff]   ;;  %7098 = vmatprep.subr.bf16.mxu1 %v9380_v18  ;;  %6134 = vmatpush1.bf16.msra.mxu0 %v9375_v14 }
  0x73   : > { %v8075_v24 = vcombine.low %v1147_v10, %v1161_v62  ;;  %v9360_v25 = vld [vmem:[#allocation2 + $0x50] ss:$8 sps:$4 sm:$0xff]   ;;  %v975_v26 = vld [vmem:[#allocation2 + $0x60] sm:$0xf]  ;;  %v976_v27 = vld [vmem:[#allocation2 + $0x64] sm:$0x1]  ;;  %v394_v28 = vor.u32 %v392_v9, %v391_v16 }
  0x74   : > { %v273_v29 = vld [vmem:[%s9976_s5 + $0x34] sm:$0xf]  ;;  %v977_v30 = vld [vmem:[#allocation2 + $0x68] sm:$0xf]  ;;  %v1163_v31 = vshrl.u32 %v975_v26, 16  ;;  %v1166_v32 = vshll.u32 %v975_v26, 16  ;;  %v686_v38 = vsel %vm9999_vm4, %v386_v19, %v685_v13  ;;  %v689_v39 = vsel %vm10008_vm5, %v387_v20, %v688_v17 }
  0x75   : > { %v1172_v33 = vshll.u32 %v976_v27, 16  ;;  %v395_v34 = vrot.slane %v391_v16, 4  ;;  %6000 = vmatprep.mubr.bf16.mxu0 %v8075_v24  ;;  %6965 = vmatprep.mubr.bf16.mxu1 %v8075_v24  ;;  %v978_v35 = vld [vmem:[#allocation2 + $0x6c] sm:$0x1]  ;;  %v1177_v36 = vshrl.u32 %v977_v30, 16  ;;  %v1180_v37 = vshll.u32 %v977_v30, 16 }
  0x76   : > { %v1165_v40 = vrot.slane %v1163_v31, 4  ;;  %v1168_v41 = vrot.slane %v1166_v32, 5  ;;  %v1186_v42 = vshll.u32 %v978_v35, 16  ;;  %687 = vst [vmem:[#allocation2 + $0x70] sm:$0xf] %v686_v38  ;;  %7099 = vmatpush1.bf16.msra.mxu1 %v9378_v23  ;;  %v692_v46 = vsel %vm9999_vm4, %v394_v28, %v691_v21 }
  0x77   : > { %690 = vst [vmem:[#allocation2 + $0x74] sm:$0x1] %v689_v39  ;;  %v274_v43 = vld [vmem:[%s9976_s5 + $0x38] sm:$0xf]  ;;  %v1179_v44 = vrot.slane %v1177_v36, 4  ;;  %v1182_v45 = vrot.slane %v1180_v37, 5  ;;  %v695_v47 = vsel %vm10008_vm5, %v395_v34, %v694_v22 }
  0x78   : > { %v1169_v48 = vor.u32 %v1168_v41, %v1165_v40  ;;  %v1174_v49 = vrot.slane %v1172_v33, 5  ;;  %693 = vst [vmem:[#allocation2 + $0x78] sm:$0xf] %v692_v46  ;;  %696 = vst [vmem:[#allocation2 + $0x7c] sm:$0x1] %v695_v47  ;;  %v397_v50 = vshrl.u32 %v273_v29, 16  ;;  %6001 = vmatmul.mubr.bf16.gmra.mrb[16].mxu0 %v9360_v25  ;;  %6966 = vmatmul.mubr.bf16.gmra.mrb[16].mxu1 %v9360_v25 }
  0x79   : > { %v400_v51 = vshll.u32 %v273_v29, 16  ;;  %v1183_v52 = vor.u32 %v1182_v45, %v1179_v44  ;;  %v1188_v53 = vrot.slane %v1186_v42, 5  ;;  %v405_v54 = vshrl.u32 %v274_v43, 16  ;;  %v9382_v56 = vld [vmem:[%s11925_s1 + $0x2e0] ss:$16 sps:$4 sm:$0xff]  }
  0x7a   : > { %v408_v55 = vshll.u32 %v274_v43, 16  ;;  %v1170_v58 = vrot.slane %v1169_v48, 4  ;;  %v399_v59 = vrot.slane %v397_v50, 7  ;;  %v697_v61 = vld [vmem:[#allocation2 + $0x80] sm:$0xf] }
  0x7b   : > { %v9384_v63 = vld [vmem:[%s11925_s1 + $0x2e4] ss:$16 sps:$4 sm:$0xff]   ;;  %v9385_v0 = vld [vmem:[%s11925_s1 + $0x2e8] ss:$16 sps:$4 sm:$0xff]   ;;  %v1184_v1 = vrot.slane %v1183_v52, 4  ;;  %v407_v5 = vrot.slane %v405_v54, 7 }
  0x7c   : > { %v9367_v4 = vld [vmem:[#allocation2 + $0x60] ss:$8 sps:$4 sm:$0xff]   ;;  %v9387_v6 = vld [vmem:[%s11925_s1 + $0x2ec] ss:$16 sps:$4 sm:$0xff]   ;;  %v1175_v8 = vsel %vm10071_vm8, %v1170_v58, %v1174_v49  ;;  %v402_v9 = vor.u32 %v400_v51, %v399_v59  ;;  %v403_v10 = vrot.slane %v399_v59, 4  ;;  %6135 = vmatprep.subr.bf16.mxu0 %v9384_v63 }
  0x7d   : > { %v276_v7 = vld [vmem:[%s9976_s5 + $0x40] sm:$0xf]  ;;  %v700_v11 = vld [vmem:[#allocation2 + $0x84] sm:$0x1]  ;;  %v703_v12 = vld [vmem:[#allocation2 + $0x88] sm:$0xf]  ;;  %v1189_v14 = vsel %vm10071_vm8, %v1184_v1, %v1188_v53  ;;  %v410_v17 = vor.u32 %v408_v55, %v407_v5  ;;  %7100 = vmatprep.subr.bf16.mxu1 %v9387_v6  ;;  %6136 = vmatpush1.bf16.msra.mxu0 %v9382_v56 }
  0x7e   : > { %v421_v13 = vshrl.u32 %v276_v7, 16  ;;  %v979_v15 = vld [vmem:[#allocation2 + $0x70] sm:$0xf]  ;;  %v980_v16 = vld [vmem:[#allocation2 + $0x74] sm:$0x1]  ;;  %v8076_v18 = vcombine.low %v1175_v8, %v1189_v14  ;;  %7101 = vmatpush1.bf16.msra.mxu1 %v9385_v0  ;;  %v698_v25 = vsel %vm9999_vm4, %v402_v9, %v697_v61  ;;  %v701_v26 = vsel %vm10008_vm5, %v403_v10, %v700_v11 }
  0x7f   : > { %v1191_v62 = vshrl.u32 %v979_v15, 16  ;;  %v1194_v19 = vshll.u32 %v979_v15, 16  ;;  %v1200_v20 = vshll.u32 %v980_v16, 16  ;;  %v706_v21 = vld [vmem:[#allocation2 + $0x8c] sm:$0x1]  ;;  %v704_v27 = vsel %vm9999_vm4, %v410_v17, %v703_v12 }
  0x80   : > { %v987_v22 = vld [vmem:[#allocation2 + $0xa0] sm:$0xf]  ;;  %v981_v23 = vld [vmem:[#allocation2 + $0x78] sm:$0xf]  ;;  %v982_v24 = vld [vmem:[#allocation2 + $0x7c] sm:$0x1]  ;;  %6010 = vmatprep.mubr.bf16.mxu0 %v8076_v18  ;;  %6975 = vmatprep.mubr.bf16.mxu1 %v8076_v18 }
  0x81   : > { %v1193_v28 = vrot.slane %v1191_v62, 4  ;;  %v1196_v29 = vrot.slane %v1194_v19, 5  ;;  %v1202_v30 = vrot.slane %v1200_v20, 5  ;;  %v1205_v31 = vshrl.u32 %v981_v23, 16  ;;  %699 = vst [vmem:[#allocation2 + $0x80] sm:$0xf] %v698_v25  ;;  %6011 = vmatmul.mubr.bf16.gmra.mrb[20].mxu0 %v9367_v4  ;;  %6976 = vmatmul.mubr.bf16.gmra.mrb[20].mxu1 %v9367_v4 }
  0x82   : > { %702 = vst [vmem:[#allocation2 + $0x84] sm:$0x1] %v701_v26  ;;  %705 = vst [vmem:[#allocation2 + $0x88] sm:$0xf] %v704_v27  ;;  %v718_v32 = vld [vmem:[#allocation2 + $0xac] sm:$0x1] }
  0x83   : > { %v1208_v33 = vshll.u32 %v981_v23, 16  ;;  %v1214_v34 = vshll.u32 %v982_v24, 16  ;;  %v411_v35 = vrot.slane %v407_v5, 4  ;;  %v423_v36 = vrot.slane %v421_v13, 7  ;;  %v715_v37 = vld [vmem:[#allocation2 + $0xa8] sm:$0xf] }
  0x84   : > { %v988_v38 = vld [vmem:[#allocation2 + $0xa4] sm:$0x1]  ;;  %v1197_v39 = vor.u32 %v1196_v29, %v1193_v28  ;;  %v1207_v40 = vrot.slane %v1205_v31, 4  ;;  %v424_v41 = vshll.u32 %v276_v7, 16  ;;  %v1247_v42 = vshrl.u32 %v987_v22, 16 }
  0x85   : > { %v1210_v43 = vrot.slane %v1208_v33, 5  ;;  %v1216_v44 = vrot.slane %v1214_v34, 5  ;;  %v707_v45 = vsel %vm10008_vm5, %v411_v35, %v706_v21  ;;  %v427_v46 = vrot.slane %v423_v36, 4  ;;  %v9389_v47 = vld [vmem:[%s11925_s1 + $0x300] ss:$16 sps:$4 sm:$0xff]  }
  0x86   : > { %v1198_v48 = vrot.slane %v1197_v39, 4  ;;  %708 = vst [vmem:[#allocation2 + $0x8c] sm:$0x1] %v707_v45  ;;  %v426_v49 = vor.u32 %v424_v41, %v423_v36  ;;  %v1249_v50 = vrot.slane %v1247_v42, 4  ;;  %v1250_v51 = vshll.u32 %v987_v22, 16 }
  0x87   : > { %v9391_v52 = vld [vmem:[%s11925_s1 + $0x304] ss:$16 sps:$4 sm:$0xff]   ;;  %v1211_v53 = vor.u32 %v1210_v43, %v1207_v40  ;;  %v719_v54 = vsel %vm10008_vm5, %v427_v46, %v718_v32  ;;  %v1256_v55 = vshll.u32 %v988_v38, 16  ;;  %v9392_v56 = vld [vmem:[%s11925_s1 + $0x308] ss:$16 sps:$4 sm:$0xff]  }
  0x88   : > { %v9394_v58 = vld [vmem:[%s11925_s1 + $0x30c] ss:$16 sps:$4 sm:$0xff]   ;;  %v716_v59 = vsel %vm9999_vm4, %v426_v49, %v715_v37  ;;  %720 = vst [vmem:[#allocation2 + $0xac] sm:$0x1] %v719_v54  ;;  %v1252_v61 = vrot.slane %v1250_v51, 5  ;;  %6137 = vmatprep.subr.bf16.mxu0 %v9391_v52  ;;  %v1203_v0 = vsel %vm10071_vm8, %v1198_v48, %v1202_v30 }
  0x89   : > { %v277_v63 = vld [vmem:[%s9976_s5 + $0x44] sm:$0xf]  ;;  %v1212_v1 = vrot.slane %v1211_v53, 4  ;;  %v9374_v4 = vld [vmem:[#allocation2 + $0x70] ss:$8 sps:$4 sm:$0xff]   ;;  %v10279_v7 = vrot.slane %v1256_v55, 5  ;;  %7102 = vmatprep.subr.bf16.mxu1 %v9394_v58  ;;  %6138 = vmatpush1.bf16.msra.mxu0 %v9389_v47 }
  0x8a   : > { %v983_v5 = vld [vmem:[#allocation2 + $0x80] sm:$0xf]  ;;  %v984_v6 = vld [vmem:[#allocation2 + $0x84] sm:$0x1]  ;;  %717 = vst [vmem:[#allocation2 + $0xa8] sm:$0xf] %v716_v59  ;;  %v1253_v13 = vor.u32 %v1252_v61, %v1249_v50  ;;  %7103 = vmatpush1.bf16.msra.mxu1 %v9392_v56 }
  0x8b   : > { %v278_v8 = vld [vmem:[%s9976_s5 + $0x48] sm:$0xf]  ;;  %v1219_v10 = vshrl.u32 %v983_v5, 16  ;;  %v1222_v11 = vshll.u32 %v983_v5, 16  ;;  %v1228_v12 = vshll.u32 %v984_v6, 16  ;;  %v1217_v14 = vsel %vm10071_vm8, %v1212_v1, %v1216_v44 }
  0x8c   : > { %v985_v9 = vld [vmem:[#allocation2 + $0x88] sm:$0xf]  ;;  %v8077_v17 = vcombine.low %v1203_v0, %v1217_v14  ;;  %v10284_v23 = vrot.slane %v1253_v13, 4  ;;  %v429_v24 = vshrl.u32 %v277_v63, 16  ;;  %v432_v27 = vshll.u32 %v277_v63, 16 }
  0x8d   : > { %v1233_v15 = vshrl.u32 %v985_v9, 16  ;;  %v1236_v16 = vshll.u32 %v985_v9, 16  ;;  %v1221_v18 = vrot.slane %v1219_v10, 4  ;;  %v1224_v62 = vrot.slane %v1222_v11, 5  ;;  %v986_v20 = vld [vmem:[#allocation2 + $0x8c] sm:$0x1] }
  0x8e   : > { %v1230_v19 = vrot.slane %v1228_v12, 5  ;;  %6020 = vmatprep.mubr.bf16.mxu0 %v8077_v17  ;;  %6985 = vmatprep.mubr.bf16.mxu1 %v8077_v17  ;;  %v1242_v26 = vshll.u32 %v986_v20, 16  ;;  %v437_v28 = vshrl.u32 %v278_v8, 16  ;;  %v431_v31 = vrot.slane %v429_v24, 7  ;;  %v721_v33 = vld [vmem:[#allocation2 + $0xb0] sm:$0xf] }
  0x8f   : > { %v1235_v21 = vrot.slane %v1233_v15, 4  ;;  %v1238_v22 = vrot.slane %v1236_v16, 5  ;;  %v1225_v25 = vor.u32 %v1224_v62, %v1221_v18  ;;  %6021 = vmatmul.mubr.bf16.gmra.mrb[24].mxu0 %v9374_v4  ;;  %6986 = vmatmul.mubr.bf16.gmra.mrb[24].mxu1 %v9374_v4  ;;  %v990_v30 = vld [vmem:[#allocation2 + $0xac] sm:$0x1]  ;;  %v440_v32 = vshll.u32 %v278_v8, 16 }
  0x90   : > { %v724_v34 = vld [vmem:[#allocation2 + $0xb4] sm:$0x1]  ;;  %v1244_v36 = vrot.slane %v1242_v26, 5  ;;  %v1270_v38 = vshll.u32 %v990_v30, 16  ;;  %v439_v39 = vrot.slane %v437_v28, 7  ;;  %v434_v43 = vor.u32 %v432_v27, %v431_v31 }
  0x91   : > { %v1239_v29 = vor.u32 %v1238_v22, %v1235_v21  ;;  %v1226_v35 = vrot.slane %v1225_v25, 4  ;;  %v989_v37 = vld [vmem:[#allocation2 + $0xa8] sm:$0xf]  ;;  %v435_v47 = vrot.slane %v431_v31, 4  ;;  %v727_v49 = vld [vmem:[#allocation2 + $0xb8] sm:$0xf]  ;;  %v1259_v13 = vsel %vm10071_vm8, %v10284_v23, %v10279_v7 }
  0x92   : > { %v1261_v41 = vshrl.u32 %v989_v37, 16  ;;  %v1264_v42 = vshll.u32 %v989_v37, 16  ;;  %v9381_v45 = vld [vmem:[#allocation2 + $0x80] ss:$8 sps:$4 sm:$0xff]   ;;  %v1272_v46 = vrot.slane %v1270_v38, 5  ;;  %v442_v48 = vor.u32 %v440_v32, %v439_v39 }
  0x93   : > { %v1240_v40 = vrot.slane %v1239_v29, 4  ;;  %v1231_v44 = vsel %vm10071_vm8, %v1226_v35, %v1230_v19  ;;  %v443_v53 = vrot.slane %v439_v39, 4  ;;  %v730_v54 = vld [vmem:[#allocation2 + $0xbc] sm:$0x1]  ;;  %v722_v56 = vsel %vm9999_vm4, %v434_v43, %v721_v33  ;;  %v9396_v61 = vld [vmem:[%s11925_s1 + $0x320] ss:$16 sps:$4 sm:$0xff]  }
  0x94   : > { %v1263_v51 = vrot.slane %v1261_v41, 4  ;;  %v1266_v52 = vrot.slane %v1264_v42, 5  ;;  %v725_v58 = vsel %vm10008_vm5, %v435_v47, %v724_v34  ;;  %v728_v59 = vsel %vm9999_vm4, %v442_v48, %v727_v49  ;;  %v9398_v63 = vld [vmem:[%s11925_s1 + $0x324] ss:$16 sps:$4 sm:$0xff]   ;;  %v9399_v0 = vld [vmem:[%s11925_s1 + $0x328] ss:$16 sps:$4 sm:$0xff]  }
  0x95   : > { %v1245_v50 = vsel %vm10071_vm8, %v1240_v40, %v1244_v36  ;;  %723 = vst [vmem:[#allocation2 + $0xb0] sm:$0xf] %v722_v56  ;;  %726 = vst [vmem:[#allocation2 + $0xb4] sm:$0x1] %v725_v58  ;;  %v731_v4 = vsel %vm10008_vm5, %v443_v53, %v730_v54  ;;  %v9401_v5 = vld [vmem:[%s11925_s1 + $0x32c] ss:$16 sps:$4 sm:$0xff]   ;;  %6139 = vmatprep.subr.bf16.mxu0 %v9398_v63 }
  0x96   : > { %v8078_v55 = vcombine.low %v1231_v44, %v1245_v50  ;;  %v1267_v1 = vor.u32 %v1266_v52, %v1263_v51  ;;  %729 = vst [vmem:[#allocation2 + $0xb8] sm:$0xf] %v728_v59  ;;  %v279_v6 = vld [vmem:[%s9976_s5 + $0x4c] sm:$0xf]  ;;  %v280_v8 = vld [vmem:[%s9976_s5 + $0x50] sm:$0xf]  ;;  %7104 = vmatprep.subr.bf16.mxu1 %v9401_v5  ;;  %6140 = vmatpush1.bf16.msra.mxu0 %v9396_v61 }
  0x97   : > { %732 = vst [vmem:[#allocation2 + $0xbc] sm:$0x1] %v731_v4  ;;  %v445_v9 = vshrl.u32 %v279_v6, 16  ;;  %v448_v10 = vshll.u32 %v279_v6, 16  ;;  %v453_v11 = vshrl.u32 %v280_v8, 16  ;;  %v456_v12 = vshll.u32 %v280_v8, 16  ;;  %7105 = vmatpush1.bf16.msra.mxu1 %v9399_v0 }
  0x98   : > { %6030 = vmatprep.mubr.bf16.mxu0 %v8078_v55  ;;  %6995 = vmatprep.mubr.bf16.mxu1 %v8078_v55  ;;  %v1268_v14 = vrot.slane %v1267_v1, 4  ;;  %v733_v15 = vld [vmem:[#allocation2 + $0xc0] sm:$0xf]  ;;  %v736_v16 = vld [vmem:[#allocation2 + $0xc4] sm:$0x1] }
  0x99   : > { %6031 = vmatmul.mubr.bf16.gmra.mrb[28].mxu0 %v9381_v45  ;;  %6996 = vmatmul.mubr.bf16.gmra.mrb[28].mxu1 %v9381_v45  ;;  %v447_v17 = vrot.slane %v445_v9, 7  ;;  %v455_v18 = vrot.slane %v453_v11, 7  ;;  %v739_v62 = vld [vmem:[#allocation2 + $0xc8] sm:$0xf]  ;;  %v9403_v19 = vld [vmem:[%s11925_s1 + $0x340] ss:$16 sps:$4 sm:$0xff]  }
  0x9a   : > { %v1273_v20 = vsel %vm10071_vm8, %v1268_v14, %v1272_v46  ;;  %v9388_v21 = vld [vmem:[#allocation2 + $0xa0] ss:$8 sps:$4 sm:$0xff]   ;;  %v9405_v7 = vld [vmem:[%s11925_s1 + $0x344] ss:$16 sps:$4 sm:$0xff]   ;;  %v9408_v23 = vld [vmem:[%s11925_s1 + $0x34c] ss:$16 sps:$4 sm:$0xff]  }
  0x9b   : > { %v9406_v22 = vld [vmem:[%s11925_s1 + $0x348] ss:$16 sps:$4 sm:$0xff]   ;;  %v8079_v24 = vcombine.low %v1259_v13, %v1273_v20  ;;  %v450_v25 = vor.u32 %v448_v10, %v447_v17  ;;  %v451_v26 = vrot.slane %v447_v17, 4  ;;  %v458_v27 = vor.u32 %v456_v12, %v455_v18  ;;  %v281_v28 = vld [vmem:[%s9976_s5 + $0x54] sm:$0xf]  ;;  %6141 = vmatprep.subr.bf16.mxu0 %v9405_v7  ;;  %7106 = vmatprep.subr.bf16.mxu1 %v9408_v23 }
  0x9c   : > { %v282_v29 = vld [vmem:[%s9976_s5 + $0x58] sm:$0xf]  ;;  %v459_v30 = vrot.slane %v455_v18, 4  ;;  %v742_v31 = vld [vmem:[#allocation2 + $0xcc] sm:$0x1]  ;;  %v461_v32 = vshrl.u32 %v281_v28, 16  ;;  %6142 = vmatpush1.bf16.msra.mxu0 %v9403_v19  ;;  %7107 = vmatpush1.bf16.msra.mxu1 %v9406_v22 }
  0x9d   : > { %v464_v33 = vshll.u32 %v281_v28, 16  ;;  %v469_v34 = vshrl.u32 %v282_v29, 16  ;;  %6040 = vmatprep.mubr.bf16.mxu0 %v8079_v24  ;;  %7005 = vmatprep.mubr.bf16.mxu1 %v8079_v24  ;;  %v991_v35 = vld [vmem:[#allocation2 + $0xb0] sm:$0xf]  ;;  %v992_v36 = vld [vmem:[#allocation2 + $0xb4] sm:$0x1]  ;;  %v734_v38 = vsel %vm9999_vm4, %v450_v25, %v733_v15  ;;  %v737_v39 = vsel %vm10008_vm5, %v451_v26, %v736_v16 }
  0x9e   : > { %v993_v37 = vld [vmem:[#allocation2 + $0xb8] sm:$0xf]  ;;  %v740_v40 = vsel %vm9999_vm4, %v458_v27, %v739_v62  ;;  %v994_v41 = vld [vmem:[#allocation2 + $0xbc] sm:$0x1]  ;;  %v1275_v42 = vshrl.u32 %v991_v35, 16  ;;  %v1278_v43 = vshll.u32 %v991_v35, 16  ;;  %v743_v48 = vsel %vm10008_vm5, %v459_v30, %v742_v31 }
  0x9f   : > { %v1284_v44 = vshll.u32 %v992_v36, 16  ;;  %v1289_v45 = vshrl.u32 %v993_v37, 16  ;;  %735 = vst [vmem:[#allocation2 + $0xc0] sm:$0xf] %v734_v38  ;;  %738 = vst [vmem:[#allocation2 + $0xc4] sm:$0x1] %v737_v39 }
  0xa0   : > { %741 = vst [vmem:[#allocation2 + $0xc8] sm:$0xf] %v740_v40  ;;  %v1292_v46 = vshll.u32 %v993_v37, 16  ;;  %v1298_v47 = vshll.u32 %v994_v41, 16  ;;  %v1277_v49 = vrot.slane %v1275_v42, 4  ;;  %v1280_v50 = vrot.slane %v1278_v43, 5 }
  0xa1   : > { %6041 = vmatmul.mubr.bf16.gmra.mrb[32].mxu0 %v9388_v21  ;;  %7006 = vmatmul.mubr.bf16.gmra.mrb[32].mxu1 %v9388_v21  ;;  %v1286_v51 = vrot.slane %v1284_v44, 5  ;;  %v1291_v52 = vrot.slane %v1289_v45, 4  ;;  %744 = vst [vmem:[#allocation2 + $0xcc] sm:$0x1] %v743_v48  ;;  %v745_v53 = vld [vmem:[#allocation2 + $0xd0] sm:$0xf] }
  0xa2   : > { %v1294_v54 = vrot.slane %v1292_v46, 5  ;;  %v1300_v55 = vrot.slane %v1298_v47, 5  ;;  %v463_v56 = vrot.slane %v461_v32, 7  ;;  %v471_v58 = vrot.slane %v469_v34, 7  ;;  %v748_v59 = vld [vmem:[#allocation2 + $0xd4] sm:$0x1] }
  0xa3   : > { %v1281_v61 = vor.u32 %v1280_v50, %v1277_v49  ;;  %v472_v63 = vshll.u32 %v282_v29, 16  ;;  %v751_v0 = vld [vmem:[#allocation2 + $0xd8] sm:$0xf]  ;;  %v754_v1 = vld [vmem:[#allocation2 + $0xdc] sm:$0x1] }
  0xa4   : > { %v1295_v4 = vor.u32 %v1294_v54, %v1291_v52  ;;  %v466_v5 = vor.u32 %v464_v33, %v463_v56  ;;  %v467_v6 = vrot.slane %v463_v56, 4  ;;  %v475_v8 = vrot.slane %v471_v58, 4  ;;  %v9410_v9 = vld [vmem:[%s11925_s1 + $0x360] ss:$16 sps:$4 sm:$0xff]   ;;  %v9412_v10 = vld [vmem:[%s11925_s1 + $0x364] ss:$16 sps:$4 sm:$0xff]  }
  0xa5   : > { %v1282_v11 = vrot.slane %v1281_v61, 4  ;;  %v474_v12 = vor.u32 %v472_v63, %v471_v58  ;;  %v9413_v13 = vld [vmem:[%s11925_s1 + $0x368] ss:$16 sps:$4 sm:$0xff]   ;;  %v9415_v14 = vld [vmem:[%s11925_s1 + $0x36c] ss:$16 sps:$4 sm:$0xff]   ;;  %6143 = vmatprep.subr.bf16.mxu0 %v9412_v10 }
  0xa6   : > { %v1296_v15 = vrot.slane %v1295_v4, 4  ;;  %v9395_v16 = vld [vmem:[#allocation2 + $0xb0] ss:$8 sps:$4 sm:$0xff]   ;;  %v995_v17 = vld [vmem:[#allocation2 + $0xc0] sm:$0xf]  ;;  %v746_v62 = vsel %vm9999_vm4, %v466_v5, %v745_v53  ;;  %v749_v19 = vsel %vm10008_vm5, %v467_v6, %v748_v59  ;;  %v755_v20 = vsel %vm10008_vm5, %v475_v8, %v754_v1  ;;  %7108 = vmatprep.subr.bf16.mxu1 %v9415_v14  ;;  %6144 = vmatpush1.bf16.msra.mxu0 %v9410_v9 }
  0xa7   : > { %v996_v18 = vld [vmem:[#allocation2 + $0xc4] sm:$0x1]  ;;  %v1287_v21 = vsel %vm10071_vm8, %v1282_v11, %v1286_v51  ;;  %v997_v7 = vld [vmem:[#allocation2 + $0xc8] sm:$0xf]  ;;  %v1303_v22 = vshrl.u32 %v995_v17, 16  ;;  %v1306_v23 = vshll.u32 %v995_v17, 16  ;;  %v752_v29 = vsel %vm9999_vm4, %v474_v12, %v751_v0  ;;  %7109 = vmatpush1.bf16.msra.mxu1 %v9413_v13 }
  0xa8   : > { %v1312_v24 = vshll.u32 %v996_v18, 16  ;;  %747 = vst [vmem:[#allocation2 + $0xd0] sm:$0xf] %v746_v62  ;;  %750 = vst [vmem:[#allocation2 + $0xd4] sm:$0x1] %v749_v19  ;;  %v1301_v25 = vsel %vm10071_vm8, %v1296_v15, %v1300_v55  ;;  %v1317_v27 = vshrl.u32 %v997_v7, 16 }
  0xa9   : > { %756 = vst [vmem:[#allocation2 + $0xdc] sm:$0x1] %v755_v20  ;;  %v998_v26 = vld [vmem:[#allocation2 + $0xcc] sm:$0x1]  ;;  %v1320_v28 = vshll.u32 %v997_v7, 16  ;;  %v8080_v30 = vcombine.low %v1287_v21, %v1301_v25  ;;  %v1305_v31 = vrot.slane %v1303_v22, 4 }
  0xaa   : > { %v1308_v32 = vrot.slane %v1306_v23, 5  ;;  %753 = vst [vmem:[#allocation2 + $0xd8] sm:$0xf] %v752_v29  ;;  %v1319_v33 = vrot.slane %v1317_v27, 4  ;;  %v1326_v35 = vshll.u32 %v998_v26, 16  ;;  %v1314_v37 = vrot.slane %v1312_v24, 5 }
  0xab   : > { %v1322_v34 = vrot.slane %v1320_v28, 5  ;;  %6050 = vmatprep.mubr.bf16.mxu0 %v8080_v30  ;;  %7015 = vmatprep.mubr.bf16.mxu1 %v8080_v30  ;;  %v284_v38 = vld [vmem:[%s9976_s5 + $0x60] sm:$0xf]  ;;  %v1003_v43 = vld [vmem:[#allocation2 + $0xf0] sm:$0xf] }
  0xac   : > { %v1309_v36 = vor.u32 %v1308_v32, %v1305_v31  ;;  %6051 = vmatmul.mubr.bf16.gmra.mrb[36].mxu0 %v9395_v16  ;;  %7016 = vmatmul.mubr.bf16.gmra.mrb[36].mxu1 %v9395_v16  ;;  %v1328_v40 = vrot.slane %v1326_v35, 5  ;;  %v485_v41 = vshrl.u32 %v284_v38, 16  ;;  %v488_v42 = vshll.u32 %v284_v38, 16  ;;  %v763_v45 = vld [vmem:[#allocation2 + $0xf8] sm:$0xf] }
  0xad   : > { %v1323_v39 = vor.u32 %v1322_v34, %v1319_v33  ;;  %v1359_v46 = vshrl.u32 %v1003_v43, 16  ;;  %v1362_v47 = vshll.u32 %v1003_v43, 16  ;;  %v9402_v49 = vld [vmem:[#allocation2 + $0xc0] ss:$8 sps:$4 sm:$0xff]   ;;  %v766_v53 = vld [vmem:[#allocation2 + $0xfc] sm:$0x1] }
  0xae   : > { %v1310_v44 = vrot.slane %v1309_v36, 4  ;;  %v487_v52 = vrot.slane %v485_v41, 7  ;;  %v1004_v61 = vld [vmem:[#allocation2 + $0xf4] sm:$0x1]  ;;  %v9417_v18 = vld [vmem:[%s11925_s1 + $0x380] ss:$16 sps:$4 sm:$0xff]  }
  0xaf   : > { %v1324_v48 = vrot.slane %v1323_v39, 4  ;;  %v999_v50 = vld [vmem:[#allocation2 + $0xd0] sm:$0xf]  ;;  %v1000_v51 = vld [vmem:[#allocation2 + $0xd4] sm:$0x1]  ;;  %v1361_v16 = vrot.slane %v1359_v46, 4 }
  0xb0   : > { %v1315_v54 = vsel %vm10071_vm8, %v1310_v44, %v1314_v37  ;;  %v1002_v55 = vld [vmem:[#allocation2 + $0xdc] sm:$0x1]  ;;  %v1331_v56 = vshrl.u32 %v999_v50, 16  ;;  %v1334_v58 = vshll.u32 %v999_v50, 16  ;;  %v1340_v59 = vshll.u32 %v1000_v51, 16 }
  0xb1   : > { %v1329_v63 = vsel %vm10071_vm8, %v1324_v48, %v1328_v40  ;;  %v1001_v0 = vld [vmem:[#allocation2 + $0xd8] sm:$0xf]  ;;  %v490_v1 = vor.u32 %v488_v42, %v487_v52  ;;  %v491_v4 = vrot.slane %v487_v52, 4  ;;  %v1354_v9 = vshll.u32 %v1002_v55, 16  ;;  %v9419_v21 = vld [vmem:[%s11925_s1 + $0x384] ss:$16 sps:$4 sm:$0xff]  }
  0xb2   : > { %v8081_v5 = vcombine.low %v1315_v54, %v1329_v63  ;;  %v1333_v6 = vrot.slane %v1331_v56, 4  ;;  %v1336_v8 = vrot.slane %v1334_v58, 5  ;;  %v1342_v10 = vrot.slane %v1340_v59, 5  ;;  %v9420_v23 = vld [vmem:[%s11925_s1 + $0x388] ss:$16 sps:$4 sm:$0xff]   ;;  %6145 = vmatprep.subr.bf16.mxu0 %v9419_v21 }
  0xb3   : > { %v1345_v11 = vshrl.u32 %v1001_v0, 16  ;;  %v1348_v12 = vshll.u32 %v1001_v0, 16  ;;  %v764_v13 = vsel %vm9999_vm4, %v490_v1, %v763_v45  ;;  %v767_v15 = vsel %vm10008_vm5, %v491_v4, %v766_v53  ;;  %v9422_v24 = vld [vmem:[%s11925_s1 + $0x38c] ss:$16 sps:$4 sm:$0xff]   ;;  %v285_v27 = vld [vmem:[%s9976_s5 + $0x64] sm:$0xf]  ;;  %6146 = vmatpush1.bf16.msra.mxu0 %v9417_v18 }
  0xb4   : > { %6060 = vmatprep.mubr.bf16.mxu0 %v8081_v5  ;;  %7025 = vmatprep.mubr.bf16.mxu1 %v8081_v5  ;;  %v1337_v14 = vor.u32 %v1336_v8, %v1333_v6  ;;  %765 = vst [vmem:[#allocation2 + $0xf8] sm:$0xf] %v764_v13  ;;  %v1364_v17 = vrot.slane %v1362_v47, 5  ;;  %768 = vst [vmem:[#allocation2 + $0xfc] sm:$0x1] %v767_v15  ;;  %v1368_v20 = vshll.u32 %v1004_v61, 16 }
  0xb5   : > { %6061 = vmatmul.mubr.bf16.gmra.mrb[40].mxu0 %v9402_v49  ;;  %7026 = vmatmul.mubr.bf16.gmra.mrb[40].mxu1 %v9402_v49  ;;  %v1347_v62 = vrot.slane %v1345_v11, 4  ;;  %v1350_v19 = vrot.slane %v1348_v12, 5  ;;  %v1356_v26 = vrot.slane %v1354_v9, 5  ;;  %v286_v28 = vld [vmem:[%s9976_s5 + $0x68] sm:$0xf]  ;;  %v493_v29 = vshrl.u32 %v285_v27, 16 }
  0xb6   : > { %v1338_v7 = vrot.slane %v1337_v14, 4  ;;  %v1365_v22 = vor.u32 %v1364_v17, %v1361_v16  ;;  %7110 = vmatprep.subr.bf16.mxu1 %v9422_v24  ;;  %v496_v30 = vshll.u32 %v285_v27, 16  ;;  %v9409_v33 = vld [vmem:[#allocation2 + $0xd0] ss:$8 sps:$4 sm:$0xff]   ;;  %v10389_v34 = vrot.slane %v1368_v20, 5 }
  0xb7   : > { %v1351_v25 = vor.u32 %v1350_v19, %v1347_v62  ;;  %7111 = vmatpush1.bf16.msra.mxu1 %v9420_v23  ;;  %v501_v35 = vshrl.u32 %v286_v28, 16  ;;  %v495_v37 = vrot.slane %v493_v29, 7  ;;  %v504_v38 = vshll.u32 %v286_v28, 16  ;;  %v769_v39 = vld [vmem:[#allocation2 + $0x100] sm:$0xf] }
  0xb8   : > { %v1343_v31 = vsel %vm10071_vm8, %v1338_v7, %v1342_v10  ;;  %v10391_v36 = vrot.slane %v1365_v22, 4  ;;  %v772_v42 = vld [vmem:[#allocation2 + $0x104] sm:$0x1]  ;;  %v775_v48 = vld [vmem:[#allocation2 + $0x108] sm:$0xf] }
  0xb9   : > { %v1352_v32 = vrot.slane %v1351_v25, 4  ;;  %v498_v47 = vor.u32 %v496_v30, %v495_v37  ;;  %v778_v49 = vld [vmem:[#allocation2 + $0x10c] sm:$0x1]  ;;  %v9424_v50 = vld [vmem:[%s11925_s1 + $0x3a0] ss:$16 sps:$4 sm:$0xff]   ;;  %v499_v52 = vrot.slane %v495_v37, 4 }
  0xba   : > { %v503_v53 = vrot.slane %v501_v35, 7  ;;  %v9426_v54 = vld [vmem:[%s11925_s1 + $0x3a4] ss:$16 sps:$4 sm:$0xff]   ;;  %v9427_v59 = vld [vmem:[%s11925_s1 + $0x3a8] ss:$16 sps:$4 sm:$0xff]   ;;  %v1371_v18 = vsel %vm10071_vm8, %v10391_v36, %v10389_v34 }
  0xbb   : > { %v1357_v40 = vsel %vm10071_vm8, %v1352_v32, %v1356_v26  ;;  %v1005_v41 = vld [vmem:[#allocation2 + $0xf8] sm:$0xf]  ;;  %v1006_v44 = vld [vmem:[#allocation2 + $0xfc] sm:$0x1]  ;;  %v770_v58 = vsel %vm9999_vm4, %v498_v47, %v769_v39  ;;  %v773_v4 = vsel %vm10008_vm5, %v499_v52, %v772_v42  ;;  %v287_v5 = vld [vmem:[%s9976_s5 + $0x6c] sm:$0xf]  ;;  %6147 = vmatprep.subr.bf16.mxu0 %v9426_v54 }
  0xbc   : > { %v8082_v43 = vcombine.low %v1343_v31, %v1357_v40  ;;  %v1373_v45 = vshrl.u32 %v1005_v41, 16  ;;  %v1376_v46 = vshll.u32 %v1005_v41, 16  ;;  %v1382_v51 = vshll.u32 %v1006_v44, 16  ;;  %v9429_v61 = vld [vmem:[%s11925_s1 + $0x3ac] ss:$16 sps:$4 sm:$0xff]   ;;  %6148 = vmatpush1.bf16.msra.mxu0 %v9424_v50 }
  0xbd   : > { %v506_v0 = vor.u32 %v504_v38, %v503_v53  ;;  %v507_v1 = vrot.slane %v503_v53, 4  ;;  %771 = vst [vmem:[#allocation2 + $0x100] sm:$0xf] %v770_v58  ;;  %v288_v6 = vld [vmem:[%s9976_s5 + $0x70] sm:$0xf]  ;;  %7112 = vmatprep.subr.bf16.mxu1 %v9429_v61  ;;  %v509_v9 = vshrl.u32 %v287_v5, 16 }
  0xbe   : > { %6070 = vmatprep.mubr.bf16.mxu0 %v8082_v43  ;;  %7035 = vmatprep.mubr.bf16.mxu1 %v8082_v43  ;;  %v1375_v55 = vrot.slane %v1373_v45, 4  ;;  %v1378_v56 = vrot.slane %v1376_v46, 5  ;;  %v1384_v63 = vrot.slane %v1382_v51, 5  ;;  %774 = vst [vmem:[#allocation2 + $0x104] sm:$0x1] %v773_v4  ;;  %v512_v10 = vshll.u32 %v287_v5, 16 }
  0xbf   : > { %6071 = vmatmul.mubr.bf16.gmra.mrb[44].mxu0 %v9409_v33  ;;  %7036 = vmatmul.mubr.bf16.gmra.mrb[44].mxu1 %v9409_v33  ;;  %v517_v11 = vshrl.u32 %v288_v6, 16  ;;  %v776_v12 = vsel %vm9999_vm4, %v506_v0, %v775_v48  ;;  %v779_v13 = vsel %vm10008_vm5, %v507_v1, %v778_v49  ;;  %v520_v14 = vshll.u32 %v288_v6, 16  ;;  %v781_v15 = vld [vmem:[#allocation2 + $0x110] sm:$0xf]  ;;  %v784_v16 = vld [vmem:[#allocation2 + $0x114] sm:$0x1] }
  0xc0   : > { %v1379_v8 = vor.u32 %v1378_v56, %v1375_v55  ;;  %7113 = vmatpush1.bf16.msra.mxu1 %v9427_v59  ;;  %v787_v17 = vld [vmem:[#allocation2 + $0x118] sm:$0xf]  ;;  %777 = vst [vmem:[#allocation2 + $0x108] sm:$0xf] %v776_v12  ;;  %780 = vst [vmem:[#allocation2 + $0x10c] sm:$0x1] %v779_v13 }
  0xc1   : > { %v9416_v19 = vld [vmem:[#allocation2 + $0xf0] ss:$8 sps:$4 sm:$0xff]   ;;  %v511_v20 = vrot.slane %v509_v9, 7  ;;  %v519_v21 = vrot.slane %v517_v11, 7  ;;  %v790_v7 = vld [vmem:[#allocation2 + $0x11c] sm:$0x1] }
  0xc2   : > { %v1380_v62 = vrot.slane %v1379_v8, 4  ;;  %v9431_v22 = vld [vmem:[%s11925_s1 + $0x3c0] ss:$16 sps:$4 sm:$0xff]   ;;  %v9433_v23 = vld [vmem:[%s11925_s1 + $0x3c4] ss:$16 sps:$4 sm:$0xff]  }
  0xc3   : > { %v9434_v24 = vld [vmem:[%s11925_s1 + $0x3c8] ss:$16 sps:$4 sm:$0xff]   ;;  %v514_v26 = vor.u32 %v512_v10, %v511_v20  ;;  %v515_v27 = vrot.slane %v511_v20, 4  ;;  %v522_v28 = vor.u32 %v520_v14, %v519_v21  ;;  %v9436_v29 = vld [vmem:[%s11925_s1 + $0x3cc] ss:$16 sps:$4 sm:$0xff]   ;;  %v523_v32 = vrot.slane %v519_v21, 4  ;;  %6149 = vmatprep.subr.bf16.mxu0 %v9433_v23 }
  0xc4   : > { %v1385_v25 = vsel %vm10071_vm8, %v1380_v62, %v1384_v63  ;;  %v289_v30 = vld [vmem:[%s9976_s5 + $0x74] sm:$0xf]  ;;  %v290_v33 = vld [vmem:[%s9976_s5 + $0x78] sm:$0xf]  ;;  %v1007_v36 = vld [vmem:[#allocation2 + $0x100] sm:$0xf]  ;;  %7114 = vmatprep.subr.bf16.mxu1 %v9436_v29  ;;  %6150 = vmatpush1.bf16.msra.mxu0 %v9431_v22 }
  0xc5   : > { %v8083_v31 = vcombine.low %v1371_v18, %v1385_v25  ;;  %v525_v34 = vshrl.u32 %v289_v30, 16  ;;  %v528_v35 = vshll.u32 %v289_v30, 16  ;;  %v782_v37 = vsel %vm9999_vm4, %v514_v26, %v781_v15  ;;  %v1008_v41 = vld [vmem:[#allocation2 + $0x104] sm:$0x1]  ;;  %v793_v49 = vld [vmem:[#allocation2 + $0x120] sm:$0xf]  ;;  %7115 = vmatpush1.bf16.msra.mxu1 %v9434_v24 }
  0xc6   : > { %v785_v38 = vsel %vm10008_vm5, %v515_v27, %v784_v16  ;;  %v788_v39 = vsel %vm9999_vm4, %v522_v28, %v787_v17  ;;  %v533_v40 = vshrl.u32 %v290_v33, 16  ;;  %v1387_v42 = vshrl.u32 %v1007_v36, 16  ;;  %783 = vst [vmem:[#allocation2 + $0x110] sm:$0xf] %v782_v37  ;;  %v796_v4 = vld [vmem:[#allocation2 + $0x124] sm:$0x1] }
  0xc7   : > { %6080 = vmatprep.mubr.bf16.mxu0 %v8083_v31  ;;  %7045 = vmatprep.mubr.bf16.mxu1 %v8083_v31  ;;  %v1390_v43 = vshll.u32 %v1007_v36, 16  ;;  %786 = vst [vmem:[#allocation2 + $0x114] sm:$0x1] %v785_v38  ;;  %789 = vst [vmem:[#allocation2 + $0x118] sm:$0xf] %v788_v39  ;;  %v791_v44 = vsel %vm10008_vm5, %v523_v32, %v790_v7  ;;  %v527_v45 = vrot.slane %v525_v34, 7 }
  0xc8   : > { %6081 = vmatmul.mubr.bf16.gmra.mrb[48].mxu0 %v9416_v19  ;;  %7046 = vmatmul.mubr.bf16.gmra.mrb[48].mxu1 %v9416_v19  ;;  %v1396_v46 = vshll.u32 %v1008_v41, 16  ;;  %792 = vst [vmem:[#allocation2 + $0x11c] sm:$0x1] %v791_v44  ;;  %v535_v47 = vrot.slane %v533_v40, 7  ;;  %v536_v48 = vshll.u32 %v290_v33, 16  ;;  %v1389_v52 = vrot.slane %v1387_v42, 4 }
  0xc9   : > { %v1009_v50 = vld [vmem:[#allocation2 + $0x108] sm:$0xf]  ;;  %v1010_v51 = vld [vmem:[#allocation2 + $0x10c] sm:$0x1]  ;;  %v1392_v53 = vrot.slane %v1390_v43, 5  ;;  %v530_v54 = vor.u32 %v528_v35, %v527_v45  ;;  %v531_v63 = vrot.slane %v527_v45, 4 }
  0xca   : > { %v1398_v55 = vrot.slane %v1396_v46, 5  ;;  %v1401_v56 = vshrl.u32 %v1009_v50, 16  ;;  %v1404_v58 = vshll.u32 %v1009_v50, 16  ;;  %v1410_v59 = vshll.u32 %v1010_v51, 16  ;;  %v799_v9 = vld [vmem:[#allocation2 + $0x128] sm:$0xf] }
  0xcb   : > { %v1393_v61 = vor.u32 %v1392_v53, %v1389_v52  ;;  %v538_v0 = vor.u32 %v536_v48, %v535_v47  ;;  %v539_v1 = vrot.slane %v535_v47, 4  ;;  %v794_v8 = vsel %vm9999_vm4, %v530_v54, %v793_v49  ;;  %v802_v14 = vld [vmem:[#allocation2 + $0x12c] sm:$0x1]  ;;  %v9423_v24 = vld [vmem:[#allocation2 + $0x100] ss:$8 sps:$4 sm:$0xff]  }
  0xcc   : > { %v1403_v5 = vrot.slane %v1401_v56, 4  ;;  %v1406_v6 = vrot.slane %v1404_v58, 5  ;;  %v1412_v11 = vrot.slane %v1410_v59, 5  ;;  %795 = vst [vmem:[#allocation2 + $0x120] sm:$0xf] %v794_v8  ;;  %v797_v12 = vsel %vm10008_vm5, %v531_v63, %v796_v4 }
  0xcd   : > { %v1394_v10 = vrot.slane %v1393_v61, 4  ;;  %v800_v13 = vsel %vm9999_vm4, %v538_v0, %v799_v9  ;;  %v1011_v16 = vld [vmem:[#allocation2 + $0x110] sm:$0xf]  ;;  %798 = vst [vmem:[#allocation2 + $0x124] sm:$0x1] %v797_v12  ;;  %v803_v62 = vsel %vm10008_vm5, %v539_v1, %v802_v14 }
  0xce   : > { %v1407_v15 = vor.u32 %v1406_v6, %v1403_v5  ;;  %v1012_v17 = vld [vmem:[#allocation2 + $0x114] sm:$0x1]  ;;  %v1013_v18 = vld [vmem:[#allocation2 + $0x118] sm:$0xf]  ;;  %801 = vst [vmem:[#allocation2 + $0x128] sm:$0xf] %v800_v13 }
  0xcf   : > { %v1399_v19 = vsel %vm10071_vm8, %v1394_v10, %v1398_v55  ;;  %v1014_v20 = vld [vmem:[#allocation2 + $0x11c] sm:$0x1]  ;;  %v1415_v21 = vshrl.u32 %v1011_v16, 16  ;;  %v1418_v7 = vshll.u32 %v1011_v16, 16  ;;  %v1424_v22 = vshll.u32 %v1012_v17, 16 }
  0xd0   : > { %804 = vst [vmem:[#allocation2 + $0x12c] sm:$0x1] %v803_v62  ;;  %v1408_v23 = vrot.slane %v1407_v15, 4  ;;  %v1429_v25 = vshrl.u32 %v1013_v18, 16  ;;  %v1432_v26 = vshll.u32 %v1013_v18, 16  ;;  %v1438_v27 = vshll.u32 %v1014_v20, 16 }
  0xd1   : > { %v1417_v28 = vrot.slane %v1415_v21, 4  ;;  %v1420_v29 = vrot.slane %v1418_v7, 5  ;;  %v1426_v30 = vrot.slane %v1424_v22, 5  ;;  %v9438_v35 = vld [vmem:[%s11925_s1 + $0x3e0] ss:$16 sps:$4 sm:$0xff]  }
  0xd2   : > { %v1413_v31 = vsel %vm10071_vm8, %v1408_v23, %v1412_v11  ;;  %v1431_v32 = vrot.slane %v1429_v25, 4  ;;  %v1434_v33 = vrot.slane %v1432_v26, 5  ;;  %v1440_v34 = vrot.slane %v1438_v27, 5  ;;  %v9440_v38 = vld [vmem:[%s11925_s1 + $0x3e4] ss:$16 sps:$4 sm:$0xff]  }
  0xd3   : > { %v8084_v36 = vcombine.low %v1399_v19, %v1413_v31  ;;  %v1421_v37 = vor.u32 %v1420_v29, %v1417_v28  ;;  %v9441_v39 = vld [vmem:[%s11925_s1 + $0x3e8] ss:$16 sps:$4 sm:$0xff]   ;;  %v9443_v40 = vld [vmem:[%s11925_s1 + $0x3ec] ss:$16 sps:$4 sm:$0xff]   ;;  %v1015_v42 = vld [vmem:[#allocation2 + $0x120] sm:$0xf]  ;;  %6151 = vmatprep.subr.bf16.mxu0 %v9440_v38 }
  0xd4   : > { %v1435_v41 = vor.u32 %v1434_v33, %v1431_v32  ;;  %v1016_v44 = vld [vmem:[#allocation2 + $0x124] sm:$0x1]  ;;  %v1443_v46 = vshrl.u32 %v1015_v42, 16  ;;  %v1446_v49 = vshll.u32 %v1015_v42, 16  ;;  %7116 = vmatprep.subr.bf16.mxu1 %v9443_v40  ;;  %6152 = vmatpush1.bf16.msra.mxu0 %v9438_v35  ;;  %v9430_v0 = vld [vmem:[#allocation2 + $0x110] ss:$8 sps:$4 sm:$0xff]  }
  0xd5   : > { %6090 = vmatprep.mubr.bf16.mxu0 %v8084_v36  ;;  %7055 = vmatprep.mubr.bf16.mxu1 %v8084_v36  ;;  %v1422_v43 = vrot.slane %v1421_v37, 4  ;;  %v1017_v45 = vld [vmem:[#allocation2 + $0x128] sm:$0xf]  ;;  %v1452_v50 = vshll.u32 %v1016_v44, 16  ;;  %v9447_v9 = vld [vmem:[%s11925_s1 + $0x404] ss:$16 sps:$4 sm:$0xff]  }
  0xd6   : > { %6091 = vmatmul.mubr.bf16.gmra.mrb[52].mxu0 %v9423_v24  ;;  %7056 = vmatmul.mubr.bf16.gmra.mrb[52].mxu1 %v9423_v24  ;;  %v1436_v47 = vrot.slane %v1435_v41, 4  ;;  %v1457_v51 = vshrl.u32 %v1017_v45, 16  ;;  %v1445_v53 = vrot.slane %v1443_v46, 4  ;;  %v1460_v54 = vshll.u32 %v1017_v45, 16  ;;  %v9450_v11 = vld [vmem:[%s11925_s1 + $0x40c] ss:$16 sps:$4 sm:$0xff]  }
  0xd7   : > { %v1018_v48 = vld [vmem:[#allocation2 + $0x12c] sm:$0x1]  ;;  %v1427_v52 = vsel %vm10071_vm8, %v1422_v43, %v1426_v30  ;;  %v1448_v58 = vrot.slane %v1446_v49, 5  ;;  %7117 = vmatpush1.bf16.msra.mxu1 %v9441_v39  ;;  %v1454_v4 = vrot.slane %v1452_v50, 5  ;;  %v1550_v14 = vld [vmem:[#allocation2] sm:$0xe]  ;;  %6314 = vmatprep.subr.bf16.mxu0 %v9447_v9 }
  0xd8   : > { %v1466_v55 = vshll.u32 %v1018_v48, 16  ;;  %v1441_v56 = vsel %vm10071_vm8, %v1436_v47, %v1440_v34  ;;  %v1459_v59 = vrot.slane %v1457_v51, 4  ;;  %v1462_v63 = vrot.slane %v1460_v54, 5  ;;  %v1551_v15 = vld [vmem:[#allocation2 + $0x4] sm:$0x1]  ;;  %7279 = vmatprep.subr.bf16.mxu1 %v9450_v11 }
  0xd9   : > { %v8085_v61 = vcombine.low %v1427_v52, %v1441_v56  ;;  %v1449_v1 = vor.u32 %v1448_v58, %v1445_v53  ;;  %v1552_v17 = vld [vmem:[#allocation2 + $0x8] sm:$0xe]  ;;  %v1553_v18 = vld [vmem:[#allocation2 + $0xc] sm:$0x1]  ;;  %v8087_v20 = vrot.slane %v1550_v14, 9  ;;  %v1683_v21 = vrot.slane %v1551_v15, 5 }
  0xda   : > { %v1463_v5 = vor.u32 %v1462_v63, %v1459_v59  ;;  %v1468_v6 = vrot.slane %v1466_v55, 5  ;;  %v9437_v62 = vld [vmem:[#allocation2 + $0x120] ss:$8 sps:$4 sm:$0xff]   ;;  %v8088_v7 = vrot.slane %v1552_v17, 9  ;;  %v1687_v22 = vrot.slane %v1553_v18, 5 }
  0xdb   : > { %6100 = vmatprep.mubr.bf16.mxu0 %v8085_v61  ;;  %7065 = vmatprep.mubr.bf16.mxu1 %v8085_v61  ;;  %v1450_v8 = vrot.slane %v1449_v1, 4  ;;  %v9444_v19 = vld [vmem:[#allocation2 + $0x8] ss:$8 sps:$4 sm:$0xff]   ;;  %v1684_v25 = vsel %vm10483_vm11, %v8087_v20, %v1683_v21  ;;  %v1555_v27 = vld [vmem:[#allocation2 + $0x14] sm:$0x1] }
  0xdc   : > { %v1464_v10 = vrot.slane %v1463_v5, 4  ;;  %v1554_v24 = vld [vmem:[#allocation2 + $0x10] sm:$0xe]  ;;  %v1688_v26 = vsel %vm10483_vm11, %v8088_v7, %v1687_v22  ;;  %v267_v28 = vld [vmem:[%s9976_s5 + $0x1c] sm:$0xf]  ;;  %v1691_v39 = vrot.slane %v1555_v27, 5 }
  0xdd   : > { %v1455_v12 = vsel %vm10071_vm8, %v1450_v8, %v1454_v4  ;;  %v1556_v29 = vld [vmem:[#allocation2 + $0x18] sm:$0xe]  ;;  %v1557_v30 = vld [vmem:[#allocation2 + $0x1c] sm:$0x1]  ;;  %v349_v31 = vshrl.u32 %v267_v28, 16  ;;  %v352_v32 = vshll.u32 %v267_v28, 16  ;;  %v8119_v34 = vcombine.low %v1684_v25, %v1688_v26 }
  0xde   : > { %6101 = vmatmul.mubr.bf16.gmra.mrb[56].mxu0 %v9430_v0  ;;  %7066 = vmatmul.mubr.bf16.gmra.mrb[56].mxu1 %v9430_v0  ;;  %v1469_v13 = vsel %vm10071_vm8, %v1464_v10, %v1468_v6  ;;  %v9445_v33 = vld [vmem:[%s11925_s1 + $0x400] ss:$16 sps:$4 sm:$0xff]   ;;  %v9448_v35 = vld [vmem:[%s11925_s1 + $0x408] ss:$16 sps:$4 sm:$0xff]   ;;  %v8089_v38 = vrot.slane %v1554_v24, 9  ;;  %v8090_v40 = vrot.slane %v1556_v29, 9 }
  0xdf   : > { %v8086_v16 = vcombine.low %v1455_v12, %v1469_v13  ;;  %v9451_v36 = vld [vmem:[#allocation2 + $0x18] ss:$8 sps:$4 sm:$0xff]   ;;  %v10498_v37 = vrot.slane %v349_v31, 7  ;;  %v1695_v41 = vrot.slane %v1557_v30, 5  ;;  %v9454_v45 = vld [vmem:[%s11925_s1 + $0x424] ss:$16 sps:$4 sm:$0xff]  }
  0xe0   : > { %v661_v42 = vld [vmem:[#allocation2 + $0x40] sm:$0xf]  ;;  %v9457_v46 = vld [vmem:[%s11925_s1 + $0x42c] ss:$16 sps:$4 sm:$0xff]   ;;  %v9455_v47 = vld [vmem:[%s11925_s1 + $0x428] ss:$16 sps:$4 sm:$0xff]   ;;  %v1692_v51 = vsel %vm10483_vm11, %v8089_v38, %v1691_v39 }
  0xe1   : > { %6110 = vmatprep.mubr.bf16.mxu0 %v8086_v16  ;;  %7075 = vmatprep.mubr.bf16.mxu1 %v8086_v16  ;;  %v354_v43 = vor.u32 %v352_v32, %v10498_v37  ;;  %v9452_v44 = vld [vmem:[%s11925_s1 + $0x420] ss:$16 sps:$4 sm:$0xff]   ;;  %v1559_v49 = vld [vmem:[#allocation2 + $0x24] sm:$0x1]  ;;  %v1696_v52 = vsel %vm10483_vm11, %v8090_v40, %v1695_v41  ;;  %v1560_v53 = vld [vmem:[#allocation2 + $0x28] sm:$0xe] }
  0xe2   : > { %v1558_v48 = vld [vmem:[#allocation2 + $0x20] sm:$0xe]  ;;  %v1561_v54 = vld [vmem:[#allocation2 + $0x2c] sm:$0x1]  ;;  %v9461_v55 = vld [vmem:[%s11925_s1 + $0x444] ss:$16 sps:$4 sm:$0xff]   ;;  %v8120_v58 = vcombine.low %v1692_v51, %v1696_v52 }
  0xe3   : > { %v662_v50 = vsel %vm9999_vm4, %v354_v43, %v661_v42  ;;  %v9464_v56 = vld [vmem:[%s11925_s1 + $0x44c] ss:$16 sps:$4 sm:$0xff]   ;;  %v9458_v59 = vld [vmem:[#allocation2 + $0x28] ss:$8 sps:$4 sm:$0xff]   ;;  %v8091_v61 = vrot.slane %v1558_v48, 9  ;;  %v1699_v63 = vrot.slane %v1559_v49, 5 }
  0xe4   : > { %663 = vst [vmem:[#allocation2 + $0x40] sm:$0xf] %v662_v50  ;;  %v8092_v0 = vrot.slane %v1560_v53, 9  ;;  %v1703_v1 = vrot.slane %v1561_v54, 5  ;;  %v9459_v4 = vld [vmem:[%s11925_s1 + $0x440] ss:$16 sps:$4 sm:$0xff]  }
  0xe5   : > { %v9462_v5 = vld [vmem:[%s11925_s1 + $0x448] ss:$16 sps:$4 sm:$0xff]   ;;  %v1562_v6 = vld [vmem:[#allocation2 + $0x30] sm:$0xe]  ;;  %v9468_v8 = vld [vmem:[%s11925_s1 + $0x464] ss:$16 sps:$4 sm:$0xff]   ;;  %v1700_v12 = vsel %vm10483_vm11, %v8091_v61, %v1699_v63 }
  0xe6   : > { %6111 = vmatmul.mubr.bf16.gmra.mrb[60].mxu0 %v9437_v62  ;;  %7076 = vmatmul.mubr.bf16.gmra.mrb[60].mxu1 %v9437_v62  ;;  %v9471_v9 = vld [vmem:[%s11925_s1 + $0x46c] ss:$16 sps:$4 sm:$0xff]   ;;  %v1563_v10 = vld [vmem:[#allocation2 + $0x34] sm:$0x1]  ;;  %v1564_v11 = vld [vmem:[#allocation2 + $0x38] sm:$0xe]  ;;  %v1704_v13 = vsel %vm10483_vm11, %v8092_v0, %v1703_v1 }
  0xe7   : > { %6153 = vmatprep.mubr.bf16.mxu0 %v9444_v19  ;;  %7118 = vmatprep.mubr.bf16.mxu1 %v9444_v19  ;;  %v1565_v14 = vld [vmem:[#allocation2 + $0x3c] sm:$0x1]  ;;  %v9466_v15 = vld [vmem:[%s11925_s1 + $0x460] ss:$16 sps:$4 sm:$0xff]   ;;  %v9469_v16 = vld [vmem:[%s11925_s1 + $0x468] ss:$16 sps:$4 sm:$0xff]   ;;  %v8121_v20 = vcombine.low %v1700_v12, %v1704_v13 }
  0xe8   : > { %v8093_v17 = vrot.slane %v1562_v6, 9  ;;  %v1707_v18 = vrot.slane %v1563_v10, 5  ;;  %v9475_v62 = vld [vmem:[%s11925_s1 + $0x484] ss:$16 sps:$4 sm:$0xff]   ;;  %v9478_v19 = vld [vmem:[%s11925_s1 + $0x48c] ss:$16 sps:$4 sm:$0xff]  }
  0xe9   : > { %v8094_v21 = vrot.slane %v1564_v11, 9  ;;  %v1711_v7 = vrot.slane %v1565_v14, 5  ;;  %v9473_v22 = vld [vmem:[%s11925_s1 + $0x480] ss:$16 sps:$4 sm:$0xff]   ;;  %v9476_v25 = vld [vmem:[%s11925_s1 + $0x488] ss:$16 sps:$4 sm:$0xff]  }
  0xea   : > { %v9482_v26 = vld [vmem:[%s11925_s1 + $0x4a4] ss:$16 sps:$4 sm:$0xff]   ;;  %v275_v27 = vld [vmem:[%s9976_s5 + $0x3c] sm:$0xf]  ;;  %v1566_v28 = vld [vmem:[#allocation2 + $0x50] sm:$0xe] }
  0xeb   : > { %v9465_v24 = vld [vmem:[#allocation2 + $0x38] ss:$8 sps:$4 sm:$0xff]   ;;  %v1567_v29 = vld [vmem:[#allocation2 + $0x54] sm:$0x1]  ;;  %v9485_v30 = vld [vmem:[%s11925_s1 + $0x4ac] ss:$16 sps:$4 sm:$0xff]  }
  0xec   : > { %v413_v31 = vshrl.u32 %v275_v27, 16  ;;  %v416_v32 = vshll.u32 %v275_v27, 16  ;;  %v9480_v38 = vld [vmem:[%s11925_s1 + $0x4a0] ss:$16 sps:$4 sm:$0xff]   ;;  %v9483_v39 = vld [vmem:[%s11925_s1 + $0x4a8] ss:$16 sps:$4 sm:$0xff]  }
  0xed   : > { %v9489_v40 = vld [vmem:[%s11925_s1 + $0x4c4] ss:$16 sps:$4 sm:$0xff]   ;;  %v709_v42 = vld [vmem:[#allocation2 + $0x90] sm:$0xf]  ;;  %v9472_v50 = vld [vmem:[#allocation2 + $0x58] ss:$8 sps:$4 sm:$0xff]  }
  0xee   : > { %6154 = vmatmul.mubr.bf16.vlgmr.msra.gmra.mrb[0].mxu0 %v8119_v34  ;;  %7119 = vmatmul.mubr.bf16.vlgmr.msra.gmra.mrb[0].mxu1 %v8119_v34  ;;  %v1712_v34 = vsel %vm10483_vm11, %v8094_v21, %v1711_v7  ;;  %v10579_v41 = vrot.slane %v413_v31, 7  ;;  %v9487_v52 = vld [vmem:[%s11925_s1 + $0x4c0] ss:$16 sps:$4 sm:$0xff]   ;;  %v9490_v53 = vld [vmem:[%s11925_s1 + $0x4c8] ss:$16 sps:$4 sm:$0xff]  }
  0xef   : > { %6315 = vmatpush1.bf16.msra.mxu0 %v9445_v33  ;;  %7280 = vmatpush1.bf16.msra.mxu1 %v9448_v35  ;;  %v1708_v33 = vsel %vm10483_vm11, %v8093_v17, %v1707_v18  ;;  %v1568_v35 = vld [vmem:[#allocation2 + $0x58] sm:$0xe]  ;;  %v9496_v54 = vld [vmem:[%s11925_s1 + $0x4e4] ss:$16 sps:$4 sm:$0xff]   ;;  %v1572_v63 = vld [vmem:[#allocation2 + $0x68] sm:$0xe] }
  0xf0   : > { %6163 = vmatprep.mubr.bf16.mxu0 %v9451_v36  ;;  %7128 = vmatprep.mubr.bf16.mxu1 %v9451_v36  ;;  %v1569_v36 = vld [vmem:[#allocation2 + $0x5c] sm:$0x1]  ;;  %v8122_v43 = vcombine.low %v1708_v33, %v1712_v34  ;;  %v8096_v48 = vrot.slane %v1568_v35, 9  ;;  %v1571_v61 = vld [vmem:[#allocation2 + $0x64] sm:$0x1]  ;;  %v8098_v11 = vrot.slane %v1572_v63, 9 }
  0xf1   : > { %6316 = vmatprep.subr.bf16.mxu0 %v9454_v45  ;;  %7281 = vmatprep.subr.bf16.mxu1 %v9457_v46  ;;  %v418_v45 = vor.u32 %v416_v32, %v10579_v41  ;;  %v8095_v46 = vrot.slane %v1566_v28, 9  ;;  %v1719_v49 = vrot.slane %v1569_v36, 5  ;;  %v1573_v0 = vld [vmem:[#allocation2 + $0x6c] sm:$0x1]  ;;  %v9494_v1 = vld [vmem:[%s11925_s1 + $0x4e0] ss:$16 sps:$4 sm:$0xff]  }
  0xf2   : > { %v9503_v6 = vld [vmem:[%s11925_s1 + $0x504] ss:$16 sps:$4 sm:$0xff]   ;;  %v1723_v10 = vrot.slane %v1571_v61, 5  ;;  %v1727_v12 = vrot.slane %v1573_v0, 5  ;;  %v9479_v13 = vld [vmem:[#allocation2 + $0x68] ss:$8 sps:$4 sm:$0xff]  }
  0xf3   : > { %6317 = vmatpush1.bf16.msra.mxu0 %v9452_v44  ;;  %7282 = vmatpush1.bf16.msra.mxu1 %v9455_v47  ;;  %v9492_v44 = vld [vmem:[%s11925_s1 + $0x4cc] ss:$16 sps:$4 sm:$0xff]   ;;  %v1715_v47 = vrot.slane %v1567_v29, 5  ;;  %v710_v51 = vsel %vm9999_vm4, %v418_v45, %v709_v42  ;;  %v9501_v14 = vld [vmem:[%s11925_s1 + $0x500] ss:$16 sps:$4 sm:$0xff]  }
  0xf4   : > { %6318 = vmatprep.subr.bf16.mxu0 %v9461_v55  ;;  %7283 = vmatprep.subr.bf16.mxu1 %v9464_v56  ;;  %711 = vst [vmem:[#allocation2 + $0x90] sm:$0xf] %v710_v51  ;;  %v1570_v55 = vld [vmem:[#allocation2 + $0x60] sm:$0xe]  ;;  %v9499_v56 = vld [vmem:[%s11925_s1 + $0x4ec] ss:$16 sps:$4 sm:$0xff]  }
  0xf5   : > { %v9513_v17 = vld [vmem:[%s11925_s1 + $0x52c] ss:$16 sps:$4 sm:$0xff]   ;;  %v1576_v21 = vld [vmem:[#allocation2 + $0x78] sm:$0xe]  ;;  %v9517_v27 = vld [vmem:[%s11925_s1 + $0x544] ss:$16 sps:$4 sm:$0xff]  }
  0xf6   : > { %6164 = vmatmul.mubr.bf16.gmra.mrb[4].mxu0 %v8120_v58  ;;  %7129 = vmatmul.mubr.bf16.gmra.mrb[4].mxu1 %v8120_v58  ;;  %v1716_v58 = vsel %vm10483_vm11, %v8095_v46, %v1715_v47  ;;  %v1577_v7 = vld [vmem:[#allocation2 + $0x7c] sm:$0x1]  ;;  %v9515_v32 = vld [vmem:[%s11925_s1 + $0x540] ss:$16 sps:$4 sm:$0xff]   ;;  %v9518_v35 = vld [vmem:[%s11925_s1 + $0x548] ss:$16 sps:$4 sm:$0xff]  }
  0xf7   : > { %6173 = vmatprep.mubr.bf16.mxu0 %v9458_v59  ;;  %7138 = vmatprep.mubr.bf16.mxu1 %v9458_v59  ;;  %v1720_v59 = vsel %vm10483_vm11, %v8096_v48, %v1719_v49  ;;  %v1735_v31 = vrot.slane %v1577_v7, 5  ;;  %v9520_v33 = vld [vmem:[%s11925_s1 + $0x54c] ss:$16 sps:$4 sm:$0xff]   ;;  %v1580_v42 = vld [vmem:[#allocation2 + $0x88] sm:$0xe] }
  0xf8   : > { %6319 = vmatpush1.bf16.msra.mxu0 %v9459_v4  ;;  %7284 = vmatpush1.bf16.msra.mxu1 %v9462_v5  ;;  %v9497_v4 = vld [vmem:[%s11925_s1 + $0x4e8] ss:$16 sps:$4 sm:$0xff]   ;;  %v8123_v5 = vcombine.low %v1716_v58, %v1720_v59  ;;  %v283_v34 = vld [vmem:[%s9976_s5 + $0x5c] sm:$0xf]  ;;  %v757_v45 = vld [vmem:[#allocation2 + $0xe0] sm:$0xf] }
  0xf9   : > { %6320 = vmatprep.subr.bf16.mxu0 %v9468_v8  ;;  %7285 = vmatprep.subr.bf16.mxu1 %v9471_v9  ;;  %v9506_v8 = vld [vmem:[%s11925_s1 + $0x50c] ss:$16 sps:$4 sm:$0xff]   ;;  %v8097_v9 = vrot.slane %v1570_v55, 9  ;;  %v477_v36 = vshrl.u32 %v283_v34, 16  ;;  %v9522_v48 = vld [vmem:[%s11925_s1 + $0x560] ss:$16 sps:$4 sm:$0xff]  }
  0xfa   : > { %v9524_v49 = vld [vmem:[%s11925_s1 + $0x564] ss:$16 sps:$4 sm:$0xff]   ;;  %v9525_v51 = vld [vmem:[%s11925_s1 + $0x568] ss:$16 sps:$4 sm:$0xff]   ;;  %v8102_v59 = vrot.slane %v1580_v42, 9 }
  0xfb   : > { %v1724_v18 = vsel %vm10483_vm11, %v8097_v9, %v1723_v10  ;;  %v9529_v63 = vld [vmem:[%s11925_s1 + $0x580] ss:$16 sps:$4 sm:$0xff]   ;;  %v9531_v0 = vld [vmem:[%s11925_s1 + $0x584] ss:$16 sps:$4 sm:$0xff]   ;;  %v1584_v10 = vld [vmem:[#allocation2 + $0xa8] sm:$0xe] }
  0xfc   : > { %6321 = vmatpush1.bf16.msra.mxu0 %v9466_v15  ;;  %7286 = vmatpush1.bf16.msra.mxu1 %v9469_v16  ;;  %v9504_v15 = vld [vmem:[%s11925_s1 + $0x508] ss:$16 sps:$4 sm:$0xff]   ;;  %v9510_v16 = vld [vmem:[%s11925_s1 + $0x524] ss:$16 sps:$4 sm:$0xff]   ;;  %v9561_v57 = vld [vmem:[%s11925_s1 + $0x60c] ss:$16 sps:$4 sm:$0xff]  }
  0xfd   : > { %6322 = vmatprep.subr.bf16.mxu0 %v9475_v62  ;;  %7287 = vmatprep.subr.bf16.mxu1 %v9478_v19  ;;  %v1728_v62 = vsel %vm10483_vm11, %v8098_v11, %v1727_v12  ;;  %v1574_v19 = vld [vmem:[#allocation2 + $0x70] sm:$0xe]  ;;  %v1583_v9 = vld [vmem:[#allocation2 + $0xa4] sm:$0x1]  ;;  %v1585_v11 = vld [vmem:[#allocation2 + $0xac] sm:$0x1] }
  0xfe   : > { %6174 = vmatmul.mubr.bf16.gmra.mrb[8].mxu0 %v8121_v20  ;;  %7139 = vmatmul.mubr.bf16.gmra.mrb[8].mxu1 %v8121_v20  ;;  %v1575_v20 = vld [vmem:[#allocation2 + $0x74] sm:$0x1]  ;;  %v8099_v28 = vrot.slane %v1574_v19, 9  ;;  %v9536_v12 = vld [vmem:[%s11925_s1 + $0x5a0] ss:$16 sps:$4 sm:$0xff]  }
  0xff   : > { %6183 = vmatprep.mubr.bf16.mxu0 %v9465_v24  ;;  %7148 = vmatprep.mubr.bf16.mxu1 %v9465_v24  ;;  %v9511_v24 = vld [vmem:[%s11925_s1 + $0x528] ss:$16 sps:$4 sm:$0xff]   ;;  %v1731_v29 = vrot.slane %v1575_v20, 5  ;;  %v9541_v19 = vld [vmem:[%s11925_s1 + $0x5ac] ss:$16 sps:$4 sm:$0xff]  }
 0x100   : > { %6323 = vmatpush1.bf16.msra.mxu0 %v9473_v22  ;;  %7288 = vmatpush1.bf16.msra.mxu1 %v9476_v25  ;;  %v9508_v22 = vld [vmem:[%s11925_s1 + $0x520] ss:$16 sps:$4 sm:$0xff]   ;;  %v8124_v25 = vcombine.low %v1724_v18, %v1728_v62  ;;  %v8104_v18 = vrot.slane %v1584_v10, 9  ;;  %v1751_v62 = vrot.slane %v1585_v11, 5  ;;  %v9539_v20 = vld [vmem:[%s11925_s1 + $0x5a8] ss:$16 sps:$4 sm:$0xff]  }
 0x101   : > { %6324 = vmatprep.subr.bf16.mxu0 %v9482_v26  ;;  %7289 = vmatprep.subr.bf16.mxu1 %v9485_v30  ;;  %v9486_v26 = vld [vmem:[#allocation2 + $0x78] ss:$8 sps:$4 sm:$0xff]   ;;  %v8100_v30 = vrot.slane %v1576_v21, 9  ;;  %v1732_v46 = vsel %vm10483_vm11, %v8099_v28, %v1731_v29  ;;  %v1586_v21 = vld [vmem:[#allocation2 + $0xb0] sm:$0xe] }
 0x102   : > { %v1587_v7 = vld [vmem:[#allocation2 + $0xb4] sm:$0x1]  ;;  %v9546_v29 = vld [vmem:[%s11925_s1 + $0x5c8] ss:$16 sps:$4 sm:$0xff]   ;;  %v1597_v11 = vld [vmem:[#allocation2 + $0xdc] sm:$0x1] }
 0x103   : > { %v1736_v47 = vsel %vm10483_vm11, %v8100_v30, %v1735_v31  ;;  %v9545_v28 = vld [vmem:[%s11925_s1 + $0x5c4] ss:$16 sps:$4 sm:$0xff]   ;;  %v9548_v30 = vld [vmem:[%s11925_s1 + $0x5cc] ss:$16 sps:$4 sm:$0xff]   ;;  %v1596_v10 = vld [vmem:[#allocation2 + $0xd8] sm:$0xe] }
 0x104   : > { %6325 = vmatpush1.bf16.msra.mxu0 %v9480_v38  ;;  %7290 = vmatpush1.bf16.msra.mxu1 %v9483_v39  ;;  %v480_v38 = vshll.u32 %v283_v34, 16  ;;  %v1578_v39 = vld [vmem:[#allocation2 + $0x80] sm:$0xe]  ;;  %v291_v31 = vld [vmem:[%s9976_s5 + $0x7c] sm:$0xf] }
 0x105   : > { %6326 = vmatprep.subr.bf16.mxu0 %v9489_v40  ;;  %7291 = vmatprep.subr.bf16.mxu1 %v9492_v44  ;;  %v1579_v40 = vld [vmem:[#allocation2 + $0x84] sm:$0x1]  ;;  %v10650_v44 = vrot.slane %v477_v36, 7  ;;  %v544_v34 = vshll.u32 %v291_v31, 16  ;;  %v8105_v36 = vrot.slane %v1586_v21, 9 }
 0x106   : > { %6184 = vmatmul.mubr.bf16.gmra.mrb[12].mxu0 %v8122_v43  ;;  %7149 = vmatmul.mubr.bf16.gmra.mrb[12].mxu1 %v8122_v43  ;;  %v1581_v43 = vld [vmem:[#allocation2 + $0x8c] sm:$0x1]  ;;  %v1739_v58 = vrot.slane %v1579_v40, 5  ;;  %v1600_v21 = vld [vmem:[#allocation2 + $0xf8] sm:$0xe] }
 0x107   : > { %6193 = vmatprep.mubr.bf16.mxu0 %v9472_v50  ;;  %7158 = vmatprep.mubr.bf16.mxu1 %v9472_v50  ;;  %v482_v50 = vor.u32 %v480_v38, %v10650_v44  ;;  %v1743_v61 = vrot.slane %v1581_v43, 5  ;;  %v1755_v38 = vrot.slane %v1587_v7, 5  ;;  %v805_v43 = vld [vmem:[#allocation2 + $0x130] sm:$0xf]  ;;  %v1601_v7 = vld [vmem:[#allocation2 + $0xfc] sm:$0x1] }
 0x108   : > { %6327 = vmatpush1.bf16.msra.mxu0 %v9487_v52  ;;  %7292 = vmatpush1.bf16.msra.mxu1 %v9490_v53  ;;  %v9527_v52 = vld [vmem:[%s11925_s1 + $0x56c] ss:$16 sps:$4 sm:$0xff]   ;;  %v8125_v53 = vcombine.low %v1732_v46, %v1736_v47  ;;  %v9552_v47 = vld [vmem:[%s11925_s1 + $0x5e4] ss:$16 sps:$4 sm:$0xff]  }
 0x109   : > { %6328 = vmatprep.subr.bf16.mxu0 %v9496_v54  ;;  %7293 = vmatprep.subr.bf16.mxu1 %v9499_v56  ;;  %v8101_v54 = vrot.slane %v1578_v39, 9  ;;  %v758_v55 = vsel %vm9999_vm4, %v482_v50, %v757_v45  ;;  %v9493_v56 = vld [vmem:[#allocation2 + $0x88] ss:$8 sps:$4 sm:$0xff]   ;;  %v1590_v50 = vld [vmem:[#allocation2 + $0xc0] sm:$0xe] }
 0x10a   : > { %759 = vst [vmem:[#allocation2 + $0xe0] sm:$0xf] %v758_v55  ;;  %v9550_v45 = vld [vmem:[%s11925_s1 + $0x5e0] ss:$16 sps:$4 sm:$0xff]   ;;  %v1593_v55 = vld [vmem:[#allocation2 + $0xcc] sm:$0x1] }
 0x10c   : > { %6329 = vmatpush1.bf16.msra.mxu0 %v9494_v1  ;;  %7294 = vmatpush1.bf16.msra.mxu1 %v9497_v4  ;;  %v9532_v1 = vld [vmem:[%s11925_s1 + $0x588] ss:$16 sps:$4 sm:$0xff]   ;;  %v9534_v4 = vld [vmem:[%s11925_s1 + $0x58c] ss:$16 sps:$4 sm:$0xff]  }
 0x10d   : > { %6330 = vmatprep.subr.bf16.mxu0 %v9503_v6  ;;  %7295 = vmatprep.subr.bf16.mxu1 %v9506_v8  ;;  %v1744_v6 = vsel %vm10483_vm11, %v8102_v59, %v1743_v61  ;;  %v1582_v8 = vld [vmem:[#allocation2 + $0xa0] sm:$0xe]  ;;  %v9514_v59 = vld [vmem:[#allocation2 + $0xc8] ss:$8 sps:$4 sm:$0xff]   ;;  %v8107_v61 = vrot.slane %v1590_v50, 9 }
 0x10e   : > { %6194 = vmatmul.mubr.bf16.gmra.mrb[16].mxu0 %v8123_v5  ;;  %7159 = vmatmul.mubr.bf16.gmra.mrb[16].mxu1 %v8123_v5  ;;  %v1740_v5 = vsel %vm10483_vm11, %v8101_v54, %v1739_v58  ;;  %v1592_v54 = vld [vmem:[#allocation2 + $0xc8] sm:$0xe] }
 0x10f   : > { %6203 = vmatprep.mubr.bf16.mxu0 %v9479_v13  ;;  %7168 = vmatprep.mubr.bf16.mxu1 %v9479_v13  ;;  %v8126_v13 = vcombine.low %v1740_v5, %v1744_v6  ;;  %v2033_v50 = vld [vmem:[#allocation2 + $0x8] sm:$0xf] }
 0x110   : > { %6331 = vmatpush1.bf16.msra.mxu0 %v9501_v14  ;;  %7296 = vmatpush1.bf16.msra.mxu1 %v9504_v15  ;;  %v9500_v14 = vld [vmem:[#allocation2 + $0xa8] ss:$8 sps:$4 sm:$0xff]   ;;  %v9538_v15 = vld [vmem:[%s11925_s1 + $0x5a4] ss:$16 sps:$4 sm:$0xff]  }
 0x111   : > { %6332 = vmatprep.subr.bf16.mxu0 %v9510_v16  ;;  %7297 = vmatprep.subr.bf16.mxu1 %v9513_v17  ;;  %v8103_v16 = vrot.slane %v1582_v8, 9  ;;  %v1747_v17 = vrot.slane %v1583_v9, 5  ;;  %v1594_v8 = vld [vmem:[#allocation2 + $0xd0] sm:$0xe]  ;;  %v1595_v9 = vld [vmem:[#allocation2 + $0xd4] sm:$0x1] }
 0x114   : > { %6333 = vmatpush1.bf16.msra.mxu0 %v9508_v22  ;;  %7298 = vmatpush1.bf16.msra.mxu1 %v9511_v24  ;;  %v1588_v22 = vld [vmem:[#allocation2 + $0xb8] sm:$0xe]  ;;  %v1589_v24 = vld [vmem:[#allocation2 + $0xbc] sm:$0x1] }
 0x115   : > { %6334 = vmatprep.subr.bf16.mxu0 %v9517_v27  ;;  %7299 = vmatprep.subr.bf16.mxu1 %v9520_v33  ;;  %v9543_v27 = vld [vmem:[%s11925_s1 + $0x5c0] ss:$16 sps:$4 sm:$0xff]   ;;  %v541_v33 = vshrl.u32 %v291_v31, 16  ;;  %v8106_v39 = vrot.slane %v1588_v22, 9  ;;  %v1759_v40 = vrot.slane %v1589_v24, 5 }
 0x116   : > { %6204 = vmatmul.mubr.bf16.gmra.mrb[20].mxu0 %v8124_v25  ;;  %7169 = vmatmul.mubr.bf16.gmra.mrb[20].mxu1 %v8124_v25  ;;  %v1748_v25 = vsel %vm10483_vm11, %v8103_v16, %v1747_v17  ;;  %v8110_v16 = vrot.slane %v1596_v10, 9  ;;  %v1775_v17 = vrot.slane %v1597_v11, 5  ;;  %v9528_v24 = vld [vmem:[#allocation2 + $0xf8] ss:$8 sps:$4 sm:$0xff]   ;;  %v2626_v10 = vld [vmem:[#allocation2 + $0xc] sm:$0x1] }
 0x117   : > { %6213 = vmatprep.mubr.bf16.mxu0 %v9486_v26  ;;  %7178 = vmatprep.mubr.bf16.mxu1 %v9486_v26  ;;  %v1752_v26 = vsel %vm10483_vm11, %v8104_v18, %v1751_v62  ;;  %v10716_v42 = vrot.slane %v541_v33, 7  ;;  %v1602_v33 = vld [vmem:[#allocation2 + $0x100] sm:$0xe]  ;;  %v2627_v11 = vld [vmem:[#allocation2 + $0x10] sm:$0xe] }
 0x118   : > { %6335 = vmatpush1.bf16.msra.mxu0 %v9515_v32  ;;  %7300 = vmatpush1.bf16.msra.mxu1 %v9518_v35  ;;  %v8127_v32 = vcombine.low %v1748_v25, %v1752_v26  ;;  %v9507_v35 = vld [vmem:[#allocation2 + $0xb8] ss:$8 sps:$4 sm:$0xff]   ;;  %v1776_v62 = vsel %vm10483_vm11, %v8110_v16, %v1775_v17  ;;  %v483_v17 = vrot.slane %v10650_v44, 4 }
 0x119   : > { %6336 = vmatprep.subr.bf16.mxu0 %v9524_v49  ;;  %7301 = vmatprep.subr.bf16.mxu1 %v9527_v52  ;;  %v546_v46 = vor.u32 %v544_v34, %v10716_v42  ;;  %v1760_v49 = vsel %vm10483_vm11, %v8106_v39, %v1759_v40  ;;  %v9555_v52 = vld [vmem:[%s11925_s1 + $0x5ec] ss:$16 sps:$4 sm:$0xff]   ;;  %v1603_v34 = vld [vmem:[#allocation2 + $0x104] sm:$0x1]  ;;  %v9535_v39 = vld [vmem:[#allocation2 + $0x108] ss:$8 sps:$4 sm:$0xff]  }
 0x11a   : > { %v8113_v40 = vrot.slane %v1602_v33, 9 }
 0x11c   : > { %6337 = vmatpush1.bf16.msra.mxu0 %v9522_v48  ;;  %7302 = vmatpush1.bf16.msra.mxu1 %v9525_v51  ;;  %v1756_v48 = vsel %vm10483_vm11, %v8105_v36, %v1755_v38  ;;  %v9553_v51 = vld [vmem:[%s11925_s1 + $0x5e8] ss:$16 sps:$4 sm:$0xff]   ;;  %v1605_v36 = vld [vmem:[#allocation2 + $0x10c] sm:$0x1] }
 0x11d   : > { %6338 = vmatprep.subr.bf16.mxu0 %v9531_v0  ;;  %7303 = vmatprep.subr.bf16.mxu1 %v9534_v4  ;;  %v8128_v58 = vcombine.low %v1756_v48, %v1760_v49  ;;  %v8108_v0 = vrot.slane %v1592_v54, 9  ;;  %v9558_v4 = vld [vmem:[%s11925_s1 + $0x604] ss:$16 sps:$4 sm:$0xff]   ;;  %v1608_v49 = vld [vmem:[#allocation2 + $0x118] sm:$0xe] }
 0x11e   : > { %6214 = vmatmul.mubr.bf16.gmra.mrb[24].mxu0 %v8125_v53  ;;  %7179 = vmatmul.mubr.bf16.gmra.mrb[24].mxu1 %v8125_v53  ;;  %v1591_v53 = vld [vmem:[#allocation2 + $0xc4] sm:$0x1]  ;;  %v1607_v48 = vld [vmem:[#allocation2 + $0x114] sm:$0x1] }
 0x11f   : > { %6223 = vmatprep.mubr.bf16.mxu0 %v9493_v56  ;;  %7188 = vmatprep.mubr.bf16.mxu1 %v9493_v56  ;;  %v806_v56 = vsel %vm9999_vm4, %v546_v46, %v805_v43  ;;  %v1787_v43 = vrot.slane %v1603_v34, 5  ;;  %v1791_v46 = vrot.slane %v1605_v36, 5 }
 0x120   : > { %6339 = vmatpush1.bf16.msra.mxu0 %v9529_v63  ;;  %7304 = vmatpush1.bf16.msra.mxu1 %v9532_v1  ;;  %807 = vst [vmem:[#allocation2 + $0x130] sm:$0xf] %v806_v56  ;;  %v1763_v63 = vrot.slane %v1591_v53, 5  ;;  %v1767_v1 = vrot.slane %v1593_v55, 5  ;;  %v1795_v56 = vrot.slane %v1607_v48, 5 }
 0x121   : > { %6340 = vmatprep.subr.bf16.mxu0 %v9538_v15  ;;  %7305 = vmatprep.subr.bf16.mxu1 %v9541_v19  ;;  %v1771_v15 = vrot.slane %v1595_v9, 5  ;;  %v1598_v19 = vld [vmem:[#allocation2 + $0xf0] sm:$0xe]  ;;  %v1788_v53 = vsel %vm10483_vm11, %v8113_v40, %v1787_v43  ;;  %v2625_v9 = vld [vmem:[#allocation2 + $0x8] sm:$0xe] }
 0x122   : > { %v1764_v5 = vsel %vm10483_vm11, %v8107_v61, %v1763_v63  ;;  %v1768_v6 = vsel %vm10483_vm11, %v8108_v0, %v1767_v1  ;;  %v8111_v25 = vrot.slane %v1598_v19, 9  ;;  %v2098_v61 = vshrl.u32 %v2033_v50, 16  ;;  %v9542_v0 = vld [vmem:[#allocation2 + $0x118] ss:$8 sps:$4 sm:$0xff]  }
 0x123   : > { %v2101_v63 = vshll.u32 %v2033_v50, 16  ;;  %v10771_v40 = vld [vmem:[#allocation2 + $0x20] sm:$0xe]  ;;  %v2038_v50 = vld [vmem:[#allocation2 + $0x1c] sm:$0x1] }
 0x124   : > { %6341 = vmatpush1.bf16.msra.mxu0 %v9536_v12  ;;  %7306 = vmatpush1.bf16.msra.mxu1 %v9539_v20  ;;  %v8129_v12 = vcombine.low %v1764_v5, %v1768_v6  ;;  %v1599_v20 = vld [vmem:[#allocation2 + $0xf4] sm:$0x1]  ;;  %v1612_v6 = vld [vmem:[#allocation2 + $0x128] sm:$0xe]  ;;  %v2039_v43 = vld [vmem:[#allocation2 + $0x20] sm:$0xf] }
 0x125   : > { %6342 = vmatprep.subr.bf16.mxu0 %v9545_v28  ;;  %7307 = vmatprep.subr.bf16.mxu1 %v9548_v30  ;;  %v1779_v26 = vrot.slane %v1599_v20, 5  ;;  %v1783_v28 = vrot.slane %v1601_v7, 5  ;;  %v664_v30 = vld [vmem:[#allocation2 + $0x44] sm:$0x1]  ;;  %v2036_v20 = vld [vmem:[#allocation2 + $0x14] sm:$0x1] }
 0x126   : > { %6224 = vmatmul.mubr.bf16.gmra.mrb[28].mxu0 %v8126_v13  ;;  %7189 = vmatmul.mubr.bf16.gmra.mrb[28].mxu1 %v8126_v13  ;;  %v9521_v13 = vld [vmem:[#allocation2 + $0xd8] ss:$8 sps:$4 sm:$0xff]   ;;  %v547_v7 = vrot.slane %v10716_v42, 4  ;;  %v2121_v34 = vshll.u32 %v2036_v20, 16  ;;  %v10794_v20 = vld [vmem:[#allocation2 + $0x2c] sm:$0x1] }
 0x127   : > { %6233 = vmatprep.mubr.bf16.mxu0 %v9500_v14  ;;  %7198 = vmatprep.mubr.bf16.mxu1 %v9500_v14  ;;  %v8109_v14 = vrot.slane %v1594_v8, 9  ;;  %v1780_v31 = vsel %vm10483_vm11, %v8111_v25, %v1779_v26  ;;  %v1613_v8 = vld [vmem:[#allocation2 + $0x12c] sm:$0x1]  ;;  %v2628_v25 = vld [vmem:[#allocation2 + $0x14] sm:$0x1]  ;;  %v8167_v26 = vrot.slane %v2625_v9, 9 }
 0x128   : > { %6343 = vmatpush1.bf16.msra.mxu0 %v9543_v27  ;;  %7308 = vmatpush1.bf16.msra.mxu1 %v9546_v29  ;;  %v8112_v27 = vrot.slane %v1600_v21, 9  ;;  %v355_v29 = vrot.slane %v10498_v37, 4  ;;  %v2759_v36 = vrot.slane %v2628_v25, 5 }
 0x129   : > { %6344 = vmatprep.subr.bf16.mxu0 %v9552_v47  ;;  %7309 = vmatprep.subr.bf16.mxu1 %v9555_v52  ;;  %v1772_v18 = vsel %vm10483_vm11, %v8109_v14, %v1771_v15  ;;  %v1606_v47 = vld [vmem:[#allocation2 + $0x110] sm:$0xe]  ;;  %v419_v52 = vrot.slane %v10579_v41, 4  ;;  %v2103_v14 = vrot.slane %v2101_v63, 5  ;;  %v9559_v41 = vld [vmem:[%s11925_s1 + $0x608] ss:$16 sps:$4 sm:$0xff]  }
 0x12a   : > { %v8130_v22 = vcombine.low %v1772_v18, %v1776_v62  ;;  %v665_v38 = vsel %vm10008_vm5, %v355_v29, %v664_v30  ;;  %v8115_v55 = vrot.slane %v1606_v47, 9  ;;  %v2037_v30 = vld [vmem:[#allocation2 + $0x18] sm:$0xf] }
 0x12b   : > { %666 = vst [vmem:[#allocation2 + $0x44] sm:$0x1] %v665_v38  ;;  %v10769_v38 = vld [vmem:[#allocation2 + $0x18] sm:$0xe] }
 0x12c   : > { %6345 = vmatpush1.bf16.msra.mxu0 %v9550_v45  ;;  %7310 = vmatpush1.bf16.msra.mxu1 %v9553_v51  ;;  %v1609_v51 = vld [vmem:[#allocation2 + $0x11c] sm:$0x1]  ;;  %v1796_v18 = vsel %vm10483_vm11, %v8115_v55, %v1795_v56  ;;  %v10783_v56 = vrot.slane %v2121_v34, 5  ;;  %v8169_v63 = vrot.slane %v10769_v38, 9  ;;  %v10806_v34 = vld [vmem:[#allocation2 + $0x34] sm:$0x1] }
 0x12d   : > { %6507 = vmatprep.subr.bf16.mxu0 %v9558_v4  ;;  %7472 = vmatprep.subr.bf16.mxu1 %v9561_v57  ;;  %v1799_v1 = vrot.slane %v1609_v51, 5  ;;  %v1611_v4 = vld [vmem:[#allocation2 + $0x124] sm:$0x1]  ;;  %v2035_v57 = vld [vmem:[#allocation2 + $0x10] sm:$0xf] }
 0x12e   : > { %6234 = vmatmul.mubr.bf16.gmra.mrb[32].mxu0 %v8127_v32  ;;  %7199 = vmatmul.mubr.bf16.gmra.mrb[32].mxu1 %v8127_v32  ;;  %v1784_v32 = vsel %vm10483_vm11, %v8112_v27, %v1783_v28  ;;  %v2112_v15 = vshrl.u32 %v2035_v57, 16  ;;  %v2115_v16 = vshll.u32 %v2035_v57, 16  ;;  %v1803_v19 = vrot.slane %v1611_v4, 5  ;;  %v2040_v51 = vld [vmem:[#allocation2 + $0x24] sm:$0x1] }
 0x12f   : > { %6243 = vmatprep.mubr.bf16.mxu0 %v9507_v35  ;;  %7208 = vmatprep.mubr.bf16.mxu1 %v9507_v35  ;;  %v1604_v35 = vld [vmem:[#allocation2 + $0x108] sm:$0xe]  ;;  %v8131_v37 = vcombine.low %v1780_v31, %v1784_v32  ;;  %v2755_v27 = vrot.slane %v2626_v10, 5  ;;  %v8168_v28 = vrot.slane %v2627_v11, 9  ;;  %v2043_v4 = vld [vmem:[#allocation2 + $0x30] sm:$0xf] }
 0x130   : > { %v8114_v45 = vrot.slane %v1604_v35, 9  ;;  %v2114_v32 = vrot.slane %v2112_v15, 4  ;;  %v2117_v33 = vrot.slane %v2115_v16, 5  ;;  %v9549_v35 = vld [vmem:[#allocation2 + $0x128] ss:$8 sps:$4 sm:$0xff]   ;;  %v8170_v10 = vrot.slane %v10771_v40, 9 }
 0x131   : > { %v10792_v15 = vld [vmem:[#allocation2 + $0x28] sm:$0xe]  ;;  %v2168_v16 = vshrl.u32 %v2043_v4, 16 }
 0x132   : > { %v1792_v54 = vsel %vm10483_vm11, %v8114_v45, %v1791_v46  ;;  %v2126_v45 = vshrl.u32 %v2037_v30, 16  ;;  %v2129_v46 = vshll.u32 %v2037_v30, 16  ;;  %v2118_v55 = vor.u32 %v2117_v33, %v2114_v32  ;;  %v2045_v33 = vld [vmem:[#allocation2 + $0x38] sm:$0xf] }
 0x133   : > { %v8132_v5 = vcombine.low %v1788_v53, %v1792_v54  ;;  %v2756_v53 = vsel %vm10483_vm11, %v8167_v26, %v2755_v27  ;;  %v10800_v27 = vld [vmem:[#allocation2 + $0x30] sm:$0xe]  ;;  %v2170_v38 = vrot.slane %v2168_v16, 4  ;;  %v9564_v16 = vld [vmem:[%s11925_s1 + $0x624] ss:$16 sps:$4 sm:$0xff]  }
 0x134   : > { %v2128_v57 = vrot.slane %v2126_v45, 4 }
 0x136   : > { %6244 = vmatmul.mubr.bf16.gmra.mrb[36].mxu0 %v8128_v58  ;;  %7209 = vmatmul.mubr.bf16.gmra.mrb[36].mxu1 %v8128_v58  ;;  %v8116_v58 = vrot.slane %v1608_v49, 9 }
 0x137   : > { %6253 = vmatprep.mubr.bf16.mxu0 %v9514_v59  ;;  %7218 = vmatprep.mubr.bf16.mxu1 %v9514_v59  ;;  %v1610_v59 = vld [vmem:[#allocation2 + $0x120] sm:$0xe] }
 0x138   : > { %v8117_v62 = vrot.slane %v1610_v59, 9  ;;  %v1800_v21 = vsel %vm10483_vm11, %v8116_v58, %v1799_v1  ;;  %v10785_v58 = vld [vmem:[#allocation2 + $0x24] sm:$0x1]  ;;  %v2041_v59 = vld [vmem:[#allocation2 + $0x28] sm:$0xf]  ;;  %v2143_v1 = vshll.u32 %v2039_v43, 16 }
 0x139   : > { %v2154_v11 = vshrl.u32 %v2041_v59, 16 }
 0x13a   : > { %v1804_v47 = vsel %vm10483_vm11, %v8117_v62, %v1803_v19  ;;  %v2145_v19 = vrot.slane %v2143_v1, 5 }
 0x13e   : > { %6254 = vmatmul.mubr.bf16.gmra.mrb[40].mxu0 %v8129_v12  ;;  %7219 = vmatmul.mubr.bf16.gmra.mrb[40].mxu1 %v8129_v12  ;;  %v2034_v12 = vld [vmem:[#allocation2 + $0xc] sm:$0x1] }
 0x13f   : > { %6263 = vmatprep.mubr.bf16.mxu0 %v9521_v13  ;;  %7228 = vmatprep.mubr.bf16.mxu1 %v9521_v13  ;;  %v2100_v13 = vrot.slane %v2098_v61, 4  ;;  %v2107_v29 = vshll.u32 %v2034_v12, 16  ;;  %v2760_v61 = vsel %vm10483_vm11, %v8168_v28, %v2759_v36  ;;  %v2157_v12 = vshll.u32 %v2041_v59, 16  ;;  %v2044_v28 = vld [vmem:[#allocation2 + $0x34] sm:$0x1] }
 0x140   : > { %v2177_v45 = vshll.u32 %v2044_v28, 16 }
 0x141   : > { %v2104_v31 = vor.u32 %v2103_v14, %v2100_v13  ;;  %v10777_v49 = vrot.slane %v2107_v29, 5  ;;  %v2119_v13 = vrot.slane %v2118_v55, 4  ;;  %v2767_v14 = vrot.slane %v10785_v58, 5 }
 0x142   : > { %v8199_v29 = vcombine.low %v2756_v53, %v2760_v61  ;;  %v2159_v32 = vrot.slane %v2157_v12, 5  ;;  %v8172_v53 = vrot.slane %v10800_v27, 9 }
 0x143   : > { %v10781_v54 = vrot.slane %v2104_v31, 4  ;;  %v2156_v31 = vrot.slane %v2154_v11, 4  ;;  %v2768_v59 = vsel %vm10483_vm11, %v8170_v10, %v2767_v14 }
 0x145   : > { %v2110_v30 = vsel %vm10071_vm8, %v10781_v54, %v10777_v49  ;;  %v2771_v49 = vrot.slane %v10794_v20, 5  ;;  %v2775_v54 = vrot.slane %v10806_v34, 5  ;;  %v2160_v55 = vor.u32 %v2159_v32, %v2156_v31  ;;  %v2051_v20 = vld [vmem:[#allocation2 + $0x60] sm:$0xf]  ;;  %v9565_v32 = vld [vmem:[%s11925_s1 + $0x628] ss:$16 sps:$4 sm:$0xff]  }
 0x146   : > { %6264 = vmatmul.mubr.bf16.gmra.mrb[44].mxu0 %v8130_v22  ;;  %7229 = vmatmul.mubr.bf16.gmra.mrb[44].mxu1 %v8130_v22  ;;  %v8118_v22 = vrot.slane %v1612_v6, 9  ;;  %v2135_v6 = vshll.u32 %v2038_v50, 16  ;;  %v2182_v50 = vshrl.u32 %v2045_v33, 16  ;;  %v9562_v31 = vld [vmem:[%s11925_s1 + $0x620] ss:$16 sps:$4 sm:$0xff]  }
 0x147   : > { %6273 = vmatprep.mubr.bf16.mxu0 %v9528_v24  ;;  %7238 = vmatprep.mubr.bf16.mxu1 %v9528_v24  ;;  %v1807_v24 = vrot.slane %v1613_v8, 5  ;;  %v2149_v8 = vshll.u32 %v2040_v51, 16  ;;  %v2185_v51 = vshll.u32 %v2045_v33, 16  ;;  %v10871_v33 = vld [vmem:[#allocation2 + $0x58] sm:$0xe] }
 0x148   : > { %v10796_v25 = vrot.slane %v2135_v6, 5  ;;  %v10837_v6 = vrot.slane %v2177_v45, 5  ;;  %v2184_v10 = vrot.slane %v2182_v50, 4  ;;  %v10873_v34 = vld [vmem:[#allocation2 + $0x5c] sm:$0x1]  ;;  %v2227_v45 = vshll.u32 %v2051_v20, 16 }
 0x149   : > { %v1808_v48 = vsel %vm10483_vm11, %v8118_v22, %v1807_v24  ;;  %v10798_v26 = vrot.slane %v2149_v8, 5  ;;  %v10839_v8 = vld [vmem:[#allocation2 + $0x40] sm:$0xe]  ;;  %v2187_v11 = vrot.slane %v2185_v51, 5  ;;  %v10889_v50 = vld [vmem:[#allocation2 + $0x64] sm:$0x1] }
 0x14a   : > { %v8134_v22 = vcombine.low %v1804_v47, %v1808_v48  ;;  %v712_v47 = vld [vmem:[#allocation2 + $0x94] sm:$0x1] }
 0x14b   : > { %v713_v58 = vsel %vm10008_vm5, %v419_v52, %v712_v47  ;;  %v2640_v47 = vld [vmem:[#allocation2 + $0x44] sm:$0x1] }
 0x14c   : > { %714 = vst [vmem:[#allocation2 + $0x94] sm:$0x1] %v713_v58  ;;  %v8175_v58 = vrot.slane %v10871_v33, 9 }
 0x14e   : > { %6274 = vmatmul.mubr.bf16.gmra.mrb[48].mxu0 %v8131_v37  ;;  %7239 = vmatmul.mubr.bf16.gmra.mrb[48].mxu1 %v8131_v37  ;;  %v2630_v37 = vld [vmem:[#allocation2 + $0x1c] sm:$0x1] }
 0x14f   : > { %6283 = vmatprep.mubr.bf16.mxu0 %v9535_v39  ;;  %7248 = vmatprep.mubr.bf16.mxu1 %v9535_v39  ;;  %v8133_v39 = vcombine.low %v1796_v18, %v1800_v21  ;;  %v2763_v9 = vrot.slane %v2630_v37, 5  ;;  %v2171_v18 = vshll.u32 %v2043_v4, 16  ;;  %v2042_v21 = vld [vmem:[#allocation2 + $0x2c] sm:$0x1]  ;;  %v2124_v37 = vsel %vm10071_vm8, %v2119_v13, %v10783_v56  ;;  %v2046_v56 = vld [vmem:[#allocation2 + $0x3c] sm:$0x1] }
 0x150   : > { %v2163_v36 = vshll.u32 %v2042_v21, 16  ;;  %v2191_v12 = vshll.u32 %v2046_v56, 16  ;;  %v2049_v13 = vld [vmem:[#allocation2 + $0x58] sm:$0xf]  ;;  %v9567_v21 = vld [vmem:[%s11925_s1 + $0x62c] ss:$16 sps:$4 sm:$0xff]  }
 0x151   : > { %v2764_v40 = vsel %vm10483_vm11, %v8169_v63, %v2763_v9  ;;  %v10825_v63 = vld [vmem:[#allocation2 + $0x38] sm:$0xe]  ;;  %v8151_v9 = vcombine.low %v2110_v30, %v2124_v37 }
 0x152   : > { %v8200_v14 = vcombine.low %v2764_v40, %v2768_v59  ;;  %v10881_v37 = vrot.slane %v2191_v12, 5  ;;  %v10883_v40 = vld [vmem:[#allocation2 + $0x60] sm:$0xe]  ;;  %v2050_v59 = vld [vmem:[#allocation2 + $0x5c] sm:$0x1] }
 0x153   : > { %v9576_v12 = vld [vmem:[%s11925_s1 + $0x664] ss:$16 sps:$4 sm:$0xff]  }
 0x156   : > { %6284 = vmatmul.mubr.bf16.gmra.mrb[52].mxu0 %v8132_v5  ;;  %7249 = vmatmul.mubr.bf16.gmra.mrb[52].mxu1 %v8132_v5  ;;  %v2131_v5 = vrot.slane %v2129_v46, 5  ;;  %v2047_v46 = vld [vmem:[#allocation2 + $0x40] sm:$0xf] }
 0x157   : > { %6293 = vmatprep.mubr.bf16.mxu0 %v9542_v0  ;;  %7258 = vmatprep.mubr.bf16.mxu1 %v9542_v0  ;;  %v2140_v0 = vshrl.u32 %v2039_v43, 16  ;;  %v2196_v1 = vshrl.u32 %v2047_v46, 16  ;;  %v2199_v4 = vshll.u32 %v2047_v46, 16 }
 0x158   : > { %v2132_v24 = vor.u32 %v2131_v5, %v2128_v57  ;;  %v9556_v57 = vld [vmem:[%s11925_s1 + $0x600] ss:$16 sps:$4 sm:$0xff]   ;;  %v10835_v5 = vrot.slane %v2163_v36, 5  ;;  %v2210_v36 = vshrl.u32 %v2049_v13, 16 }
 0x159   : > { %v2142_v62 = vrot.slane %v2140_v0, 4  ;;  %v10827_v0 = vld [vmem:[#allocation2 + $0x3c] sm:$0x1]  ;;  %v10854_v27 = vrot.slane %v2196_v1, 4  ;;  %v10856_v28 = vrot.slane %v2199_v4, 5 }
 0x15a   : > { %v10814_v48 = vrot.slane %v2132_v24, 4  ;;  %v8174_v24 = vrot.slane %v10839_v8, 9  ;;  %v2053_v4 = vld [vmem:[#allocation2 + $0x68] sm:$0xf] }
 0x15b   : > { %v2146_v43 = vor.u32 %v2145_v19, %v2142_v62  ;;  %v8173_v62 = vrot.slane %v10825_v63, 9  ;;  %v2779_v19 = vrot.slane %v10827_v0, 5  ;;  %v2202_v56 = vor.u32 %v10856_v28, %v10854_v27  ;;  %v10913_v27 = vld [vmem:[#allocation2 + $0x68] sm:$0xe]  ;;  %v9574_v63 = vld [vmem:[%s11925_s1 + $0x660] ss:$16 sps:$4 sm:$0xff]  }
 0x15c   : > { %v2238_v28 = vshrl.u32 %v2053_v4, 16 }
 0x15d   : > { %v2147_v52 = vrot.slane %v2146_v43, 4  ;;  %v2224_v43 = vshrl.u32 %v2051_v20, 16  ;;  %v2055_v20 = vld [vmem:[#allocation2 + $0x70] sm:$0xf] }
 0x15e   : > { %6294 = vmatmul.mubr.bf16.gmra.mrb[56].mxu0 %v8133_v39  ;;  %7259 = vmatmul.mubr.bf16.gmra.mrb[56].mxu1 %v8133_v39  ;;  %v2173_v39 = vrot.slane %v2171_v18, 5  ;;  %v10844_v18 = vrot.slane %v2160_v55, 4  ;;  %v2776_v55 = vsel %vm10483_vm11, %v8172_v53, %v2775_v54  ;;  %v9568_v53 = vld [vmem:[%s11925_s1 + $0x640] ss:$16 sps:$4 sm:$0xff]   ;;  %v9571_v54 = vld [vmem:[%s11925_s1 + $0x648] ss:$16 sps:$4 sm:$0xff]  }
 0x15f   : > { %6303 = vmatprep.mubr.bf16.mxu0 %v9549_v35  ;;  %7268 = vmatprep.mubr.bf16.mxu1 %v9549_v35  ;;  %v8171_v35 = vrot.slane %v10792_v15, 9  ;;  %v2152_v30 = vsel %vm10071_vm8, %v2147_v52, %v10798_v26  ;;  %v9573_v26 = vld [vmem:[%s11925_s1 + $0x64c] ss:$16 sps:$4 sm:$0xff]   ;;  %v2052_v15 = vld [vmem:[#allocation2 + $0x64] sm:$0x1]  ;;  %v2226_v52 = vrot.slane %v2224_v43, 4 }
 0x160   : > { %v2174_v61 = vor.u32 %v2173_v39, %v2170_v38  ;;  %v2213_v38 = vshll.u32 %v2049_v13, 16  ;;  %v2188_v39 = vor.u32 %v2187_v11, %v2184_v10  ;;  %v2783_v11 = vrot.slane %v2640_v47, 5  ;;  %v9579_v13 = vld [vmem:[%s11925_s1 + $0x66c] ss:$16 sps:$4 sm:$0xff]  }
 0x161   : > { %v2772_v46 = vsel %vm10483_vm11, %v8171_v35, %v2771_v49  ;;  %v2787_v35 = vrot.slane %v10873_v34, 5  ;;  %v8176_v49 = vrot.slane %v10883_v40, 9  ;;  %v8177_v47 = vrot.slane %v10913_v27, 9  ;;  %v9601_v27 = vld [vmem:[%s11925_s1 + $0x6e8] ss:$16 sps:$4 sm:$0xff]  }
 0x162   : > { %v2215_v1 = vrot.slane %v2213_v38, 5  ;;  %v8201_v10 = vcombine.low %v2772_v46, %v2776_v55  ;;  %v10927_v38 = vld [vmem:[#allocation2 + $0x6c] sm:$0x1]  ;;  %v2255_v55 = vshll.u32 %v2055_v20, 16 }
 0x163   : > { %v9585_v46 = vld [vmem:[%s11925_s1 + $0x68c] ss:$16 sps:$4 sm:$0xff]   ;;  %v2795_v8 = vrot.slane %v10927_v38, 5  ;;  %v9598_v38 = vld [vmem:[%s11925_s1 + $0x6e0] ss:$16 sps:$4 sm:$0xff]  }
 0x165   : > { %v2796_v44 = vsel %vm10483_vm11, %v8177_v47, %v2795_v8 }
 0x166   : > { %6304 = vmatmul.mubr.bf16.gmra.mrb[60].mxu0 %v8134_v22  ;;  %7269 = vmatmul.mubr.bf16.gmra.mrb[60].mxu1 %v8134_v22  ;;  %v10851_v22 = vrot.slane %v2174_v61, 4  ;;  %v2212_v61 = vrot.slane %v2210_v36, 4 }
 0x167   : > { %6346 = vmatprep.mubr.bf16.mxu0 %v8199_v29  ;;  %7311 = vmatprep.mubr.bf16.mxu1 %v8199_v29  ;;  %v2138_v29 = vsel %vm10071_vm8, %v10814_v48, %v10796_v25  ;;  %v9570_v25 = vld [vmem:[%s11925_s1 + $0x644] ss:$16 sps:$4 sm:$0xff]  }
 0x168   : > { %v2048_v48 = vld [vmem:[#allocation2 + $0x44] sm:$0x1]  ;;  %v8152_v51 = vcombine.low %v2138_v29, %v2152_v30  ;;  %v2241_v29 = vshll.u32 %v2053_v4, 16  ;;  %v2166_v30 = vsel %vm10071_vm8, %v10844_v18, %v10835_v5  ;;  %v2216_v36 = vor.u32 %v2215_v1, %v2212_v61  ;;  %v9577_v18 = vld [vmem:[%s11925_s1 + $0x668] ss:$16 sps:$4 sm:$0xff]  }
 0x169   : > { %v2180_v5 = vsel %vm10071_vm8, %v10851_v22, %v10837_v6  ;;  %v2784_v6 = vsel %vm10483_vm11, %v8174_v24, %v2783_v11  ;;  %v2240_v24 = vrot.slane %v2238_v28, 4  ;;  %v2057_v1 = vld [vmem:[#allocation2 + $0x78] sm:$0xf]  ;;  %v10979_v28 = vld [vmem:[#allocation2 + $0x84] sm:$0x1] }
 0x16a   : > { %v8153_v4 = vcombine.low %v2166_v30, %v2180_v5  ;;  %v2269_v30 = vshll.u32 %v2057_v1, 16  ;;  %v2807_v40 = vrot.slane %v10979_v28, 5  ;;  %v9621_v28 = vld [vmem:[%s11925_s1 + $0x74c] ss:$16 sps:$4 sm:$0xff]  }
 0x16e   : > { %6347 = vmatmul.mubr.bf16.vlgmr.msra.gmra.mrb[0].mxu0 %v8151_v9  ;;  %7312 = vmatmul.mubr.bf16.vlgmr.msra.gmra.mrb[0].mxu1 %v8151_v9  ;;  %v2229_v9 = vrot.slane %v2227_v45, 5  ;;  %v9582_v45 = vld [vmem:[%s11925_s1 + $0x684] ss:$16 sps:$4 sm:$0xff]  }
 0x16f   : > { %6508 = vmatpush1.bf16.msra.mxu0 %v9556_v57  ;;  %7473 = vmatpush1.bf16.msra.mxu1 %v9559_v41  ;;  %v10904_v57 = vrot.slane %v2188_v39, 4  ;;  %v2205_v41 = vshll.u32 %v2048_v48, 16  ;;  %v2252_v39 = vshrl.u32 %v2055_v20, 16  ;;  %v2056_v48 = vld [vmem:[#allocation2 + $0x74] sm:$0x1]  ;;  %v2257_v20 = vrot.slane %v2255_v55, 5 }
 0x170   : > { %6356 = vmatprep.mubr.bf16.mxu0 %v8200_v14  ;;  %7321 = vmatprep.mubr.bf16.mxu1 %v8200_v14  ;;  %v2219_v14 = vshll.u32 %v2050_v59, 16 }
 0x171   : > { %6509 = vmatprep.subr.bf16.mxu0 %v9564_v16  ;;  %7474 = vmatprep.subr.bf16.mxu1 %v9567_v21  ;;  %v2233_v16 = vshll.u32 %v2052_v15, 16  ;;  %v2791_v21 = vrot.slane %v10889_v50, 5  ;;  %v10935_v0 = vrot.slane %v2205_v41, 5 }
 0x172   : > { %v10949_v22 = vrot.slane %v2219_v14, 5  ;;  %v2059_v14 = vld [vmem:[#allocation2 + $0x80] sm:$0xf] }
 0x173   : > { %6510 = vmatpush1.bf16.msra.mxu0 %v9562_v31  ;;  %7475 = vmatpush1.bf16.msra.mxu1 %v9565_v32  ;;  %v2780_v31 = vsel %vm10483_vm11, %v8173_v62, %v2779_v19  ;;  %v10925_v32 = vrot.slane %v2202_v56, 4  ;;  %v2230_v62 = vor.u32 %v2229_v9, %v2226_v52  ;;  %v10943_v19 = vld [vmem:[#allocation2 + $0x74] sm:$0x1]  ;;  %v10951_v43 = vrot.slane %v2233_v16, 5 }
 0x174   : > { %6511 = vmatprep.subr.bf16.mxu0 %v9570_v25  ;;  %7476 = vmatprep.subr.bf16.mxu1 %v9573_v26  ;;  %v10929_v25 = vld [vmem:[#allocation2 + $0x70] sm:$0xe]  ;;  %v2054_v26 = vld [vmem:[#allocation2 + $0x6c] sm:$0x1]  ;;  %v10961_v56 = vrot.slane %v2216_v36, 4  ;;  %v2799_v15 = vrot.slane %v10943_v19, 5  ;;  %v8202_v11 = vcombine.low %v2780_v31, %v2784_v6  ;;  %v2194_v36 = vsel %vm10071_vm8, %v10904_v57, %v10881_v37 }
 0x175   : > { %v8178_v59 = vrot.slane %v10929_v25, 9  ;;  %v2247_v61 = vshll.u32 %v2054_v26, 16  ;;  %v10965_v41 = vrot.slane %v2230_v62, 4  ;;  %v2254_v52 = vrot.slane %v2252_v39, 4  ;;  %v9586_v39 = vld [vmem:[%s11925_s1 + $0x6a0] ss:$16 sps:$4 sm:$0xff]  }
 0x176   : > { %6357 = vmatmul.mubr.bf16.gmra.mrb[4].mxu0 %v8152_v51  ;;  %7322 = vmatmul.mubr.bf16.gmra.mrb[4].mxu1 %v8152_v51  ;;  %v2243_v51 = vrot.slane %v2241_v29, 5  ;;  %v2261_v9 = vshll.u32 %v2056_v48, 16  ;;  %v2266_v29 = vshrl.u32 %v2057_v1, 16  ;;  %v2788_v31 = vsel %vm10483_vm11, %v8175_v58, %v2787_v35  ;;  %v2058_v58 = vld [vmem:[#allocation2 + $0x7c] sm:$0x1] }
 0x177   : > { %6366 = vmatprep.mubr.bf16.mxu0 %v8201_v10  ;;  %7331 = vmatprep.mubr.bf16.mxu1 %v8201_v10  ;;  %v10973_v10 = vld [vmem:[#allocation2 + $0x78] sm:$0xe]  ;;  %v10991_v5 = vrot.slane %v2247_v61, 5  ;;  %v2208_v33 = vsel %vm10071_vm8, %v10925_v32, %v10935_v0  ;;  %v2792_v34 = vsel %vm10483_vm11, %v8176_v49, %v2791_v21  ;;  %v2060_v35 = vld [vmem:[#allocation2 + $0x84] sm:$0x1]  ;;  %v2280_v57 = vshrl.u32 %v2059_v14, 16 }
 0x178   : > { %6512 = vmatpush1.bf16.msra.mxu0 %v9568_v53  ;;  %7477 = vmatpush1.bf16.msra.mxu1 %v9571_v54  ;;  %v9580_v53 = vld [vmem:[%s11925_s1 + $0x680] ss:$16 sps:$4 sm:$0xff]   ;;  %v9583_v54 = vld [vmem:[%s11925_s1 + $0x688] ss:$16 sps:$4 sm:$0xff]   ;;  %v2244_v16 = vor.u32 %v2243_v51, %v2240_v24  ;;  %v8179_v37 = vrot.slane %v10973_v10, 9  ;;  %v2283_v62 = vshll.u32 %v2059_v14, 16  ;;  %v2258_v21 = vor.u32 %v2257_v20, %v2254_v52 }
 0x179   : > { %6513 = vmatprep.subr.bf16.mxu0 %v9576_v12  ;;  %7478 = vmatprep.subr.bf16.mxu1 %v9579_v13  ;;  %v10975_v12 = vld [vmem:[#allocation2 + $0x7c] sm:$0x1]  ;;  %v10977_v13 = vld [vmem:[#allocation2 + $0x80] sm:$0xe]  ;;  %v11010_v26 = vrot.slane %v2261_v9, 5  ;;  %v2268_v6 = vrot.slane %v2266_v29, 4  ;;  %v8154_v55 = vcombine.low %v2194_v36, %v2208_v33  ;;  %v2236_v36 = vsel %vm10071_vm8, %v10965_v41, %v10951_v43 }
 0x17a   : > { %v2803_v32 = vrot.slane %v10975_v12, 5  ;;  %v8180_v50 = vrot.slane %v10977_v13, 9  ;;  %v11018_v49 = vrot.slane %v2244_v16, 4  ;;  %v9589_v0 = vld [vmem:[%s11925_s1 + $0x6a8] ss:$16 sps:$4 sm:$0xff]   ;;  %v2289_v48 = vshll.u32 %v2060_v35, 16 }
 0x17b   : > { %v9594_v24 = vld [vmem:[%s11925_s1 + $0x6c4] ss:$16 sps:$4 sm:$0xff]   ;;  %v9597_v51 = vld [vmem:[%s11925_s1 + $0x6cc] ss:$16 sps:$4 sm:$0xff]   ;;  %v2282_v61 = vrot.slane %v2280_v57, 4  ;;  %v2285_v1 = vrot.slane %v2283_v62, 5 }
 0x17c   : > { %6514 = vmatpush1.bf16.msra.mxu0 %v9574_v63  ;;  %7479 = vmatpush1.bf16.msra.mxu1 %v9577_v18  ;;  %v9588_v63 = vld [vmem:[%s11925_s1 + $0x6a4] ss:$16 sps:$4 sm:$0xff]   ;;  %v9591_v18 = vld [vmem:[%s11925_s1 + $0x6ac] ss:$16 sps:$4 sm:$0xff]   ;;  %v11035_v52 = vld [vmem:[#allocation2 + $0x88] sm:$0xe] }
 0x17d   : > { %6515 = vmatprep.subr.bf16.mxu0 %v9582_v45  ;;  %7480 = vmatprep.subr.bf16.mxu1 %v9585_v46  ;;  %v2271_v45 = vrot.slane %v2269_v30, 5  ;;  %v2275_v46 = vshll.u32 %v2058_v58, 16  ;;  %v11037_v9 = vld [vmem:[#allocation2 + $0x8c] sm:$0x1]  ;;  %v11039_v14 = vrot.slane %v2258_v21, 4  ;;  %v2222_v30 = vsel %vm10071_vm8, %v10961_v56, %v10949_v22 }
 0x17e   : > { %6367 = vmatmul.mubr.bf16.gmra.mrb[8].mxu0 %v8153_v4  ;;  %7332 = vmatmul.mubr.bf16.gmra.mrb[8].mxu1 %v8153_v4  ;;  %v9592_v4 = vld [vmem:[%s11925_s1 + $0x6c0] ss:$16 sps:$4 sm:$0xff]   ;;  %v760_v29 = vld [vmem:[#allocation2 + $0xe4] sm:$0x1]  ;;  %v9603_v33 = vld [vmem:[%s11925_s1 + $0x6ec] ss:$16 sps:$4 sm:$0xff]   ;;  %v2286_v22 = vor.u32 %v2285_v1, %v2282_v61  ;;  %v8155_v47 = vcombine.low %v2222_v30, %v2236_v36 }
 0x17f   : > { %6376 = vmatprep.mubr.bf16.mxu0 %v8202_v11  ;;  %7341 = vmatprep.mubr.bf16.mxu1 %v8202_v11  ;;  %v2061_v11 = vld [vmem:[#allocation2 + $0x88] sm:$0xf]  ;;  %v2272_v16 = vor.u32 %v2271_v45, %v2268_v6  ;;  %v2063_v20 = vld [vmem:[#allocation2 + $0x90] sm:$0xf]  ;;  %v2062_v56 = vld [vmem:[#allocation2 + $0x8c] sm:$0x1]  ;;  %v761_v41 = vsel %vm10008_vm5, %v483_v17, %v760_v29  ;;  %v2800_v17 = vsel %vm10483_vm11, %v8178_v59, %v2799_v15 }
 0x180   : > { %6516 = vmatpush1.bf16.msra.mxu0 %v9580_v53  ;;  %7481 = vmatpush1.bf16.msra.mxu1 %v9583_v54  ;;  %v9595_v53 = vld [vmem:[%s11925_s1 + $0x6c8] ss:$16 sps:$4 sm:$0xff]   ;;  %v8203_v54 = vcombine.low %v2788_v31, %v2792_v34  ;;  %v11049_v31 = vrot.slane %v2275_v46, 5  ;;  %v2294_v34 = vshrl.u32 %v2061_v11, 16  ;;  %v2297_v43 = vshll.u32 %v2061_v11, 16 }
 0x181   : > { %6517 = vmatprep.subr.bf16.mxu0 %v9588_v63  ;;  %7482 = vmatprep.subr.bf16.mxu1 %v9591_v18  ;;  %v11051_v63 = vrot.slane %v2289_v48, 5  ;;  %v9600_v18 = vld [vmem:[%s11925_s1 + $0x6e4] ss:$16 sps:$4 sm:$0xff]   ;;  %v11063_v58 = vld [vmem:[#allocation2 + $0x90] sm:$0xe]  ;;  %v8181_v35 = vrot.slane %v11035_v52, 9  ;;  %v8204_v45 = vcombine.low %v2796_v44, %v2800_v17  ;;  %v2250_v11 = vsel %vm10071_vm8, %v11018_v49, %v10991_v5 }
 0x182   : > { %v2811_v57 = vrot.slane %v11037_v9, 5  ;;  %v2308_v62 = vshrl.u32 %v2063_v20, 16  ;;  %762 = vst [vmem:[#allocation2 + $0xe4] sm:$0x1] %v761_v41  ;;  %v11079_v21 = vrot.slane %v2272_v16, 4  ;;  %v2303_v8 = vshll.u32 %v2062_v56, 16 }
 0x183   : > { %v9606_v25 = vld [vmem:[%s11925_s1 + $0x704] ss:$16 sps:$4 sm:$0xff]   ;;  %v9609_v19 = vld [vmem:[%s11925_s1 + $0x70c] ss:$16 sps:$4 sm:$0xff]   ;;  %v11093_v59 = vrot.slane %v2286_v22, 4  ;;  %v8182_v15 = vrot.slane %v11063_v58, 9  ;;  %v2264_v16 = vsel %vm10071_vm8, %v11039_v14, %v11010_v26  ;;  %v2804_v5 = vsel %vm10483_vm11, %v8179_v37, %v2803_v32 }
 0x184   : > { %6518 = vmatpush1.bf16.msra.mxu0 %v9586_v39  ;;  %7483 = vmatpush1.bf16.msra.mxu1 %v9589_v0  ;;  %v2311_v39 = vshll.u32 %v2063_v20, 16  ;;  %v2296_v0 = vrot.slane %v2294_v34, 4  ;;  %v2299_v6 = vrot.slane %v2297_v43, 5  ;;  %v2310_v46 = vrot.slane %v2308_v62, 4  ;;  %v9604_v61 = vld [vmem:[%s11925_s1 + $0x700] ss:$16 sps:$4 sm:$0xff]  }
 0x185   : > { %6519 = vmatprep.subr.bf16.mxu0 %v9594_v24  ;;  %7484 = vmatprep.subr.bf16.mxu1 %v9597_v51  ;;  %v11096_v24 = vld [vmem:[#allocation2 + $0xa8] sm:$0xe]  ;;  %v11098_v51 = vld [vmem:[#allocation2 + $0xac] sm:$0x1]  ;;  %v2656_v20 = vld [vmem:[#allocation2 + $0x94] sm:$0x1]  ;;  %v2808_v26 = vsel %vm10483_vm11, %v8180_v50, %v2807_v40  ;;  %v8156_v37 = vcombine.low %v2250_v11, %v2264_v16 }
 0x186   : > { %6377 = vmatmul.mubr.bf16.gmra.mrb[12].mxu0 %v8154_v55  ;;  %7342 = vmatmul.mubr.bf16.gmra.mrb[12].mxu1 %v8154_v55  ;;  %v2313_v48 = vrot.slane %v2311_v39, 5  ;;  %v11100_v55 = vld [vmem:[#allocation2 + $0xb0] sm:$0xe]  ;;  %v9607_v1 = vld [vmem:[%s11925_s1 + $0x708] ss:$16 sps:$4 sm:$0xff]   ;;  %v8183_v30 = vrot.slane %v11096_v24, 9  ;;  %v8205_v41 = vcombine.low %v2804_v5, %v2808_v26 }
 0x187   : > { %6386 = vmatprep.mubr.bf16.mxu0 %v8203_v54  ;;  %7351 = vmatprep.mubr.bf16.mxu1 %v8203_v54  ;;  %v9615_v54 = vld [vmem:[%s11925_s1 + $0x72c] ss:$16 sps:$4 sm:$0xff]   ;;  %v11124_v29 = vld [vmem:[#allocation2 + $0xb4] sm:$0x1]  ;;  %v2819_v36 = vrot.slane %v11098_v51, 5  ;;  %v2815_v62 = vrot.slane %v2656_v20, 5 }
 0x188   : > { %6520 = vmatpush1.bf16.msra.mxu0 %v9592_v4  ;;  %7485 = vmatpush1.bf16.msra.mxu1 %v9595_v53  ;;  %v11108_v4 = vrot.slane %v2303_v8, 5  ;;  %v9612_v53 = vld [vmem:[%s11925_s1 + $0x724] ss:$16 sps:$4 sm:$0xff]   ;;  %v2065_v22 = vld [vmem:[#allocation2 + $0xa8] sm:$0xf]  ;;  %v2314_v14 = vor.u32 %v2313_v48, %v2310_v46  ;;  %v2823_v44 = vrot.slane %v11124_v29, 5  ;;  %v2278_v8 = vsel %vm10071_vm8, %v11079_v21, %v11049_v31 }
 0x189   : > { %6521 = vmatprep.subr.bf16.mxu0 %v9600_v18  ;;  %7486 = vmatprep.subr.bf16.mxu1 %v9603_v33  ;;  %v2300_v18 = vor.u32 %v2299_v6, %v2296_v0  ;;  %v8184_v33 = vrot.slane %v11100_v55, 9  ;;  %v2067_v56 = vld [vmem:[#allocation2 + $0xb0] sm:$0xf]  ;;  %v2064_v49 = vld [vmem:[#allocation2 + $0x94] sm:$0x1]  ;;  %v2322_v50 = vshrl.u32 %v2065_v22, 16 }
 0x18a   : > { %v9610_v12 = vld [vmem:[%s11925_s1 + $0x720] ss:$16 sps:$4 sm:$0xff]   ;;  %v9613_v10 = vld [vmem:[%s11925_s1 + $0x728] ss:$16 sps:$4 sm:$0xff]   ;;  %v2066_v32 = vld [vmem:[#allocation2 + $0xac] sm:$0x1] }
 0x18b   : > { %v9618_v13 = vld [vmem:[%s11925_s1 + $0x744] ss:$16 sps:$4 sm:$0xff]   ;;  %v2325_v40 = vshll.u32 %v2065_v22, 16  ;;  %v2336_v34 = vshrl.u32 %v2067_v56, 16  ;;  %v2339_v43 = vshll.u32 %v2067_v56, 16  ;;  %v11153_v39 = vrot.slane %v2300_v18, 4 }
 0x18c   : > { %6522 = vmatpush1.bf16.msra.mxu0 %v9598_v38  ;;  %7487 = vmatpush1.bf16.msra.mxu1 %v9601_v27  ;;  %v2068_v17 = vld [vmem:[#allocation2 + $0xb4] sm:$0x1]  ;;  %v11156_v38 = vrot.slane %v2314_v14, 4  ;;  %v9616_v27 = vld [vmem:[%s11925_s1 + $0x740] ss:$16 sps:$4 sm:$0xff]   ;;  %v2331_v0 = vshll.u32 %v2066_v32, 16 }
 0x18d   : > { %6523 = vmatprep.subr.bf16.mxu0 %v9606_v25  ;;  %7488 = vmatprep.subr.bf16.mxu1 %v9609_v19  ;;  %v2292_v25 = vsel %vm10071_vm8, %v11093_v59, %v11051_v63  ;;  %v2317_v19 = vshll.u32 %v2064_v49, 16  ;;  %v9624_v6 = vld [vmem:[%s11925_s1 + $0x764] ss:$16 sps:$4 sm:$0xff]   ;;  %v2324_v31 = vrot.slane %v2322_v50, 4  ;;  %v2327_v21 = vrot.slane %v2325_v40, 5 }
 0x18e   : > { %6387 = vmatmul.mubr.bf16.gmra.mrb[16].mxu0 %v8155_v47  ;;  %7352 = vmatmul.mubr.bf16.gmra.mrb[16].mxu1 %v8155_v47  ;;  %v9619_v47 = vld [vmem:[%s11925_s1 + $0x748] ss:$16 sps:$4 sm:$0xff]   ;;  %v2338_v46 = vrot.slane %v2336_v34, 4  ;;  %v2341_v48 = vrot.slane %v2339_v43, 5  ;;  %v2812_v63 = vsel %vm10483_vm11, %v8181_v35, %v2811_v57  ;;  %v2816_v59 = vsel %vm10483_vm11, %v8182_v15, %v2815_v62  ;;  %v9622_v9 = vld [vmem:[%s11925_s1 + $0x760] ss:$16 sps:$4 sm:$0xff]  }
 0x18f   : > { %6396 = vmatprep.mubr.bf16.mxu0 %v8204_v45  ;;  %7361 = vmatprep.mubr.bf16.mxu1 %v8204_v45  ;;  %v9627_v45 = vld [vmem:[%s11925_s1 + $0x76c] ss:$16 sps:$4 sm:$0xff]   ;;  %v9625_v52 = vld [vmem:[%s11925_s1 + $0x768] ss:$16 sps:$4 sm:$0xff]   ;;  %v8157_v35 = vcombine.low %v2278_v8, %v2292_v25  ;;  %v2319_v58 = vrot.slane %v2317_v19, 5  ;;  %v8206_v11 = vcombine.low %v2812_v63, %v2816_v59  ;;  %v2328_v16 = vor.u32 %v2327_v21, %v2324_v31 }
 0x190   : > { %6524 = vmatpush1.bf16.msra.mxu0 %v9604_v61  ;;  %7489 = vmatpush1.bf16.msra.mxu1 %v9607_v1  ;;  %v2345_v61 = vshll.u32 %v2068_v17, 16  ;;  %v11188_v1 = vld [vmem:[#allocation2 + $0xb8] sm:$0xe]  ;;  %v9630_v57 = vld [vmem:[%s11925_s1 + $0x784] ss:$16 sps:$4 sm:$0xff]   ;;  %v11202_v20 = vrot.slane %v2331_v0, 5  ;;  %v2342_v18 = vor.u32 %v2341_v48, %v2338_v46  ;;  %v2306_v34 = vsel %vm10071_vm8, %v11153_v39, %v11108_v4 }
 0x191   : > { %6525 = vmatprep.subr.bf16.mxu0 %v9612_v53  ;;  %7490 = vmatprep.subr.bf16.mxu1 %v9615_v54  ;;  %v2069_v53 = vld [vmem:[#allocation2 + $0xb8] sm:$0xf]  ;;  %v2071_v54 = vld [vmem:[#allocation2 + $0xc0] sm:$0xf]  ;;  %v9633_v15 = vld [vmem:[%s11925_s1 + $0x78c] ss:$16 sps:$4 sm:$0xff]   ;;  %v2320_v43 = vsel %vm10071_vm8, %v11156_v38, %v2319_v58  ;;  %v2820_v4 = vsel %vm10483_vm11, %v8183_v30, %v2819_v36  ;;  %v2824_v39 = vsel %vm10483_vm11, %v8184_v33, %v2823_v44 }
 0x192   : > { %v11204_v22 = vld [vmem:[#allocation2 + $0xbc] sm:$0x1]  ;;  %v11206_v56 = vld [vmem:[#allocation2 + $0xc0] sm:$0xe]  ;;  %v2350_v5 = vshrl.u32 %v2069_v53, 16  ;;  %v2353_v26 = vshll.u32 %v2069_v53, 16  ;;  %v8158_v33 = vcombine.low %v2306_v34, %v2320_v43  ;;  %v8207_v48 = vcombine.low %v2820_v4, %v2824_v39 }
 0x193   : > { %v2364_v49 = vshrl.u32 %v2071_v54, 16  ;;  %v2367_v14 = vshll.u32 %v2071_v54, 16  ;;  %v9631_v32 = vld [vmem:[%s11925_s1 + $0x788] ss:$16 sps:$4 sm:$0xff]   ;;  %v9636_v50 = vld [vmem:[%s11925_s1 + $0x7a4] ss:$16 sps:$4 sm:$0xff]  }
 0x194   : > { %6526 = vmatpush1.bf16.msra.mxu0 %v9610_v12  ;;  %7491 = vmatpush1.bf16.msra.mxu1 %v9613_v10  ;;  %v11208_v12 = vrot.slane %v2345_v61, 5  ;;  %v8185_v10 = vrot.slane %v11188_v1, 9  ;;  %v9639_v40 = vld [vmem:[%s11925_s1 + $0x7ac] ss:$16 sps:$4 sm:$0xff]   ;;  %v11234_v62 = vrot.slane %v2342_v18, 4  ;;  %v2352_v8 = vrot.slane %v2350_v5, 4 }
 0x195   : > { %6527 = vmatprep.subr.bf16.mxu0 %v9618_v13  ;;  %7492 = vmatprep.subr.bf16.mxu1 %v9621_v28  ;;  %v2827_v13 = vrot.slane %v11204_v22, 5  ;;  %v8186_v28 = vrot.slane %v11206_v56, 9  ;;  %v2070_v17 = vld [vmem:[#allocation2 + $0xbc] sm:$0x1]  ;;  %v2355_v25 = vrot.slane %v2353_v26, 5  ;;  %v2366_v19 = vrot.slane %v2364_v49, 4 }
 0x196   : > { %6397 = vmatmul.mubr.bf16.gmra.mrb[20].mxu0 %v8156_v37  ;;  %7362 = vmatmul.mubr.bf16.gmra.mrb[20].mxu1 %v8156_v37  ;;  %v9628_v37 = vld [vmem:[%s11925_s1 + $0x780] ss:$16 sps:$4 sm:$0xff]   ;;  %v2369_v0 = vrot.slane %v2367_v14, 5  ;;  %v11250_v38 = vld [vmem:[#allocation2 + $0xc8] sm:$0xe]  ;;  %v2359_v30 = vshll.u32 %v2070_v17, 16 }
 0x197   : > { %6406 = vmatprep.mubr.bf16.mxu0 %v8205_v41  ;;  %7371 = vmatprep.mubr.bf16.mxu1 %v8205_v41  ;;  %v11232_v41 = vrot.slane %v2328_v16, 4  ;;  %v9634_v51 = vld [vmem:[%s11925_s1 + $0x7a0] ss:$16 sps:$4 sm:$0xff]   ;;  %v9637_v24 = vld [vmem:[%s11925_s1 + $0x7a8] ss:$16 sps:$4 sm:$0xff]   ;;  %v2356_v63 = vor.u32 %v2355_v25, %v2352_v8  ;;  %v2828_v60 = vsel %vm10483_vm11, %v8185_v10, %v2827_v13 }
 0x198   : > { %6528 = vmatpush1.bf16.msra.mxu0 %v9616_v27  ;;  %7493 = vmatpush1.bf16.msra.mxu1 %v9619_v47  ;;  %v2072_v27 = vld [vmem:[#allocation2 + $0xc4] sm:$0x1]  ;;  %v11258_v36 = vld [vmem:[#allocation2 + $0xcc] sm:$0x1]  ;;  %v11263_v44 = vld [vmem:[#allocation2 + $0xd0] sm:$0xe]  ;;  %v2370_v59 = vor.u32 %v2369_v0, %v2366_v19 }
 0x199   : > { %6529 = vmatprep.subr.bf16.mxu0 %v9624_v6  ;;  %7494 = vmatprep.subr.bf16.mxu1 %v9627_v45  ;;  %v11236_v47 = vld [vmem:[#allocation2 + $0xc4] sm:$0x1]  ;;  %v2073_v6 = vld [vmem:[#allocation2 + $0xc8] sm:$0xf]  ;;  %v2075_v45 = vld [vmem:[#allocation2 + $0xd0] sm:$0xf] }
 0x19a   : > { %v2373_v29 = vshll.u32 %v2072_v27, 16  ;;  %v9642_v55 = vld [vmem:[%s11925_s1 + $0x7c4] ss:$16 sps:$4 sm:$0xff]   ;;  %v11265_v31 = vld [vmem:[#allocation2 + $0xcc] sm:$0x1]  ;;  %v2378_v21 = vshrl.u32 %v2073_v6, 16 }
 0x19b   : > { %v2381_v46 = vshll.u32 %v2073_v6, 16  ;;  %v2392_v61 = vshrl.u32 %v2075_v45, 16  ;;  %v9645_v53 = vld [vmem:[%s11925_s1 + $0x7cc] ss:$16 sps:$4 sm:$0xff]   ;;  %v808_v54 = vld [vmem:[#allocation2 + $0x134] sm:$0x1] }
 0x19c   : > { %6530 = vmatpush1.bf16.msra.mxu0 %v9622_v9  ;;  %7495 = vmatpush1.bf16.msra.mxu1 %v9625_v52  ;;  %v2334_v9 = vsel %vm10071_vm8, %v11232_v41, %v11202_v20  ;;  %v2348_v52 = vsel %vm10071_vm8, %v11234_v62, %v11208_v12  ;;  %v2395_v58 = vshll.u32 %v2075_v45, 16  ;;  %v11287_v16 = vrot.slane %v2373_v29, 5  ;;  %v2076_v49 = vld [vmem:[#allocation2 + $0xd4] sm:$0x1]  ;;  %v2077_v43 = vld [vmem:[#allocation2 + $0xd8] sm:$0xf] }
 0x19d   : > { %6531 = vmatprep.subr.bf16.mxu0 %v9630_v57  ;;  %7496 = vmatprep.subr.bf16.mxu1 %v9633_v15  ;;  %v9640_v57 = vld [vmem:[%s11925_s1 + $0x7c0] ss:$16 sps:$4 sm:$0xff]   ;;  %v9643_v15 = vld [vmem:[%s11925_s1 + $0x7c8] ss:$16 sps:$4 sm:$0xff]   ;;  %v8187_v20 = vrot.slane %v11250_v38, 9  ;;  %v809_v18 = vsel %vm10008_vm5, %v547_v7, %v808_v54  ;;  %v2835_v5 = vrot.slane %v11258_v36, 5  ;;  %v8159_v10 = vcombine.low %v2334_v9, %v2348_v52 }
 0x19e   : > { %6407 = vmatmul.mubr.bf16.gmra.mrb[24].mxu0 %v8157_v35  ;;  %7372 = vmatmul.mubr.bf16.gmra.mrb[24].mxu1 %v8157_v35  ;;  %v2831_v35 = vrot.slane %v11236_v47, 5  ;;  %v8188_v26 = vrot.slane %v11263_v44, 9  ;;  %v2380_v14 = vrot.slane %v2378_v21, 4  ;;  %v2383_v12 = vrot.slane %v2381_v46, 5  ;;  %810 = vst [vmem:[#allocation2 + $0x134] sm:$0x1] %v809_v18 }
 0x19f   : > { %6416 = vmatprep.mubr.bf16.mxu0 %v8206_v11  ;;  %7381 = vmatprep.mubr.bf16.mxu1 %v8206_v11  ;;  %v11285_v11 = vrot.slane %v2359_v30, 5  ;;  %v2387_v42 = vshll.u32 %v11265_v31, 16  ;;  %v2397_v34 = vrot.slane %v2395_v58, 5  ;;  %v9646_v41 = vld [vmem:[%s11925_s1 + $0x7e0] ss:$16 sps:$4 sm:$0xff]   ;;  %v2401_v62 = vshll.u32 %v2076_v49, 16 }
 0x1a0   : > { %6532 = vmatpush1.bf16.msra.mxu0 %v9628_v37  ;;  %7497 = vmatpush1.bf16.msra.mxu1 %v9631_v32  ;;  %v2357_v37 = vrot.slane %v2356_v63, 4  ;;  %v2371_v32 = vrot.slane %v2370_v59, 4  ;;  %v2832_v7 = vsel %vm10483_vm11, %v8186_v28, %v2831_v35  ;;  %v2079_v22 = vld [vmem:[#allocation2 + $0xe0] sm:$0xf]  ;;  %v9648_v1 = vld [vmem:[%s11925_s1 + $0x7e4] ss:$16 sps:$4 sm:$0xff]   ;;  %v2384_v13 = vor.u32 %v2383_v12, %v2380_v14 }
 0x1a1   : > { %6533 = vmatprep.subr.bf16.mxu0 %v9636_v50  ;;  %7498 = vmatprep.subr.bf16.mxu1 %v9639_v40  ;;  %v2668_v50 = vld [vmem:[#allocation2 + $0xd4] sm:$0x1]  ;;  %v2394_v40 = vrot.slane %v2392_v61, 4  ;;  %v2669_v56 = vld [vmem:[#allocation2 + $0xd8] sm:$0xe]  ;;  %v8208_v27 = vcombine.low %v2828_v60, %v2832_v7  ;;  %v2406_v25 = vshrl.u32 %v2077_v43, 16 }
 0x1a2   : > { %v9649_v28 = vld [vmem:[%s11925_s1 + $0x7e8] ss:$16 sps:$4 sm:$0xff]   ;;  %v9651_v17 = vld [vmem:[%s11925_s1 + $0x7ec] ss:$16 sps:$4 sm:$0xff]   ;;  %v11319_v8 = vld [vmem:[#allocation2 + $0xe0] sm:$0xe]  ;;  %v2362_v45 = vsel %vm10071_vm8, %v2357_v37, %v11285_v11  ;;  %v2376_v44 = vsel %vm10071_vm8, %v2371_v32, %v11287_v16 }
 0x1a3   : > { %v2670_v47 = vld [vmem:[#allocation2 + $0xdc] sm:$0x1]  ;;  %v2409_v19 = vshll.u32 %v2077_v43, 16  ;;  %v2839_v0 = vrot.slane %v2668_v50, 5  ;;  %v2398_v6 = vor.u32 %v2397_v34, %v2394_v40  ;;  %v2420_v39 = vshrl.u32 %v2079_v22, 16 }
 0x1a4   : > { %6534 = vmatpush1.bf16.msra.mxu0 %v9634_v51  ;;  %7499 = vmatpush1.bf16.msra.mxu1 %v9637_v24  ;;  %v2078_v4 = vld [vmem:[#allocation2 + $0xdc] sm:$0x1]  ;;  %v2423_v38 = vshll.u32 %v2079_v22, 16  ;;  %v2836_v51 = vsel %vm10483_vm11, %v8187_v20, %v2835_v5  ;;  %v11326_v24 = vrot.slane %v2387_v42, 5  ;;  %v11328_v30 = vrot.slane %v2401_v62, 5 }
 0x1a5   : > { %6535 = vmatprep.subr.bf16.mxu0 %v9642_v55  ;;  %7500 = vmatprep.subr.bf16.mxu1 %v9645_v53  ;;  %v2385_v29 = vrot.slane %v2384_v13, 4  ;;  %v8189_v36 = vrot.slane %v2669_v56, 9  ;;  %v2843_v55 = vrot.slane %v2670_v47, 5  ;;  %v2408_v31 = vrot.slane %v2406_v25, 4  ;;  %v2081_v53 = vld [vmem:[#allocation2 + $0xf8] sm:$0xf] }
 0x1a6   : > { %6417 = vmatmul.mubr.bf16.gmra.mrb[28].mxu0 %v8158_v33  ;;  %7382 = vmatmul.mubr.bf16.gmra.mrb[28].mxu1 %v8158_v33  ;;  %v8190_v33 = vrot.slane %v11319_v8, 9  ;;  %v2411_v21 = vrot.slane %v2409_v19, 5  ;;  %v2415_v46 = vshll.u32 %v2078_v4, 16  ;;  %v2399_v63 = vrot.slane %v2398_v6, 4  ;;  %v2672_v54 = vld [vmem:[#allocation2 + $0xe4] sm:$0x1] }
 0x1a7   : > { %6426 = vmatprep.mubr.bf16.mxu0 %v8207_v48  ;;  %7391 = vmatprep.mubr.bf16.mxu1 %v8207_v48  ;;  %v2840_v48 = vsel %vm10483_vm11, %v8188_v26, %v2839_v0  ;;  %v2422_v59 = vrot.slane %v2420_v39, 4  ;;  %v2425_v61 = vrot.slane %v2423_v38, 5  ;;  %v2080_v9 = vld [vmem:[#allocation2 + $0xe4] sm:$0x1]  ;;  %v2673_v52 = vld [vmem:[#allocation2 + $0xf8] sm:$0xe]  ;;  %v8160_v58 = vcombine.low %v2362_v45, %v2376_v44 }
 0x1a8   : > { %6536 = vmatpush1.bf16.msra.mxu0 %v9640_v57  ;;  %7501 = vmatpush1.bf16.msra.mxu1 %v9643_v15  ;;  %v9655_v35 = vld [vmem:[%s11925_s1 + $0x804] ss:$16 sps:$4 sm:$0xff]   ;;  %v2674_v57 = vld [vmem:[#allocation2 + $0xfc] sm:$0x1]  ;;  %v2083_v15 = vld [vmem:[#allocation2 + $0x100] sm:$0xf]  ;;  %v8209_v16 = vcombine.low %v2836_v51, %v2840_v48  ;;  %v2412_v20 = vor.u32 %v2411_v21, %v2408_v31  ;;  %v2844_v14 = vsel %vm10483_vm11, %v8189_v36, %v2843_v55 }
 0x1a9   : > { %6537 = vmatprep.subr.bf16.mxu0 %v9648_v1  ;;  %7502 = vmatprep.subr.bf16.mxu1 %v9651_v17  ;;  %v9658_v11 = vld [vmem:[%s11925_s1 + $0x80c] ss:$16 sps:$4 sm:$0xff]   ;;  %v2675_v18 = vld [vmem:[#allocation2 + $0x100] sm:$0xe]  ;;  %v2676_v5 = vld [vmem:[#allocation2 + $0x104] sm:$0x1]  ;;  %v2426_v37 = vor.u32 %v2425_v61, %v2422_v59  ;;  %v2390_v42 = vsel %vm10071_vm8, %v2385_v29, %v11326_v24  ;;  %v2404_v34 = vsel %vm10071_vm8, %v2399_v63, %v11328_v30 }
 0x1aa   : > { %v2434_v26 = vshrl.u32 %v2081_v53, 16  ;;  %v2437_v49 = vshll.u32 %v2081_v53, 16  ;;  %v2847_v12 = vrot.slane %v2672_v54, 5  ;;  %v2429_v32 = vshll.u32 %v2080_v9, 16  ;;  %v2082_v50 = vld [vmem:[#allocation2 + $0xfc] sm:$0x1] }
 0x1ab   : > { %v2417_v40 = vrot.slane %v2415_v46, 5  ;;  %v2448_v60 = vshrl.u32 %v2083_v15, 16  ;;  %v2451_v7 = vshll.u32 %v2083_v15, 16  ;;  %v8191_v43 = vrot.slane %v2673_v52, 9  ;;  %v2085_v39 = vld [vmem:[#allocation2 + $0x108] sm:$0xf] }
 0x1ac   : > { %6538 = vmatpush1.bf16.msra.mxu0 %v9646_v41  ;;  %7503 = vmatpush1.bf16.msra.mxu1 %v9649_v28  ;;  %v2851_v41 = vrot.slane %v2674_v57, 5  ;;  %v8192_v62 = vrot.slane %v2675_v18, 9  ;;  %v2413_v22 = vrot.slane %v2412_v20, 4  ;;  %v2855_v1 = vrot.slane %v2676_v5, 5  ;;  %v2087_v38 = vld [vmem:[#allocation2 + $0x110] sm:$0xf] }
 0x1ad   : > { %6700 = vmatprep.subr.bf16.mxu0 %v9655_v35  ;;  %7665 = vmatprep.subr.bf16.mxu1 %v9658_v11  ;;  %v2439_v13 = vrot.slane %v2437_v49, 5  ;;  %v2848_v56 = vsel %vm10483_vm11, %v8190_v33, %v2847_v12  ;;  %v2427_v28 = vrot.slane %v2426_v37, 4  ;;  %v2431_v17 = vrot.slane %v2429_v32, 5  ;;  %v2677_v24 = vld [vmem:[#allocation2 + $0x108] sm:$0xe] }
 0x1ae   : > { %6427 = vmatmul.mubr.bf16.gmra.mrb[32].mxu0 %v8159_v10  ;;  %7392 = vmatmul.mubr.bf16.gmra.mrb[32].mxu1 %v8159_v10  ;;  %v2436_v10 = vrot.slane %v2434_v26, 4  ;;  %v2443_v47 = vshll.u32 %v2082_v50, 16  ;;  %v2450_v8 = vrot.slane %v2448_v60, 4  ;;  %v2453_v25 = vrot.slane %v2451_v7, 5  ;;  %v2678_v30 = vld [vmem:[#allocation2 + $0x10c] sm:$0x1] }
 0x1af   : > { %6436 = vmatprep.mubr.bf16.mxu0 %v8208_v27  ;;  %7401 = vmatprep.mubr.bf16.mxu1 %v8208_v27  ;;  %v2084_v27 = vld [vmem:[#allocation2 + $0x104] sm:$0x1]  ;;  %v8161_v19 = vcombine.low %v2390_v42, %v2404_v34  ;;  %v8210_v0 = vcombine.low %v2844_v14, %v2848_v56  ;;  %v2418_v45 = vsel %vm10071_vm8, %v2413_v22, %v2417_v40  ;;  %v2462_v44 = vshrl.u32 %v2085_v39, 16  ;;  %v2679_v59 = vld [vmem:[#allocation2 + $0x110] sm:$0xe] }
 0x1b0   : > { %v2440_v6 = vor.u32 %v2439_v13, %v2436_v10  ;;  %v2457_v4 = vshll.u32 %v2084_v27, 16  ;;  %v2852_v51 = vsel %vm10483_vm11, %v8191_v43, %v2851_v41  ;;  %v2432_v29 = vsel %vm10071_vm8, %v2427_v28, %v2431_v17  ;;  %v2680_v61 = vld [vmem:[#allocation2 + $0x114] sm:$0x1]  ;;  %v2086_v9 = vld [vmem:[#allocation2 + $0x10c] sm:$0x1] }
 0x1b1   : > { %v2856_v36 = vsel %vm10483_vm11, %v8192_v62, %v2855_v1  ;;  %v2445_v55 = vrot.slane %v2443_v47, 5  ;;  %v2454_v33 = vor.u32 %v2453_v25, %v2450_v8  ;;  %v2465_v31 = vshll.u32 %v2085_v39, 16  ;;  %v2089_v52 = vld [vmem:[#allocation2 + $0x118] sm:$0xf]  ;;  %v2091_v35 = vld [vmem:[#allocation2 + $0x120] sm:$0xf] }
 0x1b2   : > { %v2476_v21 = vshrl.u32 %v2087_v38, 16  ;;  %v2479_v46 = vshll.u32 %v2087_v38, 16  ;;  %v2441_v48 = vrot.slane %v2440_v6, 4  ;;  %v2459_v63 = vrot.slane %v2457_v4, 5  ;;  %v2088_v11 = vld [vmem:[#allocation2 + $0x114] sm:$0x1] }
 0x1b3   : > { %v8193_v53 = vrot.slane %v2677_v24, 9  ;;  %v2859_v54 = vrot.slane %v2678_v30, 5  ;;  %v8211_v57 = vcombine.low %v2852_v51, %v2856_v36  ;;  %v2455_v15 = vrot.slane %v2454_v33, 4  ;;  %v2681_v60 = vld [vmem:[#allocation2 + $0x118] sm:$0xe] }
 0x1b4   : > { %v2467_v20 = vrot.slane %v2465_v31, 5  ;;  %v2478_v18 = vrot.slane %v2476_v21, 4  ;;  %v2481_v5 = vrot.slane %v2479_v46, 5  ;;  %v2490_v26 = vshrl.u32 %v2089_v52, 16  ;;  %v2682_v7 = vld [vmem:[#allocation2 + $0x11c] sm:$0x1] }
 0x1b5   : > { %v2493_v49 = vshll.u32 %v2089_v52, 16  ;;  %v2504_v14 = vshrl.u32 %v2091_v35, 16  ;;  %v2507_v12 = vshll.u32 %v2091_v35, 16  ;;  %v8194_v37 = vrot.slane %v2679_v59, 9  ;;  %v2090_v62 = vld [vmem:[#allocation2 + $0x11c] sm:$0x1] }
 0x1b6   : > { %6437 = vmatmul.mubr.bf16.gmra.mrb[36].mxu0 %v8160_v58  ;;  %7402 = vmatmul.mubr.bf16.gmra.mrb[36].mxu1 %v8160_v58  ;;  %v8162_v58 = vcombine.low %v2418_v45, %v2432_v29  ;;  %v2863_v32 = vrot.slane %v2680_v61, 5  ;;  %v2471_v50 = vshll.u32 %v2086_v9, 16  ;;  %v2485_v42 = vshll.u32 %v2088_v11, 16  ;;  %v2092_v22 = vld [vmem:[#allocation2 + $0x124] sm:$0x1] }
 0x1b7   : > { %6446 = vmatprep.mubr.bf16.mxu0 %v8209_v16  ;;  %7411 = vmatprep.mubr.bf16.mxu1 %v8209_v16  ;;  %v2464_v16 = vrot.slane %v2462_v44, 4  ;;  %v2446_v40 = vsel %vm10071_vm8, %v2441_v48, %v2445_v55  ;;  %v2460_v34 = vsel %vm10071_vm8, %v2455_v15, %v2459_v63  ;;  %v2482_v41 = vor.u32 %v2481_v5, %v2478_v18  ;;  %v2683_v47 = vld [vmem:[#allocation2 + $0x120] sm:$0xe]  ;;  %v2093_v8 = vld [vmem:[#allocation2 + $0x128] sm:$0xf] }
 0x1b8   : > { %v2492_v1 = vrot.slane %v2490_v26, 4  ;;  %v2495_v10 = vrot.slane %v2493_v49, 5  ;;  %v2506_v13 = vrot.slane %v2504_v14, 4  ;;  %v2509_v56 = vrot.slane %v2507_v12, 5  ;;  %v2095_v24 = vld [vmem:[#allocation2 + $0x130] sm:$0xf] }
 0x1b9   : > { %v2468_v43 = vor.u32 %v2467_v20, %v2464_v16  ;;  %v2860_v28 = vsel %vm10483_vm11, %v8193_v53, %v2859_v54  ;;  %v2864_v17 = vsel %vm10483_vm11, %v8194_v37, %v2863_v32  ;;  %v2473_v27 = vrot.slane %v2471_v50, 5  ;;  %v3106_v33 = vld [vmem:[#allocation2 + $0x10] sm:$0xf]  ;;  %v2685_v63 = vld [vmem:[#allocation2 + $0x128] sm:$0xe] }
 0x1ba   : > { %v8163_v25 = vcombine.low %v2446_v40, %v2460_v34  ;;  %v2867_v6 = vrot.slane %v2682_v7, 5  ;;  %v2499_v4 = vshll.u32 %v2090_v62, 16  ;;  %v2483_v38 = vrot.slane %v2482_v41, 4  ;;  %v3108_v53 = vld [vmem:[#allocation2 + $0x18] sm:$0xf] }
 0x1bb   : > { %v2469_v39 = vrot.slane %v2468_v43, 4  ;;  %v2487_v45 = vrot.slane %v2485_v42, 5  ;;  %v2513_v51 = vshll.u32 %v2092_v22, 16  ;;  %v8212_v30 = vcombine.low %v2860_v28, %v2864_v17  ;;  %v2686_v35 = vld [vmem:[#allocation2 + $0x12c] sm:$0x1] }
 0x1bc   : > { %v2496_v29 = vor.u32 %v2495_v10, %v2492_v1  ;;  %v2510_v36 = vor.u32 %v2509_v56, %v2506_v13  ;;  %v2518_v55 = vshrl.u32 %v2093_v8, 16  ;;  %v8196_v44 = vrot.slane %v2683_v47, 9  ;;  %v2094_v16 = vld [vmem:[#allocation2 + $0x12c] sm:$0x1]  ;;  %v2688_v37 = vld [vmem:[#allocation2 + $0x134] sm:$0x1] }
 0x1bd   : > { %v2521_v21 = vshll.u32 %v2093_v8, 16  ;;  %v11370_v48 = vrot.slane %v2499_v4, 5  ;;  %v2532_v59 = vshrl.u32 %v2095_v24, 16  ;;  %v2535_v61 = vshll.u32 %v2095_v24, 16  ;;  %v3107_v7 = vld [vmem:[#allocation2 + $0x14] sm:$0x1] }
 0x1be   : > { %6447 = vmatmul.mubr.bf16.gmra.mrb[40].mxu0 %v8161_v19  ;;  %7412 = vmatmul.mubr.bf16.gmra.mrb[40].mxu1 %v8161_v19  ;;  %v2684_v19 = vld [vmem:[#allocation2 + $0x124] sm:$0x1]  ;;  %v2474_v54 = vsel %vm10071_vm8, %v2469_v39, %v2473_v27  ;;  %v2488_v9 = vsel %vm10071_vm8, %v2483_v38, %v2487_v45  ;;  %v2515_v52 = vrot.slane %v2513_v51, 5  ;;  %v2497_v15 = vrot.slane %v2496_v29, 4  ;;  %v3110_v62 = vld [vmem:[#allocation2 + $0x20] sm:$0xf] }
 0x1bf   : > { %6456 = vmatprep.mubr.bf16.mxu0 %v8210_v0  ;;  %7421 = vmatprep.mubr.bf16.mxu1 %v8210_v0  ;;  %v8195_v0 = vrot.slane %v2681_v60, 9  ;;  %v2871_v31 = vrot.slane %v2684_v19, 5  ;;  %v2511_v11 = vrot.slane %v2510_v36, 4  ;;  %v2520_v20 = vrot.slane %v2518_v55, 4  ;;  %v3112_v22 = vld [vmem:[#allocation2 + $0x28] sm:$0xf] }
 0x1c0   : > { %v3174_v18 = vshll.u32 %v3106_v33, 16  ;;  %v2523_v26 = vrot.slane %v2521_v21, 5  ;;  %v3185_v49 = vshrl.u32 %v3108_v53, 16  ;;  %v3188_v14 = vshll.u32 %v3108_v53, 16  ;;  %v2096_v10 = vld [vmem:[#allocation2 + $0x134] sm:$0x1] }
 0x1c1   : > { %v2868_v46 = vsel %vm10483_vm11, %v8195_v0, %v2867_v6  ;;  %v2872_v5 = vsel %vm10483_vm11, %v8196_v44, %v2871_v31  ;;  %v8164_v12 = vcombine.low %v2474_v54, %v2488_v9  ;;  %v2534_v32 = vrot.slane %v2532_v59, 4  ;;  %v3111_v31 = vld [vmem:[#allocation2 + $0x24] sm:$0x1]  ;;  %v3113_v21 = vld [vmem:[#allocation2 + $0x2c] sm:$0x1] }
 0x1c2   : > { %v2537_v50 = vrot.slane %v2535_v61, 5  ;;  %v8197_v42 = vrot.slane %v2685_v63, 9  ;;  %v2875_v40 = vrot.slane %v2686_v35, 5  ;;  %v8213_v43 = vcombine.low %v2868_v46, %v2872_v5 }
 0x1c3   : > { %v3176_v41 = vrot.slane %v3174_v18, 5  ;;  %v2879_v1 = vrot.slane %v2688_v37, 5  ;;  %v2527_v13 = vshll.u32 %v2094_v16, 16  ;;  %v3187_v56 = vrot.slane %v3185_v49, 4 }
 0x1c4   : > { %v3190_v28 = vrot.slane %v3188_v14, 5  ;;  %v2502_v17 = vsel %vm10071_vm8, %v2497_v15, %v11370_v48  ;;  %v2516_v27 = vsel %vm10071_vm8, %v2511_v11, %v2515_v52  ;;  %v2524_v47 = vor.u32 %v2523_v26, %v2520_v20  ;;  %v3116_v11 = vld [vmem:[#allocation2 + $0x38] sm:$0xf] }
 0x1c5   : > { %v2538_v8 = vor.u32 %v2537_v50, %v2534_v32  ;;  %v3199_v19 = vshrl.u32 %v3110_v62, 16  ;;  %v3202_v0 = vshll.u32 %v3110_v62, 16  ;;  %v3213_v6 = vshrl.u32 %v3112_v22, 16 }
 0x1c6   : > { %6457 = vmatmul.mubr.bf16.gmra.mrb[44].mxu0 %v8162_v58  ;;  %7422 = vmatmul.mubr.bf16.gmra.mrb[44].mxu1 %v8162_v58  ;;  %v2687_v58 = vld [vmem:[#allocation2 + $0x130] sm:$0xe]  ;;  %v3216_v4 = vshll.u32 %v3112_v22, 16  ;;  %v2541_v39 = vshll.u32 %v2096_v10, 16  ;;  %v3180_v45 = vshll.u32 %v3107_v7, 16  ;;  %v2876_v51 = vsel %vm10483_vm11, %v8197_v42, %v2875_v40 }
 0x1c7   : > { %6466 = vmatprep.mubr.bf16.mxu0 %v8211_v57  ;;  %7431 = vmatprep.mubr.bf16.mxu1 %v8211_v57  ;;  %v3171_v57 = vshrl.u32 %v3106_v33, 16  ;;  %v8198_v60 = vrot.slane %v2687_v58, 9  ;;  %v8165_v36 = vcombine.low %v2502_v17, %v2516_v27  ;;  %v2525_v55 = vrot.slane %v2524_v47, 4  ;;  %v3114_v58 = vld [vmem:[#allocation2 + $0x30] sm:$0xf] }
 0x1c8   : > { %v2529_v33 = vrot.slane %v2527_v13, 5  ;;  %v2539_v44 = vrot.slane %v2538_v8, 4  ;;  %v3201_v46 = vrot.slane %v3199_v19, 4  ;;  %v3204_v48 = vrot.slane %v3202_v0, 5  ;;  %v3115_v40 = vld [vmem:[#allocation2 + $0x34] sm:$0x1] }
 0x1c9   : > { %v3173_v34 = vrot.slane %v3171_v57, 4  ;;  %v2880_v24 = vsel %vm10483_vm11, %v8198_v60, %v2879_v1  ;;  %v3215_v63 = vrot.slane %v3213_v6, 4  ;;  %v3218_v59 = vrot.slane %v3216_v4, 5  ;;  %v3118_v22 = vld [vmem:[#allocation2 + $0x40] sm:$0xf] }
 0x1ca   : > { %v8214_v61 = vcombine.low %v2876_v51, %v2880_v24  ;;  %v2543_v53 = vrot.slane %v2541_v39, 5  ;;  %v3182_v9 = vrot.slane %v3180_v45, 5  ;;  %v3208_v57 = vshll.u32 %v3111_v31, 16  ;;  %v9652_v6 = vld [vmem:[#allocation2 + $0x10] ss:$8 sps:$4 sm:$0xff]  }
 0x1cb   : > { %v3177_v38 = vor.u32 %v3176_v41, %v3173_v34  ;;  %v3222_v15 = vshll.u32 %v3113_v21, 16  ;;  %v3205_v16 = vor.u32 %v3204_v48, %v3201_v46  ;;  %v3219_v20 = vor.u32 %v3218_v59, %v3215_v63  ;;  %v3124_v45 = vld [vmem:[#allocation2 + $0x68] sm:$0xf]  ;;  %v9653_v51 = vld [vmem:[%s11925_s1 + $0x800] ss:$16 sps:$4 sm:$0xff]  }
 0x1cc   : > { %v2530_v18 = vsel %vm10071_vm8, %v2525_v55, %v2529_v33  ;;  %v2544_v5 = vsel %vm10071_vm8, %v2539_v44, %v2543_v53  ;;  %v3227_v49 = vshrl.u32 %v3114_v58, 16  ;;  %v3241_v37 = vshrl.u32 %v3116_v11, 16  ;;  %v9656_v24 = vld [vmem:[%s11925_s1 + $0x808] ss:$16 sps:$4 sm:$0xff]   ;;  %v3119_v55 = vld [vmem:[#allocation2 + $0x44] sm:$0x1] }
 0x1cd   : > { %v3178_v54 = vrot.slane %v3177_v38, 4  ;;  %v3244_v32 = vshll.u32 %v3116_v11, 16  ;;  %v3210_v50 = vrot.slane %v3208_v57, 5  ;;  %v3224_v42 = vrot.slane %v3222_v15, 5  ;;  %v3122_v38 = vld [vmem:[#allocation2 + $0x60] sm:$0xf] }
 0x1ce   : > { %6467 = vmatmul.mubr.bf16.gmra.mrb[48].mxu0 %v8163_v25  ;;  %7432 = vmatmul.mubr.bf16.gmra.mrb[48].mxu1 %v8163_v25  ;;  %v3109_v25 = vld [vmem:[#allocation2 + $0x1c] sm:$0x1]  ;;  %v8166_v60 = vcombine.low %v2530_v18, %v2544_v5  ;;  %v3206_v7 = vrot.slane %v3205_v16, 4  ;;  %v3220_v34 = vrot.slane %v3219_v20, 4  ;;  %v3229_v62 = vrot.slane %v3227_v49, 4 }
 0x1cf   : > { %6476 = vmatprep.mubr.bf16.mxu0 %v8212_v30  ;;  %7441 = vmatprep.mubr.bf16.mxu1 %v8212_v30  ;;  %v3191_v30 = vor.u32 %v3190_v28, %v3187_v56  ;;  %v3194_v29 = vshll.u32 %v3109_v25, 16  ;;  %v3183_v26 = vsel %vm10071_vm8, %v3178_v54, %v3182_v9  ;;  %v3243_v10 = vrot.slane %v3241_v37, 4  ;;  %v3120_v56 = vld [vmem:[#allocation2 + $0x48] sm:$0xf]  ;;  %v3121_v33 = vld [vmem:[#allocation2 + $0x4c] sm:$0x1] }
 0x1d0   : > { %v3246_v13 = vrot.slane %v3244_v32, 5  ;;  %v3236_v28 = vshll.u32 %v3115_v40, 16  ;;  %v3255_v27 = vshrl.u32 %v3118_v22, 16  ;;  %v3258_v47 = vshll.u32 %v3118_v22, 16  ;;  %v9663_v21 = vld [vmem:[%s11925_s1 + $0x824] ss:$16 sps:$4 sm:$0xff]  }
 0x1d1   : > { %v3192_v52 = vrot.slane %v3191_v30, 4  ;;  %v3196_v35 = vrot.slane %v3194_v29, 5  ;;  %v3211_v8 = vsel %vm10071_vm8, %v3206_v7, %v3210_v50  ;;  %v3225_v25 = vsel %vm10071_vm8, %v3220_v34, %v3224_v42  ;;  %v9666_v54 = vld [vmem:[%s11925_s1 + $0x82c] ss:$16 sps:$4 sm:$0xff]   ;;  %v3123_v11 = vld [vmem:[#allocation2 + $0x64] sm:$0x1] }
 0x1d2   : > { %v3269_v19 = vshrl.u32 %v3120_v56, 16  ;;  %v3272_v0 = vshll.u32 %v3120_v56, 16  ;;  %v3247_v39 = vor.u32 %v3246_v13, %v3243_v10  ;;  %v3238_v30 = vrot.slane %v3236_v28, 5  ;;  %v3125_v20 = vld [vmem:[#allocation2 + $0x6c] sm:$0x1] }
 0x1d3   : > { %v3197_v14 = vsel %vm10071_vm8, %v3192_v52, %v3196_v35  ;;  %v3257_v44 = vrot.slane %v3255_v27, 4  ;;  %v3260_v31 = vrot.slane %v3258_v47, 5  ;;  %v3283_v46 = vshrl.u32 %v3122_v38, 16  ;;  %v9661_v35 = vld [vmem:[%s11925_s1 + $0x820] ss:$16 sps:$4 sm:$0xff]  }
 0x1d4   : > { %v8231_v41 = vcombine.low %v3183_v26, %v3197_v14  ;;  %v3286_v48 = vshll.u32 %v3122_v38, 16  ;;  %v3297_v63 = vshrl.u32 %v3124_v45, 16  ;;  %v3300_v59 = vshll.u32 %v3124_v45, 16  ;;  %v9671_v50 = vld [vmem:[%s11925_s1 + $0x844] ss:$16 sps:$4 sm:$0xff]  }
 0x1d5   : > { %v3248_v53 = vrot.slane %v3247_v39, 4  ;;  %v3271_v9 = vrot.slane %v3269_v19, 4  ;;  %v3274_v52 = vrot.slane %v3272_v0, 5  ;;  %v3264_v57 = vshll.u32 %v3119_v55, 16  ;;  %v9674_v42 = vld [vmem:[%s11925_s1 + $0x84c] ss:$16 sps:$4 sm:$0xff]  }
 0x1d6   : > { %6477 = vmatmul.mubr.bf16.gmra.mrb[52].mxu0 %v8164_v12  ;;  %7442 = vmatmul.mubr.bf16.gmra.mrb[52].mxu1 %v8164_v12  ;;  %v3230_v12 = vshll.u32 %v3114_v58, 16  ;;  %v9664_v58 = vld [vmem:[%s11925_s1 + $0x828] ss:$16 sps:$4 sm:$0xff]   ;;  %v3278_v15 = vshll.u32 %v3121_v33, 16  ;;  %v3261_v16 = vor.u32 %v3260_v31, %v3257_v44  ;;  %v3285_v18 = vrot.slane %v3283_v46, 4 }
 0x1d7   : > { %6486 = vmatprep.mubr.bf16.mxu0 %v8213_v43  ;;  %7451 = vmatprep.mubr.bf16.mxu1 %v8213_v43  ;;  %v3117_v43 = vld [vmem:[#allocation2 + $0x3c] sm:$0x1]  ;;  %v3288_v5 = vrot.slane %v3286_v48, 5  ;;  %v3299_v26 = vrot.slane %v3297_v63, 4  ;;  %v3302_v49 = vrot.slane %v3300_v59, 5  ;;  %v3275_v37 = vor.u32 %v3274_v52, %v3271_v9 }
 0x1d8   : > { %v3232_v1 = vrot.slane %v3230_v12, 5  ;;  %v3250_v17 = vshll.u32 %v3117_v43, 16  ;;  %v3292_v32 = vshll.u32 %v3123_v11, 16  ;;  %v9659_v40 = vld [vmem:[#allocation2 + $0x20] ss:$8 sps:$4 sm:$0xff]   ;;  %v3280_v7 = vrot.slane %v3278_v15, 5 }
 0x1d9   : > { %v3306_v34 = vshll.u32 %v3125_v20, 16  ;;  %v3126_v43 = vld [vmem:[#allocation2 + $0x70] sm:$0xf]  ;;  %v3289_v22 = vor.u32 %v3288_v5, %v3285_v18  ;;  %v3128_v10 = vld [vmem:[#allocation2 + $0x78] sm:$0xf]  ;;  %v3276_v13 = vrot.slane %v3275_v37, 4 }
 0x1da   : > { %v3233_v4 = vor.u32 %v3232_v1, %v3229_v62  ;;  %v3252_v29 = vrot.slane %v3250_v17, 5  ;;  %v3262_v62 = vrot.slane %v3261_v16, 4  ;;  %v3303_v1 = vor.u32 %v3302_v49, %v3299_v26  ;;  %v9669_v28 = vld [vmem:[%s11925_s1 + $0x840] ss:$16 sps:$4 sm:$0xff]   ;;  %v9672_v17 = vld [vmem:[%s11925_s1 + $0x848] ss:$16 sps:$4 sm:$0xff]  }
 0x1db   : > { %v11427_v56 = vrot.slane %v3292_v32, 5  ;;  %v3311_v27 = vshrl.u32 %v3126_v43, 16  ;;  %v9679_v47 = vld [vmem:[%s11925_s1 + $0x864] ss:$16 sps:$4 sm:$0xff]   ;;  %v3314_v19 = vshll.u32 %v3126_v43, 16  ;;  %v3325_v0 = vshrl.u32 %v3128_v10, 16 }
 0x1dc   : > { %v3253_v12 = vsel %vm10071_vm8, %v3248_v53, %v3252_v29  ;;  %v3304_v39 = vrot.slane %v3303_v1, 4  ;;  %v3127_v38 = vld [vmem:[#allocation2 + $0x74] sm:$0x1]  ;;  %v3129_v45 = vld [vmem:[#allocation2 + $0x7c] sm:$0x1] }
 0x1dd   : > { %v9677_v29 = vld [vmem:[%s11925_s1 + $0x860] ss:$16 sps:$4 sm:$0xff]   ;;  %v9687_v55 = vld [vmem:[%s11925_s1 + $0x884] ss:$16 sps:$4 sm:$0xff]   ;;  %v3313_v33 = vrot.slane %v3311_v27, 4  ;;  %v3316_v31 = vrot.slane %v3314_v19, 5 }
 0x1de   : > { %6487 = vmatmul.mubr.bf16.gmra.mrb[56].mxu0 %v8165_v36  ;;  %7452 = vmatmul.mubr.bf16.gmra.mrb[56].mxu1 %v8165_v36  ;;  %v8232_v36 = vcombine.low %v3211_v8, %v3225_v25  ;;  %v9682_v8 = vld [vmem:[%s11925_s1 + $0x86c] ss:$16 sps:$4 sm:$0xff]   ;;  %v11441_v25 = vrot.slane %v3306_v34, 5  ;;  %v3320_v63 = vshll.u32 %v3127_v38, 16  ;;  %v3334_v59 = vshll.u32 %v3129_v45, 16 }
 0x1df   : > { %6496 = vmatprep.mubr.bf16.mxu0 %v8214_v61  ;;  %7461 = vmatprep.mubr.bf16.mxu1 %v8214_v61  ;;  %v3234_v61 = vrot.slane %v3233_v4, 4  ;;  %v3290_v4 = vrot.slane %v3289_v22, 4  ;;  %v9690_v44 = vld [vmem:[%s11925_s1 + $0x88c] ss:$16 sps:$4 sm:$0xff]   ;;  %v3132_v53 = vld [vmem:[#allocation2 + $0x88] sm:$0xf] }
 0x1e0   : > { %v9688_v9 = vld [vmem:[%s11925_s1 + $0x888] ss:$16 sps:$4 sm:$0xff]   ;;  %v9695_v52 = vld [vmem:[%s11925_s1 + $0x8a4] ss:$16 sps:$4 sm:$0xff]   ;;  %v3322_v16 = vrot.slane %v3320_v63, 5  ;;  %v3353_v20 = vshrl.u32 %v3132_v53, 16  ;;  %v3309_v49 = vsel %vm10071_vm8, %v3304_v39, %v11441_v25 }
 0x1e1   : > { %v3239_v14 = vsel %vm10071_vm8, %v3234_v61, %v3238_v30  ;;  %v3281_v30 = vsel %vm10071_vm8, %v3276_v13, %v3280_v7  ;;  %v3130_v61 = vld [vmem:[#allocation2 + $0x80] sm:$0xf]  ;;  %v3356_v18 = vshll.u32 %v3132_v53, 16  ;;  %v3295_v26 = vsel %vm10071_vm8, %v3290_v4, %v11427_v56  ;;  %v9696_v37 = vld [vmem:[%s11925_s1 + $0x8a8] ss:$16 sps:$4 sm:$0xff]  }
 0x1e2   : > { %v3339_v15 = vshrl.u32 %v3130_v61, 16  ;;  %v3342_v11 = vshll.u32 %v3130_v61, 16  ;;  %v9667_v5 = vld [vmem:[#allocation2 + $0x40] ss:$8 sps:$4 sm:$0xff]   ;;  %v3131_v32 = vld [vmem:[#allocation2 + $0x84] sm:$0x1] }
 0x1e3   : > { %v3133_v7 = vld [vmem:[#allocation2 + $0x8c] sm:$0x1]  ;;  %v3358_v22 = vrot.slane %v3356_v18, 5  ;;  %v3134_v1 = vld [vmem:[#allocation2 + $0x90] sm:$0xf]  ;;  %v3348_v27 = vshll.u32 %v3131_v32, 16 }
 0x1e4   : > { %v3341_v34 = vrot.slane %v3339_v15, 4  ;;  %v3344_v43 = vrot.slane %v3342_v11, 5  ;;  %v9701_v13 = vld [vmem:[%s11925_s1 + $0x8c0] ss:$16 sps:$4 sm:$0xff]   ;;  %v9704_v56 = vld [vmem:[%s11925_s1 + $0x8c8] ss:$16 sps:$4 sm:$0xff]  }
 0x1e5   : > { %v3367_v19 = vshrl.u32 %v3134_v1, 16  ;;  %v9709_v45 = vld [vmem:[%s11925_s1 + $0x8e0] ss:$16 sps:$4 sm:$0xff]   ;;  %v3137_v61 = vld [vmem:[#allocation2 + $0x9c] sm:$0x1] }
 0x1e6   : > { %6497 = vmatmul.mubr.bf16.gmra.mrb[60].mxu0 %v8166_v60  ;;  %7462 = vmatmul.mubr.bf16.gmra.mrb[60].mxu1 %v8166_v60  ;;  %v3266_v60 = vrot.slane %v3264_v57, 5  ;;  %v3142_v32 = vld [vmem:[#allocation2 + $0xc0] sm:$0xf] }
 0x1e7   : > { %6539 = vmatprep.mubr.bf16.mxu0 %v8231_v41  ;;  %7504 = vmatprep.mubr.bf16.mxu1 %v8231_v41  ;;  %v8233_v41 = vcombine.low %v3239_v14, %v3253_v12  ;;  %v3336_v14 = vrot.slane %v3334_v59, 5  ;;  %v9693_v12 = vld [vmem:[%s11925_s1 + $0x8a0] ss:$16 sps:$4 sm:$0xff]  }
 0x1ee   : > { %6540 = vmatmul.mubr.bf16.vlgmr.msra.gmra.mrb[0].mxu0 %v9652_v6  ;;  %7505 = vmatmul.mubr.bf16.vlgmr.msra.gmra.mrb[0].mxu1 %v9652_v6  ;;  %v3328_v6 = vshll.u32 %v3128_v10, 16  ;;  %v3136_v10 = vld [vmem:[#allocation2 + $0x98] sm:$0xf] }
 0x1ef   : > { %6701 = vmatpush1.bf16.msra.mxu0 %v9653_v51  ;;  %7666 = vmatpush1.bf16.msra.mxu1 %v9656_v24  ;;  %v9660_v51 = vld [vmem:[#allocation2 + $0x30] ss:$8 sps:$4 sm:$0xff]   ;;  %v3267_v24 = vsel %vm10071_vm8, %v3262_v62, %v3266_v60  ;;  %v3355_v62 = vrot.slane %v3353_v20, 4  ;;  %v3381_v39 = vshrl.u32 %v3136_v10, 16  ;;  %v3384_v38 = vshll.u32 %v3136_v10, 16 }
 0x1f0   : > { %6549 = vmatprep.mubr.bf16.mxu0 %v8232_v36  ;;  %7514 = vmatprep.mubr.bf16.mxu1 %v8232_v36  ;;  %v9680_v36 = vld [vmem:[%s11925_s1 + $0x868] ss:$16 sps:$4 sm:$0xff]   ;;  %v3330_v46 = vrot.slane %v3328_v6, 5  ;;  %v8234_v48 = vcombine.low %v3267_v24, %v3281_v30  ;;  %v3350_v30 = vrot.slane %v3348_v27, 5 }
 0x1f1   : > { %6702 = vmatprep.subr.bf16.mxu0 %v9663_v21  ;;  %7667 = vmatprep.subr.bf16.mxu1 %v9666_v54  ;;  %v3327_v21 = vrot.slane %v3325_v0, 4  ;;  %v9685_v54 = vld [vmem:[%s11925_s1 + $0x880] ss:$16 sps:$4 sm:$0xff]   ;;  %v3359_v25 = vor.u32 %v3358_v22, %v3355_v62  ;;  %v3370_v0 = vshll.u32 %v3134_v1, 16  ;;  %v3383_v63 = vrot.slane %v3381_v39, 4 }
 0x1f2   : > { %v9668_v24 = vld [vmem:[#allocation2 + $0x60] ss:$8 sps:$4 sm:$0xff]   ;;  %v3386_v59 = vrot.slane %v3384_v38, 5  ;;  %v3423_v22 = vshrl.u32 %v3142_v32, 16  ;;  %v3426_v1 = vshll.u32 %v3142_v32, 16 }
 0x1f3   : > { %6703 = vmatpush1.bf16.msra.mxu0 %v9661_v35  ;;  %7668 = vmatpush1.bf16.msra.mxu1 %v9664_v58  ;;  %v9698_v35 = vld [vmem:[%s11925_s1 + $0x8ac] ss:$16 sps:$4 sm:$0xff]   ;;  %v3317_v58 = vor.u32 %v3316_v31, %v3313_v33  ;;  %v3331_v57 = vor.u32 %v3330_v46, %v3327_v21  ;;  %v3135_v21 = vld [vmem:[#allocation2 + $0x94] sm:$0x1]  ;;  %v3369_v46 = vrot.slane %v3367_v19, 4 }
 0x1f4   : > { %6704 = vmatprep.subr.bf16.mxu0 %v9671_v50  ;;  %7669 = vmatprep.subr.bf16.mxu1 %v9674_v42  ;;  %v9703_v50 = vld [vmem:[%s11925_s1 + $0x8c4] ss:$16 sps:$4 sm:$0xff]   ;;  %v9706_v42 = vld [vmem:[%s11925_s1 + $0x8cc] ss:$16 sps:$4 sm:$0xff]   ;;  %v3387_v11 = vor.u32 %v3386_v59, %v3383_v63  ;;  %v9683_v59 = vld [vmem:[#allocation2 + $0x90] ss:$8 sps:$4 sm:$0xff]  }
 0x1f5   : > { %v3332_v60 = vrot.slane %v3331_v57, 4  ;;  %v3143_v19 = vld [vmem:[#allocation2 + $0xc4] sm:$0x1] }
 0x1f6   : > { %6550 = vmatmul.mubr.bf16.gmra.mrb[4].mxu0 %v9659_v40  ;;  %7515 = vmatmul.mubr.bf16.gmra.mrb[4].mxu1 %v9659_v40  ;;  %v3318_v40 = vrot.slane %v3317_v58, 4  ;;  %v3376_v58 = vshll.u32 %v3135_v21, 16 }
 0x1f7   : > { %6559 = vmatprep.mubr.bf16.mxu0 %v8233_v41  ;;  %7524 = vmatprep.mubr.bf16.mxu1 %v8233_v41  ;;  %v8235_v41 = vcombine.low %v3295_v26, %v3309_v49  ;;  %v3337_v4 = vsel %vm10071_vm8, %v3332_v60, %v3336_v14  ;;  %v9675_v49 = vld [vmem:[#allocation2 + $0x70] ss:$8 sps:$4 sm:$0xff]   ;;  %v3139_v14 = vld [vmem:[#allocation2 + $0xb4] sm:$0x1]  ;;  %v3388_v60 = vrot.slane %v3387_v11, 4 }
 0x1f8   : > { %6705 = vmatpush1.bf16.msra.mxu0 %v9669_v28  ;;  %7670 = vmatpush1.bf16.msra.mxu1 %v9672_v17  ;;  %v9711_v28 = vld [vmem:[%s11925_s1 + $0x8e4] ss:$16 sps:$4 sm:$0xff]   ;;  %v9714_v17 = vld [vmem:[%s11925_s1 + $0x8ec] ss:$16 sps:$4 sm:$0xff]   ;;  %v3323_v6 = vsel %vm10071_vm8, %v3318_v40, %v3322_v16  ;;  %v3390_v16 = vshll.u32 %v3137_v61, 16  ;;  %v3378_v40 = vrot.slane %v3376_v58, 5 }
 0x1f9   : > { %6706 = vmatprep.subr.bf16.mxu0 %v9679_v47  ;;  %7671 = vmatprep.subr.bf16.mxu1 %v9682_v8  ;;  %v3362_v47 = vshll.u32 %v3133_v7, 16  ;;  %v3345_v8 = vor.u32 %v3344_v43, %v3341_v34  ;;  %v3404_v43 = vshll.u32 %v3139_v14, 16  ;;  %v3149_v11 = vld [vmem:[#allocation2 + $0xdc] sm:$0x1] }
 0x1fa   : > { %v3392_v7 = vrot.slane %v3390_v16, 5  ;;  %v3150_v16 = vld [vmem:[#allocation2 + $0xe0] sm:$0xf] }
 0x1fb   : > { %v3346_v33 = vrot.slane %v3345_v8, 4  ;;  %v3364_v31 = vrot.slane %v3362_v47, 5  ;;  %v3406_v47 = vrot.slane %v3404_v43, 5  ;;  %v3482_v32 = vshll.u32 %v3150_v16, 16 }
 0x1fc   : > { %6707 = vmatpush1.bf16.msra.mxu0 %v9677_v29  ;;  %7672 = vmatpush1.bf16.msra.mxu1 %v9680_v36  ;;  %v3138_v29 = vld [vmem:[#allocation2 + $0xb0] sm:$0xf]  ;;  %v3140_v36 = vld [vmem:[#allocation2 + $0xb8] sm:$0xf] }
 0x1fd   : > { %6708 = vmatprep.subr.bf16.mxu0 %v9687_v55  ;;  %7673 = vmatprep.subr.bf16.mxu1 %v9690_v44  ;;  %v8236_v55 = vcombine.low %v3323_v6, %v3337_v4  ;;  %v3360_v44 = vrot.slane %v3359_v25, 4  ;;  %v3395_v53 = vshrl.u32 %v3138_v29, 16  ;;  %v3428_v6 = vrot.slane %v3426_v1, 5  ;;  %v3151_v1 = vld [vmem:[#allocation2 + $0xe4] sm:$0x1] }
 0x1fe   : > { %6560 = vmatmul.mubr.bf16.gmra.mrb[8].mxu0 %v9660_v51  ;;  %7525 = vmatmul.mubr.bf16.gmra.mrb[8].mxu1 %v9660_v51  ;;  %v9712_v51 = vld [vmem:[%s11925_s1 + $0x8e8] ss:$16 sps:$4 sm:$0xff]  }
 0x1ff   : > { %6569 = vmatprep.mubr.bf16.mxu0 %v8234_v48  ;;  %7534 = vmatprep.mubr.bf16.mxu1 %v8234_v48  ;;  %v3372_v48 = vrot.slane %v3370_v0, 5  ;;  %v3365_v57 = vsel %vm10071_vm8, %v3360_v44, %v3364_v31  ;;  %v3397_v20 = vrot.slane %v3395_v53, 4  ;;  %v3425_v0 = vrot.slane %v3423_v22, 4 }
 0x200   : > { %6709 = vmatpush1.bf16.msra.mxu0 %v9685_v54  ;;  %7674 = vmatpush1.bf16.msra.mxu1 %v9688_v9  ;;  %v3398_v54 = vshll.u32 %v3138_v29, 16  ;;  %v3409_v9 = vshrl.u32 %v3140_v36, 16  ;;  %v3432_v29 = vshll.u32 %v3143_v19, 16 }
 0x201   : > { %6710 = vmatprep.subr.bf16.mxu0 %v9695_v52  ;;  %7675 = vmatprep.subr.bf16.mxu1 %v9698_v35  ;;  %v3412_v52 = vshll.u32 %v3140_v36, 16  ;;  %v3351_v35 = vsel %vm10071_vm8, %v3346_v33, %v3350_v30  ;;  %v3373_v15 = vor.u32 %v3372_v48, %v3369_v46 }
 0x202   : > { %v3400_v18 = vrot.slane %v3398_v54, 5  ;;  %v3434_v63 = vrot.slane %v3432_v29, 5  ;;  %v9691_v29 = vld [vmem:[#allocation2 + $0xc0] ss:$8 sps:$4 sm:$0xff]  }
 0x203   : > { %v3414_v26 = vrot.slane %v3412_v52, 5  ;;  %v3147_v52 = vld [vmem:[#allocation2 + $0xd4] sm:$0x1] }
 0x204   : > { %6711 = vmatpush1.bf16.msra.mxu0 %v9693_v12  ;;  %7676 = vmatpush1.bf16.msra.mxu1 %v9696_v37  ;;  %v3141_v12 = vld [vmem:[#allocation2 + $0xbc] sm:$0x1]  ;;  %v8237_v37 = vcombine.low %v3351_v35, %v3365_v57  ;;  %v3401_v34 = vor.u32 %v3400_v18, %v3397_v20  ;;  %v3152_v20 = vld [vmem:[#allocation2 + $0xe8] sm:$0xf] }
 0x205   : > { %6712 = vmatprep.subr.bf16.mxu0 %v9703_v50  ;;  %7677 = vmatprep.subr.bf16.mxu1 %v9706_v42  ;;  %v3144_v50 = vld [vmem:[#allocation2 + $0xc8] sm:$0xf]  ;;  %v3374_v42 = vrot.slane %v3373_v15, 4  ;;  %v3418_v62 = vshll.u32 %v3141_v12, 16  ;;  %v3474_v12 = vshll.u32 %v3149_v11, 16 }
 0x206   : > { %6570 = vmatmul.mubr.bf16.gmra.mrb[12].mxu0 %v9667_v5  ;;  %7535 = vmatmul.mubr.bf16.gmra.mrb[12].mxu1 %v9667_v5  ;;  %v3411_v5 = vrot.slane %v3409_v9, 4  ;;  %v3437_v10 = vshrl.u32 %v3144_v50, 16  ;;  %v3402_v27 = vrot.slane %v3401_v34, 4  ;;  %v3156_v34 = vld [vmem:[#allocation2 + $0x108] sm:$0xf] }
 0x207   : > { %6579 = vmatprep.mubr.bf16.mxu0 %v8235_v41  ;;  %7544 = vmatprep.mubr.bf16.mxu1 %v8235_v41  ;;  %v3420_v25 = vrot.slane %v3418_v62, 5  ;;  %v3476_v22 = vrot.slane %v3474_v12, 5  ;;  %v9692_v11 = vld [vmem:[#allocation2 + $0xd0] ss:$8 sps:$4 sm:$0xff]  }
 0x208   : > { %6713 = vmatpush1.bf16.msra.mxu0 %v9701_v13  ;;  %7678 = vmatpush1.bf16.msra.mxu1 %v9704_v56  ;;  %v3415_v41 = vor.u32 %v3414_v26, %v3411_v5  ;;  %v3440_v13 = vshll.u32 %v3144_v50, 16  ;;  %v3379_v56 = vsel %vm10071_vm8, %v3374_v42, %v3378_v40  ;;  %v3439_v4 = vrot.slane %v3437_v10, 4  ;;  %v9684_v40 = vld [vmem:[#allocation2 + $0xb0] ss:$8 sps:$4 sm:$0xff]  }
 0x209   : > { %6714 = vmatprep.subr.bf16.mxu0 %v9711_v28  ;;  %7679 = vmatprep.subr.bf16.mxu1 %v9714_v17  ;;  %v3393_v28 = vsel %vm10071_vm8, %v3388_v60, %v3392_v7  ;;  %v9676_v17 = vld [vmem:[#allocation2 + $0x80] ss:$8 sps:$4 sm:$0xff]   ;;  %v3407_v30 = vsel %vm10071_vm8, %v3402_v27, %v3406_v47  ;;  %v3460_v5 = vshll.u32 %v3147_v52, 16  ;;  %v3493_v50 = vshrl.u32 %v3152_v20, 16 }
 0x20a   : > { %v3416_v8 = vrot.slane %v3415_v41, 4  ;;  %v3442_v39 = vrot.slane %v3440_v13, 5  ;;  %v8238_v38 = vcombine.low %v3379_v56, %v3393_v28  ;;  %v3496_v42 = vshll.u32 %v3152_v20, 16  ;;  %v3154_v7 = vld [vmem:[#allocation2 + $0x100] sm:$0xf] }
 0x20b   : > { %v3462_v60 = vrot.slane %v3460_v5, 5  ;;  %v3484_v13 = vrot.slane %v3482_v32, 5  ;;  %v3495_v56 = vrot.slane %v3493_v50, 4  ;;  %v3507_v27 = vshrl.u32 %v3154_v7, 16  ;;  %v3161_v50 = vld [vmem:[#allocation2 + $0x11c] sm:$0x1] }
 0x20c   : > { %6715 = vmatpush1.bf16.msra.mxu0 %v9709_v45  ;;  %7680 = vmatpush1.bf16.msra.mxu1 %v9712_v51  ;;  %v3145_v45 = vld [vmem:[#allocation2 + $0xcc] sm:$0x1]  ;;  %v3146_v51 = vld [vmem:[#allocation2 + $0xd0] sm:$0xf]  ;;  %v3421_v36 = vsel %vm10071_vm8, %v3416_v8, %v3420_v25  ;;  %v3443_v33 = vor.u32 %v3442_v39, %v3439_v4  ;;  %v3498_v28 = vrot.slane %v3496_v42, 5  ;;  %v3510_v47 = vshll.u32 %v3154_v7, 16 }
 0x20d   : > { %v3446_v44 = vshll.u32 %v3145_v45, 16  ;;  %v3451_v31 = vshrl.u32 %v3146_v51, 16  ;;  %v3454_v21 = vshll.u32 %v3146_v51, 16  ;;  %v8239_v61 = vcombine.low %v3407_v30, %v3421_v36  ;;  %v3155_v36 = vld [vmem:[#allocation2 + $0x104] sm:$0x1] }
 0x20e   : > { %6580 = vmatmul.mubr.bf16.gmra.mrb[16].mxu0 %v9668_v24  ;;  %7545 = vmatmul.mubr.bf16.gmra.mrb[16].mxu1 %v9668_v24  ;;  %v3148_v24 = vld [vmem:[#allocation2 + $0xd8] sm:$0xf]  ;;  %v3444_v54 = vrot.slane %v3443_v33, 4  ;;  %v3521_v8 = vshrl.u32 %v3156_v34, 16  ;;  %v3524_v25 = vshll.u32 %v3156_v34, 16  ;;  %v3499_v39 = vor.u32 %v3498_v28, %v3495_v56 }
 0x20f   : > { %6589 = vmatprep.mubr.bf16.mxu0 %v8236_v55  ;;  %7554 = vmatprep.mubr.bf16.mxu1 %v8236_v55  ;;  %v3429_v55 = vor.u32 %v3428_v6, %v3425_v0  ;;  %v3465_v46 = vshrl.u32 %v3148_v24, 16  ;;  %v3468_v48 = vshll.u32 %v3148_v24, 16  ;;  %v3448_v9 = vrot.slane %v3446_v44, 5  ;;  %v3158_v44 = vld [vmem:[#allocation2 + $0x110] sm:$0xf] }
 0x210   : > { %v3453_v35 = vrot.slane %v3451_v31, 4  ;;  %v3456_v58 = vrot.slane %v3454_v21, 5  ;;  %v3488_v0 = vshll.u32 %v3151_v1, 16  ;;  %v3509_v45 = vrot.slane %v3507_v27, 4  ;;  %v3160_v31 = vld [vmem:[#allocation2 + $0x118] sm:$0xf] }
 0x211   : > { %v3430_v53 = vrot.slane %v3429_v55, 4  ;;  %v3467_v57 = vrot.slane %v3465_v46, 4  ;;  %v3470_v15 = vrot.slane %v3468_v48, 5  ;;  %v3449_v26 = vsel %vm10071_vm8, %v3444_v54, %v3448_v9  ;;  %v3157_v55 = vld [vmem:[#allocation2 + $0x10c] sm:$0x1] }
 0x212   : > { %v3512_v51 = vrot.slane %v3510_v47, 5  ;;  %v3523_v24 = vrot.slane %v3521_v8, 4  ;;  %v3526_v30 = vrot.slane %v3524_v25, 5  ;;  %v3490_v46 = vrot.slane %v3488_v0, 5  ;;  %v3162_v42 = vld [vmem:[#allocation2 + $0x120] sm:$0xf] }
 0x213   : > { %v3435_v18 = vsel %vm10071_vm8, %v3430_v53, %v3434_v63  ;;  %v3471_v14 = vor.u32 %v3470_v15, %v3467_v57  ;;  %v3500_v48 = vrot.slane %v3499_v39, 4  ;;  %v3530_v54 = vshll.u32 %v3157_v55, 16  ;;  %v9699_v28 = vld [vmem:[#allocation2 + $0xe0] ss:$8 sps:$4 sm:$0xff]   ;;  %v3163_v25 = vld [vmem:[#allocation2 + $0x124] sm:$0x1] }
 0x214   : > { %v8240_v43 = vcombine.low %v3435_v18, %v3449_v26  ;;  %v3527_v53 = vor.u32 %v3526_v30, %v3523_v24  ;;  %v3535_v9 = vshrl.u32 %v3158_v44, 16  ;;  %v3538_v52 = vshll.u32 %v3158_v44, 16  ;;  %v3159_v26 = vld [vmem:[#allocation2 + $0x114] sm:$0x1]  ;;  %v3165_v39 = vld [vmem:[#allocation2 + $0x12c] sm:$0x1] }
 0x215   : > { %v3472_v62 = vrot.slane %v3471_v14, 4  ;;  %v3532_v5 = vrot.slane %v3530_v54, 5  ;;  %v3544_v7 = vshll.u32 %v3159_v26, 16  ;;  %v3566_v1 = vshll.u32 %v3162_v42, 16  ;;  %v3167_v54 = vld [vmem:[#allocation2 + $0x134] sm:$0x1] }
 0x216   : > { %6590 = vmatmul.mubr.bf16.gmra.mrb[20].mxu0 %v9675_v49  ;;  %7555 = vmatmul.mubr.bf16.gmra.mrb[20].mxu1 %v9675_v49  ;;  %v3457_v49 = vor.u32 %v3456_v58, %v3453_v35  ;;  %v3549_v35 = vshrl.u32 %v3160_v31, 16  ;;  %v3552_v58 = vshll.u32 %v3160_v31, 16  ;;  %v3528_v18 = vrot.slane %v3527_v53, 4  ;;  %v9707_v26 = vld [vmem:[#allocation2 + $0x110] ss:$8 sps:$4 sm:$0xff]  }
 0x217   : > { %6599 = vmatprep.mubr.bf16.mxu0 %v8237_v37  ;;  %7564 = vmatprep.mubr.bf16.mxu1 %v8237_v37  ;;  %v3479_v37 = vshrl.u32 %v3150_v16, 16  ;;  %v3477_v6 = vsel %vm10071_vm8, %v3472_v62, %v3476_v22  ;;  %v3540_v14 = vrot.slane %v3538_v52, 5  ;;  %v3558_v62 = vshll.u32 %v3161_v50, 16 }
 0x218   : > { %v3458_v41 = vrot.slane %v3457_v49, 4  ;;  %v3537_v49 = vrot.slane %v3535_v9, 4  ;;  %v3551_v12 = vrot.slane %v3549_v35, 4  ;;  %v3533_v34 = vsel %vm10071_vm8, %v3528_v18, %v3532_v5  ;;  %v3169_v9 = vld [vmem:[#allocation2 + $0x13c] sm:$0x1] }
 0x219   : > { %v3481_v10 = vrot.slane %v3479_v37, 4  ;;  %v3554_v37 = vrot.slane %v3552_v58, 5  ;;  %v3563_v22 = vshrl.u32 %v3162_v42, 16  ;;  %v3546_v56 = vrot.slane %v3544_v7, 5  ;;  %v3698_v7 = vld [vmem:[#allocation2 + $0x10] sm:$0xe] }
 0x21a   : > { %v3463_v19 = vsel %vm10071_vm8, %v3458_v41, %v3462_v60  ;;  %v3560_v8 = vrot.slane %v3558_v62, 5  ;;  %v3568_v0 = vrot.slane %v3566_v1, 5  ;;  %v3572_v24 = vshll.u32 %v3163_v25, 16  ;;  %v9715_v62 = vld [vmem:[#allocation2 + $0x130] ss:$8 sps:$4 sm:$0xff]  }
 0x21b   : > { %v3485_v4 = vor.u32 %v3484_v13, %v3481_v10  ;;  %v8241_v33 = vcombine.low %v3463_v19, %v3477_v6  ;;  %v3555_v41 = vor.u32 %v3554_v37, %v3551_v12  ;;  %v3565_v19 = vrot.slane %v3563_v22, 4 }
 0x21c   : > { %v3586_v55 = vshll.u32 %v3165_v39, 16  ;;  %v8247_v22 = vrot.slane %v3698_v7, 9 }
 0x21d   : > { %v3486_v21 = vrot.slane %v3485_v4, 4  ;;  %v3556_v47 = vrot.slane %v3555_v41, 4  ;;  %v3701_v41 = vld [vmem:[#allocation2 + $0x1c] sm:$0x1] }
 0x21e   : > { %6600 = vmatmul.mubr.bf16.gmra.mrb[24].mxu0 %v9676_v17  ;;  %7565 = vmatmul.mubr.bf16.gmra.mrb[24].mxu1 %v9676_v17  ;;  %v3153_v17 = vld [vmem:[#allocation2 + $0xec] sm:$0x1]  ;;  %v3588_v53 = vrot.slane %v3586_v55, 5 }
 0x21f   : > { %6609 = vmatprep.mubr.bf16.mxu0 %v8238_v38  ;;  %7574 = vmatprep.mubr.bf16.mxu1 %v8238_v38  ;;  %v3502_v38 = vshll.u32 %v3153_v17, 16  ;;  %v3491_v57 = vsel %vm10071_vm8, %v3486_v21, %v3490_v46  ;;  %v3561_v30 = vsel %vm10071_vm8, %v3556_v47, %v3560_v8  ;;  %v9700_v46 = vld [vmem:[#allocation2 + $0x100] ss:$8 sps:$4 sm:$0xff]   ;;  %v3705_v47 = vld [vmem:[#allocation2 + $0x2c] sm:$0x1] }
 0x221   : > { %v3504_v63 = vrot.slane %v3502_v38, 5  ;;  %v3166_v38 = vld [vmem:[#allocation2 + $0x130] sm:$0xf] }
 0x222   : > { %v3594_v44 = vshll.u32 %v3166_v38, 16 }
 0x223   : > { %v3505_v15 = vsel %vm10071_vm8, %v3500_v48, %v3504_v63  ;;  %v3574_v48 = vrot.slane %v3572_v24, 5  ;;  %v3709_v24 = vld [vmem:[#allocation2 + $0x3c] sm:$0x1] }
 0x224   : > { %v8242_v32 = vcombine.low %v3491_v57, %v3505_v15  ;;  %v3596_v35 = vrot.slane %v3594_v44, 5  ;;  %v3600_v15 = vshll.u32 %v3167_v54, 16 }
 0x226   : > { %6610 = vmatmul.mubr.bf16.gmra.mrb[28].mxu0 %v9683_v59  ;;  %7575 = vmatmul.mubr.bf16.gmra.mrb[28].mxu1 %v9683_v59  ;;  %v3513_v59 = vor.u32 %v3512_v51, %v3509_v45  ;;  %v3168_v45 = vld [vmem:[#allocation2 + $0x138] sm:$0xf]  ;;  %v3602_v12 = vrot.slane %v3600_v15, 5  ;;  %v3716_v15 = vld [vmem:[#allocation2 + $0x68] sm:$0xe] }
 0x227   : > { %6619 = vmatprep.mubr.bf16.mxu0 %v8239_v61  ;;  %7584 = vmatprep.mubr.bf16.mxu1 %v8239_v61  ;;  %v3516_v61 = vshll.u32 %v3155_v36, 16  ;;  %v3605_v31 = vshrl.u32 %v3168_v45, 16  ;;  %v3608_v21 = vshll.u32 %v3168_v45, 16  ;;  %v3707_v45 = vld [vmem:[#allocation2 + $0x34] sm:$0x1] }
 0x228   : > { %v3514_v16 = vrot.slane %v3513_v59, 4 }
 0x229   : > { %v3518_v20 = vrot.slane %v3516_v61, 5  ;;  %v3607_v58 = vrot.slane %v3605_v31, 4  ;;  %v3610_v57 = vrot.slane %v3608_v21, 5  ;;  %v3710_v21 = vld [vmem:[#allocation2 + $0x40] sm:$0xe] }
 0x22b   : > { %v3519_v60 = vsel %vm10071_vm8, %v3514_v16, %v3518_v20  ;;  %v3611_v5 = vor.u32 %v3610_v57, %v3607_v58  ;;  %v3714_v58 = vld [vmem:[#allocation2 + $0x60] sm:$0xe]  ;;  %v3715_v57 = vld [vmem:[#allocation2 + $0x64] sm:$0x1] }
 0x22c   : > { %v8243_v17 = vcombine.low %v3519_v60, %v3533_v34  ;;  %v3699_v34 = vld [vmem:[#allocation2 + $0x14] sm:$0x1] }
 0x22d   : > { %v3612_v37 = vrot.slane %v3611_v5, 4  ;;  %v3828_v1 = vrot.slane %v3699_v34, 5  ;;  %v8256_v5 = vrot.slane %v3716_v15, 9 }
 0x22e   : > { %6620 = vmatmul.mubr.bf16.gmra.mrb[32].mxu0 %v9684_v40  ;;  %7585 = vmatmul.mubr.bf16.gmra.mrb[32].mxu1 %v9684_v40  ;;  %v3164_v40 = vld [vmem:[#allocation2 + $0x128] sm:$0xf] }
 0x22f   : > { %6629 = vmatprep.mubr.bf16.mxu0 %v8240_v43  ;;  %7594 = vmatprep.mubr.bf16.mxu1 %v8240_v43  ;;  %v3541_v43 = vor.u32 %v3540_v14, %v3537_v49  ;;  %v3577_v10 = vshrl.u32 %v3164_v40, 16  ;;  %v3580_v13 = vshll.u32 %v3164_v40, 16  ;;  %v9708_v40 = vld [vmem:[#allocation2 + $0x120] ss:$8 sps:$4 sm:$0xff]   ;;  %v3829_v3 = vsel %vm10483_vm11, %v8247_v22, %v3828_v1  ;;  %v3723_v22 = vld [vmem:[#allocation2 + $0x84] sm:$0x1] }
 0x230   : > { %v3724_v1 = vld [vmem:[#allocation2 + $0x88] sm:$0xe] }
 0x231   : > { %v3542_v27 = vrot.slane %v3541_v43, 4  ;;  %v3579_v6 = vrot.slane %v3577_v10, 4  ;;  %v3582_v4 = vrot.slane %v3580_v13, 5  ;;  %v3700_v43 = vld [vmem:[#allocation2 + $0x18] sm:$0xe]  ;;  %v3832_v13 = vrot.slane %v3701_v41, 5 }
 0x232   : > { %v8248_v10 = vrot.slane %v3700_v43, 9 }
 0x233   : > { %v3547_v51 = vsel %vm10071_vm8, %v3542_v27, %v3546_v56  ;;  %v3583_v36 = vor.u32 %v3582_v4, %v3579_v6  ;;  %v3704_v27 = vld [vmem:[#allocation2 + $0x28] sm:$0xe]  ;;  %v3840_v6 = vrot.slane %v3705_v47, 5 }
 0x234   : > { %v8244_v63 = vcombine.low %v3547_v51, %v3561_v30  ;;  %v3833_v56 = vsel %vm10483_vm11, %v8248_v10, %v3832_v13  ;;  %v3708_v51 = vld [vmem:[#allocation2 + $0x38] sm:$0xe]  ;;  %v3725_v10 = vld [vmem:[#allocation2 + $0x8c] sm:$0x1] }
 0x235   : > { %v3584_v61 = vrot.slane %v3583_v36, 4  ;;  %v8279_v8 = vcombine.low %v3829_v3, %v3833_v56  ;;  %v3844_v36 = vrot.slane %v3707_v45, 5  ;;  %v8252_v55 = vrot.slane %v3708_v51, 9 }
 0x236   : > { %6630 = vmatmul.mubr.bf16.gmra.mrb[36].mxu0 %v9691_v29  ;;  %7595 = vmatmul.mubr.bf16.gmra.mrb[36].mxu1 %v9691_v29  ;;  %v3569_v29 = vor.u32 %v3568_v0, %v3565_v19  ;;  %v8250_v0 = vrot.slane %v3704_v27, 9  ;;  %v3876_v56 = vrot.slane %v3723_v22, 5 }
 0x237   : > { %6639 = vmatprep.mubr.bf16.mxu0 %v8241_v33  ;;  %7604 = vmatprep.mubr.bf16.mxu1 %v8241_v33  ;;  %v3591_v33 = vshrl.u32 %v3166_v38, 16  ;;  %v3589_v20 = vsel %vm10071_vm8, %v3584_v61, %v3588_v53  ;;  %v3706_v38 = vld [vmem:[#allocation2 + $0x30] sm:$0xe]  ;;  %v8253_v61 = vrot.slane %v3710_v21, 9 }
 0x238   : > { %v3570_v59 = vrot.slane %v3569_v29, 4  ;;  %v3841_v39 = vsel %vm10483_vm11, %v8250_v0, %v3840_v6  ;;  %v8251_v29 = vrot.slane %v3706_v38, 9  ;;  %v3729_v0 = vld [vmem:[#allocation2 + $0x9c] sm:$0x1] }
 0x239   : > { %v3593_v52 = vrot.slane %v3591_v33, 4  ;;  %v3848_v33 = vrot.slane %v3709_v24, 5  ;;  %v3888_v45 = vrot.slane %v3729_v0, 5 }
 0x23a   : > { %v3575_v16 = vsel %vm10071_vm8, %v3570_v59, %v3574_v48  ;;  %v3845_v44 = vsel %vm10483_vm11, %v8251_v29, %v3844_v36  ;;  %v3712_v48 = vld [vmem:[#allocation2 + $0x48] sm:$0xe]  ;;  %v3731_v29 = vld [vmem:[#allocation2 + $0xb4] sm:$0x1]  ;;  %v3732_v36 = vld [vmem:[#allocation2 + $0xb8] sm:$0xe] }
 0x23b   : > { %v3597_v18 = vor.u32 %v3596_v35, %v3593_v52  ;;  %v8245_v49 = vcombine.low %v3575_v16, %v3589_v20  ;;  %v3849_v31 = vsel %vm10483_vm11, %v8252_v55, %v3848_v33  ;;  %v8254_v54 = vrot.slane %v3712_v48, 9  ;;  %v3733_v55 = vld [vmem:[#allocation2 + $0xbc] sm:$0x1] }
 0x23c   : > { %v8281_v59 = vcombine.low %v3845_v44, %v3849_v31  ;;  %v8255_v20 = vrot.slane %v3714_v58, 9  ;;  %v3892_v31 = vrot.slane %v3731_v29, 5  ;;  %v8264_v21 = vrot.slane %v3732_v36, 9 }
 0x23d   : > { %v3598_v14 = vrot.slane %v3597_v18, 4  ;;  %v3860_v18 = vrot.slane %v3715_v57, 5 }
 0x23e   : > { %6640 = vmatmul.mubr.bf16.gmra.mrb[40].mxu0 %v9692_v11  ;;  %7605 = vmatmul.mubr.bf16.gmra.mrb[40].mxu1 %v9692_v11  ;;  %v3614_v11 = vshll.u32 %v3169_v9, 16 }
 0x23f   : > { %6649 = vmatprep.mubr.bf16.mxu0 %v8242_v32  ;;  %7614 = vmatprep.mubr.bf16.mxu1 %v8242_v32  ;;  %v3603_v50 = vsel %vm10071_vm8, %v3598_v14, %v3602_v12  ;;  %v3718_v12 = vld [vmem:[#allocation2 + $0x70] sm:$0xe] }
 0x240   : > { %v3616_v32 = vrot.slane %v3614_v11, 5  ;;  %v3717_v11 = vld [vmem:[#allocation2 + $0x6c] sm:$0x1] }
 0x242   : > { %v3617_v42 = vsel %vm10071_vm8, %v3612_v37, %v3616_v32  ;;  %v3719_v37 = vld [vmem:[#allocation2 + $0x74] sm:$0x1]  ;;  %v3720_v32 = vld [vmem:[#allocation2 + $0x78] sm:$0xe] }
 0x243   : > { %v8246_v60 = vcombine.low %v3603_v50, %v3617_v42  ;;  %v3721_v50 = vld [vmem:[#allocation2 + $0x7c] sm:$0x1]  ;;  %v8258_v7 = vrot.slane %v3720_v32, 9 }
 0x244   : > { %v3872_v34 = vrot.slane %v3721_v50, 5 }
 0x246   : > { %6650 = vmatmul.mubr.bf16.gmra.mrb[44].mxu0 %v9699_v28  ;;  %7615 = vmatmul.mubr.bf16.gmra.mrb[44].mxu1 %v9699_v28  ;;  %v3702_v28 = vld [vmem:[#allocation2 + $0x20] sm:$0xe]  ;;  %v3873_v41 = vsel %vm10483_vm11, %v8258_v7, %v3872_v34  ;;  %v3745_v7 = vld [vmem:[#allocation2 + $0xec] sm:$0x1] }
 0x247   : > { %6659 = vmatprep.mubr.bf16.mxu0 %v8243_v17  ;;  %7624 = vmatprep.mubr.bf16.mxu1 %v8243_v17  ;;  %v3703_v17 = vld [vmem:[#allocation2 + $0x24] sm:$0x1]  ;;  %v8249_v25 = vrot.slane %v3702_v28, 9  ;;  %v8260_v28 = vrot.slane %v3724_v1, 9  ;;  %v3920_v22 = vrot.slane %v3745_v7, 5 }
 0x248   : > { %v3836_v19 = vrot.slane %v3703_v17, 5  ;;  %v3880_v17 = vrot.slane %v3725_v10, 5 }
 0x24a   : > { %v3837_v4 = vsel %vm10483_vm11, %v8249_v25, %v3836_v19  ;;  %v3881_v47 = vsel %vm10483_vm11, %v8260_v28, %v3880_v17  ;;  %v3727_v25 = vld [vmem:[#allocation2 + $0x94] sm:$0x1]  ;;  %v3728_v19 = vld [vmem:[#allocation2 + $0x98] sm:$0xe]  ;;  %v3749_v28 = vld [vmem:[#allocation2 + $0x10c] sm:$0x1] }
 0x24b   : > { %v8280_v30 = vcombine.low %v3837_v4, %v3841_v39  ;;  %v3884_v39 = vrot.slane %v3727_v25, 5  ;;  %v8262_v38 = vrot.slane %v3728_v19, 9  ;;  %v3928_v25 = vrot.slane %v3749_v28, 5 }
 0x24d   : > { %v3889_v24 = vsel %vm10483_vm11, %v8262_v38, %v3888_v45  ;;  %v3753_v38 = vld [vmem:[#allocation2 + $0x11c] sm:$0x1] }
 0x24e   : > { %6660 = vmatmul.mubr.bf16.gmra.mrb[48].mxu0 %v9700_v46  ;;  %7625 = vmatmul.mubr.bf16.gmra.mrb[48].mxu1 %v9700_v46  ;;  %v3711_v46 = vld [vmem:[#allocation2 + $0x44] sm:$0x1]  ;;  %v3936_v29 = vrot.slane %v3753_v38, 5 }
 0x24f   : > { %6669 = vmatprep.mubr.bf16.mxu0 %v8244_v63  ;;  %7634 = vmatprep.mubr.bf16.mxu1 %v8244_v63  ;;  %v3713_v63 = vld [vmem:[#allocation2 + $0x4c] sm:$0x1]  ;;  %v3852_v53 = vrot.slane %v3711_v46, 5  ;;  %v3896_v46 = vrot.slane %v3733_v55, 5 }
 0x250   : > { %v3856_v9 = vrot.slane %v3713_v63, 5 }
 0x251   : > { %v3853_v52 = vsel %vm10483_vm11, %v8253_v61, %v3852_v53  ;;  %v3897_v63 = vsel %vm10483_vm11, %v8264_v21, %v3896_v46  ;;  %v3735_v61 = vld [vmem:[#allocation2 + $0xc4] sm:$0x1]  ;;  %v3736_v53 = vld [vmem:[#allocation2 + $0xc8] sm:$0xe]  ;;  %v3757_v21 = vld [vmem:[#allocation2 + $0x12c] sm:$0x1] }
 0x252   : > { %v3857_v35 = vsel %vm10483_vm11, %v8254_v54, %v3856_v9  ;;  %v3737_v54 = vld [vmem:[#allocation2 + $0xcc] sm:$0x1]  ;;  %v8266_v58 = vrot.slane %v3736_v53, 9 }
 0x253   : > { %v8282_v16 = vcombine.low %v3853_v52, %v3857_v35  ;;  %v3900_v35 = vrot.slane %v3735_v61, 5  ;;  %v3904_v57 = vrot.slane %v3737_v54, 5  ;;  %v3944_v61 = vrot.slane %v3757_v21, 5 }
 0x256   : > { %6670 = vmatmul.mubr.bf16.gmra.mrb[52].mxu0 %v9707_v26  ;;  %7635 = vmatmul.mubr.bf16.gmra.mrb[52].mxu1 %v9707_v26  ;;  %v3864_v26 = vrot.slane %v3717_v11, 5  ;;  %v3905_v11 = vsel %vm10483_vm11, %v8266_v58, %v3904_v57  ;;  %v3761_v58 = vld [vmem:[#allocation2 + $0x13c] sm:$0x1] }
 0x257   : > { %6679 = vmatprep.mubr.bf16.mxu0 %v8245_v49  ;;  %7644 = vmatprep.mubr.bf16.mxu1 %v8245_v49  ;;  %v3861_v49 = vsel %vm10483_vm11, %v8255_v20, %v3860_v18  ;;  %v3739_v20 = vld [vmem:[#allocation2 + $0xd4] sm:$0x1]  ;;  %v3740_v18 = vld [vmem:[#allocation2 + $0xd8] sm:$0xe] }
 0x258   : > { %v3865_v14 = vsel %vm10483_vm11, %v8256_v5, %v3864_v26  ;;  %v3741_v5 = vld [vmem:[#allocation2 + $0xdc] sm:$0x1] }
 0x259   : > { %v8283_v42 = vcombine.low %v3861_v49, %v3865_v14  ;;  %v3908_v14 = vrot.slane %v3739_v20, 5  ;;  %v3952_v20 = vrot.slane %v3761_v58, 5 }
 0x25e   : > { %6680 = vmatmul.mubr.bf16.gmra.mrb[56].mxu0 %v9708_v40  ;;  %7645 = vmatmul.mubr.bf16.gmra.mrb[56].mxu1 %v9708_v40  ;;  %v8257_v40 = vrot.slane %v3718_v12, 9  ;;  %v8268_v12 = vrot.slane %v3740_v18, 9 }
 0x25f   : > { %6689 = vmatprep.mubr.bf16.mxu0 %v8246_v60  ;;  %7654 = vmatprep.mubr.bf16.mxu1 %v8246_v60  ;;  %v3868_v60 = vrot.slane %v3719_v37, 5  ;;  %v3912_v37 = vrot.slane %v3741_v5, 5 }
 0x261   : > { %v3869_v43 = vsel %vm10483_vm11, %v8257_v40, %v3868_v60  ;;  %v3913_v50 = vsel %vm10483_vm11, %v8268_v12, %v3912_v37  ;;  %v3743_v40 = vld [vmem:[#allocation2 + $0xe4] sm:$0x1]  ;;  %v3744_v60 = vld [vmem:[#allocation2 + $0xe8] sm:$0xe] }
 0x262   : > { %v8284_v13 = vcombine.low %v3869_v43, %v3873_v41  ;;  %v3916_v41 = vrot.slane %v3743_v40, 5 }
 0x266   : > { %6690 = vmatmul.mubr.bf16.gmra.mrb[60].mxu0 %v9715_v62  ;;  %7655 = vmatmul.mubr.bf16.gmra.mrb[60].mxu1 %v9715_v62  ;;  %v3722_v62 = vld [vmem:[#allocation2 + $0x80] sm:$0xe] }
 0x267   : > { %6732 = vmatprep.mubr.bf16.mxu0 %v9724_v2  ;;  %7697 = vmatprep.mubr.bf16.mxu1 %v9724_v2  ;;  %v8259_v3 = vrot.slane %v3722_v62, 9  ;;  %v8270_v62 = vrot.slane %v3744_v60, 9 }
 0x269   : > { %v3877_v27 = vsel %vm10483_vm11, %v8259_v3, %v3876_v56  ;;  %v3921_v10 = vsel %vm10483_vm11, %v8270_v62, %v3920_v22  ;;  %v3747_v3 = vld [vmem:[#allocation2 + $0x104] sm:$0x1]  ;;  %v3748_v56 = vld [vmem:[#allocation2 + $0x108] sm:$0xe] }
 0x26a   : > { %v8285_v6 = vcombine.low %v3877_v27, %v3881_v47  ;;  %v3924_v47 = vrot.slane %v3747_v3, 5 }
 0x26e   : > { %6733 = vmatmul.mubr.bf16.vlgmr.msra.gmra.mrb[0].mxu0 %v8279_v8  ;;  %7698 = vmatmul.mubr.bf16.vlgmr.msra.gmra.mrb[0].mxu1 %v8279_v8  ;;  %v3726_v8 = vld [vmem:[#allocation2 + $0x90] sm:$0xe] }
 0x26f   : > { %6742 = vmatprep.mubr.bf16.mxu0 %v9724_v2  ;;  %7707 = vmatprep.mubr.bf16.mxu1 %v9724_v2  ;;  %v8261_v4 = vrot.slane %v3726_v8, 9  ;;  %v8272_v8 = vrot.slane %v3748_v56, 9 }
 0x271   : > { %v3885_v51 = vsel %vm10483_vm11, %v8261_v4, %v3884_v39  ;;  %v3929_v0 = vsel %vm10483_vm11, %v8272_v8, %v3928_v25  ;;  %v3751_v4 = vld [vmem:[#allocation2 + $0x114] sm:$0x1]  ;;  %v3752_v39 = vld [vmem:[#allocation2 + $0x118] sm:$0xe] }
 0x272   : > { %v8286_v33 = vcombine.low %v3885_v51, %v3889_v24  ;;  %v3932_v24 = vrot.slane %v3751_v4, 5 }
 0x276   : > { %6743 = vmatmul.mubr.bf16.gmra.mrb[4].mxu0 %v8280_v30  ;;  %7708 = vmatmul.mubr.bf16.gmra.mrb[4].mxu1 %v8280_v30  ;;  %v3730_v30 = vld [vmem:[#allocation2 + $0xb0] sm:$0xe] }
 0x277   : > { %6752 = vmatprep.mubr.bf16.mxu0 %v9724_v2  ;;  %7717 = vmatprep.mubr.bf16.mxu1 %v9724_v2  ;;  %v8263_v44 = vrot.slane %v3730_v30, 9  ;;  %v8274_v30 = vrot.slane %v3752_v39, 9 }
 0x279   : > { %v3893_v48 = vsel %vm10483_vm11, %v8263_v44, %v3892_v31  ;;  %v3937_v55 = vsel %vm10483_vm11, %v8274_v30, %v3936_v29  ;;  %v3755_v44 = vld [vmem:[#allocation2 + $0x124] sm:$0x1]  ;;  %v3756_v31 = vld [vmem:[#allocation2 + $0x128] sm:$0xe] }
 0x27a   : > { %v8287_v9 = vcombine.low %v3893_v48, %v3897_v63  ;;  %v3940_v63 = vrot.slane %v3755_v44, 5 }
 0x27e   : > { %6753 = vmatmul.mubr.bf16.gmra.mrb[8].mxu0 %v8281_v59  ;;  %7718 = vmatmul.mubr.bf16.gmra.mrb[8].mxu1 %v8281_v59  ;;  %v3734_v59 = vld [vmem:[#allocation2 + $0xc0] sm:$0xe] }
 0x27f   : > { %6762 = vmatprep.mubr.bf16.mxu0 %v9724_v2  ;;  %7727 = vmatprep.mubr.bf16.mxu1 %v9724_v2  ;;  %v8265_v52 = vrot.slane %v3734_v59, 9  ;;  %v8276_v59 = vrot.slane %v3756_v31, 9 }
 0x281   : > { %v3901_v15 = vsel %vm10483_vm11, %v8265_v52, %v3900_v35  ;;  %v3945_v54 = vsel %vm10483_vm11, %v8276_v59, %v3944_v61  ;;  %v3759_v52 = vld [vmem:[#allocation2 + $0x134] sm:$0x1]  ;;  %v3760_v35 = vld [vmem:[#allocation2 + $0x138] sm:$0xe] }
 0x282   : > { %v8288_v26 = vcombine.low %v3901_v15, %v3905_v11  ;;  %v3948_v11 = vrot.slane %v3759_v52, 5 }
 0x286   : > { %6763 = vmatmul.mubr.bf16.gmra.mrb[12].mxu0 %v8282_v16  ;;  %7728 = vmatmul.mubr.bf16.gmra.mrb[12].mxu1 %v8282_v16  ;;  %v3738_v16 = vld [vmem:[#allocation2 + $0xd0] sm:$0xe] }
 0x287   : > { %6772 = vmatprep.mubr.bf16.mxu0 %v9724_v2  ;;  %7737 = vmatprep.mubr.bf16.mxu1 %v9724_v2  ;;  %v8267_v49 = vrot.slane %v3738_v16, 9  ;;  %v8278_v16 = vrot.slane %v3760_v35, 9 }
 0x289   : > { %v3909_v32 = vsel %vm10483_vm11, %v8267_v49, %v3908_v14  ;;  %v3953_v5 = vsel %vm10483_vm11, %v8278_v16, %v3952_v20  ;;  %v4468_v49 = vlaneseq }
 0x28a   : > { %v8289_v34 = vcombine.low %v3909_v32, %v3913_v50 }
 0x28b   : > { %v4469_v14 = vshrl.u32 %v4468_v49, 7 }
 0x28d   : > { %v4470_v12 = vsub.s32 0, %v4469_v14  ;;  %v4478_v37 = vsub.s32 2, %v4469_v14  ;;  %v4474_v32 = vsub.s32 1, %v4469_v14  ;;  %v4482_v50 = vsub.s32 3, %v4469_v14 }
 0x28e   : > { %6773 = vmatmul.mubr.bf16.gmra.mrb[16].mxu0 %v8283_v42  ;;  %7738 = vmatmul.mubr.bf16.gmra.mrb[16].mxu1 %v8283_v42  ;;  %v3742_v42 = vld [vmem:[#allocation2 + $0xe0] sm:$0xe] }
 0x28f   : > { %6782 = vmatprep.mubr.bf16.mxu0 %v9724_v2  ;;  %7747 = vmatprep.mubr.bf16.mxu1 %v9724_v2  ;;  %v8269_v43 = vrot.slane %v3742_v42, 9 }
 0x291   : > { %v3917_v1 = vsel %vm10483_vm11, %v8269_v43, %v3916_v41 }
 0x292   : > { %v8290_v17 = vcombine.low %v3917_v1, %v3921_v10 }
 0x296   : > { %6783 = vmatmul.mubr.bf16.gmra.mrb[20].mxu0 %v8284_v13  ;;  %7748 = vmatmul.mubr.bf16.gmra.mrb[20].mxu1 %v8284_v13  ;;  %v3746_v13 = vld [vmem:[#allocation2 + $0x100] sm:$0xe] }
 0x297   : > { %6792 = vmatprep.mubr.bf16.mxu0 %v9724_v2  ;;  %7757 = vmatprep.mubr.bf16.mxu1 %v9724_v2  ;;  %v8271_v27 = vrot.slane %v3746_v13, 9 }
 0x299   : > { %v3925_v19 = vsel %vm10483_vm11, %v8271_v27, %v3924_v47 }
 0x29a   : > { %v8291_v45 = vcombine.low %v3925_v19, %v3929_v0 }
 0x29e   : > { %6793 = vmatmul.mubr.bf16.gmra.mrb[24].mxu0 %v8285_v6  ;;  %7758 = vmatmul.mubr.bf16.gmra.mrb[24].mxu1 %v8285_v6  ;;  %v3750_v6 = vld [vmem:[#allocation2 + $0x110] sm:$0xe] }
 0x29f   : > { %6802 = vmatprep.mubr.bf16.mxu0 %v9724_v2  ;;  %7767 = vmatprep.mubr.bf16.mxu1 %v9724_v2  ;;  %v8273_v51 = vrot.slane %v3750_v6, 9 }
 0x2a1   : > { %v3933_v36 = vsel %vm10483_vm11, %v8273_v51, %v3932_v24 }
 0x2a2   : > { %v8292_v46 = vcombine.low %v3933_v36, %v3937_v55 }
 0x2a6   : > { %6803 = vmatmul.mubr.bf16.gmra.mrb[28].mxu0 %v8286_v33  ;;  %7768 = vmatmul.mubr.bf16.gmra.mrb[28].mxu1 %v8286_v33  ;;  %v3754_v33 = vld [vmem:[#allocation2 + $0x120] sm:$0xe] }
 0x2a7   : > { %6812 = vmatprep.mubr.bf16.mxu0 %v9724_v2  ;;  %7777 = vmatprep.mubr.bf16.mxu1 %v9724_v2  ;;  %v8275_v48 = vrot.slane %v3754_v33, 9 }
 0x2a9   : > { %v3941_v53 = vsel %vm10483_vm11, %v8275_v48, %v3940_v63 }
 0x2aa   : > { %v8293_v57 = vcombine.low %v3941_v53, %v3945_v54 }
 0x2ae   : > { %6813 = vmatmul.mubr.bf16.gmra.mrb[32].mxu0 %v8287_v9  ;;  %7778 = vmatmul.mubr.bf16.gmra.mrb[32].mxu1 %v8287_v9  ;;  %v3758_v9 = vld [vmem:[#allocation2 + $0x130] sm:$0xe] }
 0x2af   : > { %6822 = vmatprep.mubr.bf16.mxu0 %v9724_v2  ;;  %7787 = vmatprep.mubr.bf16.mxu1 %v9724_v2  ;;  %v8277_v15 = vrot.slane %v3758_v9, 9 }
 0x2b1   : > { %v3949_v18 = vsel %vm10483_vm11, %v8277_v15, %v3948_v11 }
 0x2b6   : > { %6823 = vmatmul.mubr.bf16.gmra.mrb[36].mxu0 %v8288_v26  ;;  %7788 = vmatmul.mubr.bf16.gmra.mrb[36].mxu1 %v8288_v26  ;;  %v8294_v26 = vcombine.low %v3949_v18, %v3953_v5 }
 0x2b7   : > { %6832 = vmatprep.mubr.bf16.mxu0 %v9724_v2  ;;  %7797 = vmatprep.mubr.bf16.mxu1 %v9724_v2 }
 0x2be   : > { %6833 = vmatmul.mubr.bf16.gmra.mrb[40].mxu0 %v8289_v34  ;;  %7798 = vmatmul.mubr.bf16.gmra.mrb[40].mxu1 %v8289_v34 }
 0x2bf   : > { %6842 = vmatprep.mubr.bf16.mxu0 %v9724_v2  ;;  %7807 = vmatprep.mubr.bf16.mxu1 %v9724_v2 }
 0x2c6   : > { %6843 = vmatmul.mubr.bf16.gmra.mrb[44].mxu0 %v8290_v17  ;;  %7808 = vmatmul.mubr.bf16.gmra.mrb[44].mxu1 %v8290_v17 }
 0x2c7   : > { %6852 = vmatprep.mubr.bf16.mxu0 %v9724_v2  ;;  %7817 = vmatprep.mubr.bf16.mxu1 %v9724_v2 }
 0x2ce   : > { %6853 = vmatmul.mubr.bf16.gmra.mrb[48].mxu0 %v8291_v45  ;;  %7818 = vmatmul.mubr.bf16.gmra.mrb[48].mxu1 %v8291_v45 }
 0x2cf   : > { %6862 = vmatprep.mubr.bf16.mxu0 %v9724_v2  ;;  %7827 = vmatprep.mubr.bf16.mxu1 %v9724_v2 }
 0x2d6   : > { %6863 = vmatmul.mubr.bf16.gmra.mrb[52].mxu0 %v8292_v46  ;;  %7828 = vmatmul.mubr.bf16.gmra.mrb[52].mxu1 %v8292_v46 }
 0x2d7   : > { %6872 = vmatprep.mubr.bf16.mxu0 %v9724_v2  ;;  %7837 = vmatprep.mubr.bf16.mxu1 %v9724_v2 }
 0x2de   : > { %6873 = vmatmul.mubr.bf16.gmra.mrb[56].mxu0 %v8293_v57  ;;  %7838 = vmatmul.mubr.bf16.gmra.mrb[56].mxu1 %v8293_v57 }
 0x2df   : > { %6882 = vmatprep.mubr.bf16.mxu0 %v9724_v2  ;;  %7847 = vmatprep.mubr.bf16.mxu1 %v9724_v2  ;;  %v4466_v2 = vld [vmem:[%s11926_s2] sm:$0xf] }
 0x2e0   : > { %v11652_v23 = vrot.slane %v4466_v2, %v4470_v12  ;;  %v11654_v42 = vrot.slane %v4466_v2, %v4478_v37  ;;  %v11656_v40 = vrot.slane %v4466_v2, %v4474_v32  ;;  %v11658_v60 = vrot.slane %v4466_v2, %v4482_v50 }
 0x2e6   : > { %6883 = vmatmul.mubr.bf16.gmra.mrb[60].mxu0 %v8294_v26  ;;  %7848 = vmatmul.mubr.bf16.gmra.mrb[60].mxu1 %v8294_v26 }
 0x341   : > { %v6734_v7 = vpop.f32.mrb[0].mxu0  ;;  %v7699_v34 = vpop.f32.mrb[0].mxu1 }
 0x342   : > { %v8587_v43 = vadd.f32 %v6734_v7, %v11652_v23  ;;  %v8651_v41 = vadd.f32 %v7699_v34, %v11654_v42  ;;  %v6736_v62 = vpop.f32.mrb[1].mxu0  ;;  %v7701_v22 = vpop.f32.mrb[1].mxu1 }
 0x343   : > { %v8588_v1 = vadd.f32 %v6736_v62, %v11656_v40  ;;  %v8652_v10 = vadd.f32 %v7701_v22, %v11658_v60  ;;  %v6738_v13 = vpop.f32.mrb[2].mxu0  ;;  %v7703_v3 = vpop.f32.mrb[2].mxu1 }
 0x344   : > { %7858 = vst [vmem:[%s11663_s9] sm:$0xff] %v8587_v43  ;;  %7860 = vst [vmem:[%s11663_s9 + $0x10] sm:$0xff] %v8651_v41  ;;  %v8589_v56 = vadd.f32 %v6738_v13, %v11652_v23  ;;  %v8653_v28 = vadd.f32 %v7703_v3, %v11654_v42  ;;  %v6740_v17 = vpop.f32.mrb[3].mxu0  ;;  %v7705_v27 = vpop.f32.mrb[3].mxu1 }
 0x345   : > { %7859 = vst [vmem:[%s11663_s9 + $0x8] sm:$0xff] %v8588_v1  ;;  %7861 = vst [vmem:[%s11663_s9 + $0x18] sm:$0xff] %v8652_v10  ;;  %v8590_v47 = vadd.f32 %v6740_v17, %v11656_v40  ;;  %v8654_v8 = vadd.f32 %v7705_v27, %v11658_v60 }
 0x346   : > { %7862 = vst [vmem:[%s11663_s9 + $0x20] sm:$0xff] %v8589_v56  ;;  %7864 = vst [vmem:[%s11663_s9 + $0x30] sm:$0xff] %v8653_v28 }
 0x347   : > { %7863 = vst [vmem:[%s11663_s9 + $0x28] sm:$0xff] %v8590_v47  ;;  %7865 = vst [vmem:[%s11663_s9 + $0x38] sm:$0xff] %v8654_v8 }
 0x349   : > { %v6744_v25 = vpop.f32.mrb[4].mxu0  ;;  %v7709_v19 = vpop.f32.mrb[4].mxu1 }
 0x34a   : > { %v8591_v0 = vadd.f32 %v6744_v25, %v11652_v23  ;;  %v8655_v6 = vadd.f32 %v7709_v19, %v11654_v42  ;;  %v6746_v4 = vpop.f32.mrb[5].mxu0  ;;  %v7711_v39 = vpop.f32.mrb[5].mxu1 }
 0x34b   : > { %v8592_v38 = vadd.f32 %v6746_v4, %v11656_v40  ;;  %v8656_v45 = vadd.f32 %v7711_v39, %v11658_v60  ;;  %v6748_v51 = vpop.f32.mrb[6].mxu0  ;;  %v7713_v24 = vpop.f32.mrb[6].mxu1 }
 0x34c   : > { %7866 = vst [vmem:[%s11663_s9 + $0x40] sm:$0xff] %v8591_v0  ;;  %7868 = vst [vmem:[%s11663_s9 + $0x50] sm:$0xff] %v8655_v6  ;;  %v8593_v30 = vadd.f32 %v6748_v51, %v11652_v23  ;;  %v8657_v29 = vadd.f32 %v7713_v24, %v11654_v42  ;;  %v6750_v36 = vpop.f32.mrb[7].mxu0  ;;  %v7715_v55 = vpop.f32.mrb[7].mxu1 }
 0x34d   : > { %7867 = vst [vmem:[%s11663_s9 + $0x48] sm:$0xff] %v8592_v38  ;;  %7869 = vst [vmem:[%s11663_s9 + $0x58] sm:$0xff] %v8656_v45  ;;  %v8594_v33 = vadd.f32 %v6750_v36, %v11656_v40  ;;  %v8658_v44 = vadd.f32 %v7715_v55, %v11658_v60 }
 0x34e   : > { %7870 = vst [vmem:[%s11663_s9 + $0x60] sm:$0xff] %v8593_v30  ;;  %7872 = vst [vmem:[%s11663_s9 + $0x70] sm:$0xff] %v8657_v29 }
 0x34f   : > { %7871 = vst [vmem:[%s11663_s9 + $0x68] sm:$0xff] %v8594_v33  ;;  %7873 = vst [vmem:[%s11663_s9 + $0x78] sm:$0xff] %v8658_v44 }
 0x351   : > { %v6754_v31 = vpop.f32.mrb[8].mxu0  ;;  %v7719_v21 = vpop.f32.mrb[8].mxu1 }
 0x352   : > { %v8595_v46 = vadd.f32 %v6754_v31, %v11652_v23  ;;  %v8659_v48 = vadd.f32 %v7719_v21, %v11654_v42  ;;  %v6756_v63 = vpop.f32.mrb[9].mxu0  ;;  %v7721_v59 = vpop.f32.mrb[9].mxu1 }
 0x353   : > { %v8596_v61 = vadd.f32 %v6756_v63, %v11656_v40  ;;  %v8660_v53 = vadd.f32 %v7721_v59, %v11658_v60  ;;  %v6758_v54 = vpop.f32.mrb[10].mxu0  ;;  %v7723_v9 = vpop.f32.mrb[10].mxu1 }
 0x354   : > { %7874 = vst [vmem:[%s11663_s9 + $0x80] sm:$0xff] %v8595_v46  ;;  %7876 = vst [vmem:[%s11663_s9 + $0x90] sm:$0xff] %v8659_v48  ;;  %v8597_v52 = vadd.f32 %v6758_v54, %v11652_v23  ;;  %v8661_v35 = vadd.f32 %v7723_v9, %v11654_v42  ;;  %v6760_v58 = vpop.f32.mrb[11].mxu0  ;;  %v7725_v57 = vpop.f32.mrb[11].mxu1 }
 0x355   : > { %7875 = vst [vmem:[%s11663_s9 + $0x88] sm:$0xff] %v8596_v61  ;;  %7877 = vst [vmem:[%s11663_s9 + $0x98] sm:$0xff] %v8660_v53  ;;  %v8598_v15 = vadd.f32 %v6760_v58, %v11656_v40  ;;  %v8662_v11 = vadd.f32 %v7725_v57, %v11658_v60 }
 0x356   : > { %7878 = vst [vmem:[%s11663_s9 + $0xa0] sm:$0xff] %v8597_v52  ;;  %7880 = vst [vmem:[%s11663_s9 + $0xb0] sm:$0xff] %v8661_v35 }
 0x357   : > { %7879 = vst [vmem:[%s11663_s9 + $0xa8] sm:$0xff] %v8598_v15  ;;  %7881 = vst [vmem:[%s11663_s9 + $0xb8] sm:$0xff] %v8662_v11 }
 0x359   : > { %v6764_v16 = vpop.f32.mrb[12].mxu0  ;;  %v7729_v20 = vpop.f32.mrb[12].mxu1 }
 0x35a   : > { %v8599_v18 = vadd.f32 %v6764_v16, %v11652_v23  ;;  %v8663_v5 = vadd.f32 %v7729_v20, %v11654_v42  ;;  %v6766_v26 = vpop.f32.mrb[13].mxu0  ;;  %v7731_v49 = vpop.f32.mrb[13].mxu1 }
 0x35b   : > { %v8600_v14 = vadd.f32 %v6766_v26, %v11656_v40  ;;  %v8664_v12 = vadd.f32 %v7731_v49, %v11658_v60  ;;  %v6768_v37 = vpop.f32.mrb[14].mxu0  ;;  %v7733_v2 = vpop.f32.mrb[14].mxu1 }
 0x35c   : > { %7882 = vst [vmem:[%s11663_s9 + $0xc0] sm:$0xff] %v8599_v18  ;;  %7884 = vst [vmem:[%s11663_s9 + $0xd0] sm:$0xff] %v8663_v5  ;;  %v8601_v32 = vadd.f32 %v6768_v37, %v11652_v23  ;;  %v8665_v50 = vadd.f32 %v7733_v2, %v11654_v42  ;;  %v6770_v7 = vpop.f32.mrb[15].mxu0  ;;  %v7735_v34 = vpop.f32.mrb[15].mxu1 }
 0x35d   : > { %7883 = vst [vmem:[%s11663_s9 + $0xc8] sm:$0xff] %v8600_v14  ;;  %7885 = vst [vmem:[%s11663_s9 + $0xd8] sm:$0xff] %v8664_v12  ;;  %v8602_v43 = vadd.f32 %v6770_v7, %v11656_v40  ;;  %v8666_v41 = vadd.f32 %v7735_v34, %v11658_v60 }
 0x35e   : > { %7886 = vst [vmem:[%s11663_s9 + $0xe0] sm:$0xff] %v8601_v32  ;;  %7888 = vst [vmem:[%s11663_s9 + $0xf0] sm:$0xff] %v8665_v50 }
 0x35f   : > { %7887 = vst [vmem:[%s11663_s9 + $0xe8] sm:$0xff] %v8602_v43  ;;  %7889 = vst [vmem:[%s11663_s9 + $0xf8] sm:$0xff] %v8666_v41 }
 0x361   : > { %v6774_v62 = vpop.f32.mrb[16].mxu0  ;;  %v7739_v22 = vpop.f32.mrb[16].mxu1 }
 0x362   : > { %v8603_v1 = vadd.f32 %v6774_v62, %v11652_v23  ;;  %v8667_v10 = vadd.f32 %v7739_v22, %v11654_v42  ;;  %v6776_v13 = vpop.f32.mrb[17].mxu0  ;;  %v7741_v3 = vpop.f32.mrb[17].mxu1 }
 0x363   : > { %v8604_v56 = vadd.f32 %v6776_v13, %v11656_v40  ;;  %v8668_v28 = vadd.f32 %v7741_v3, %v11658_v60  ;;  %v6778_v17 = vpop.f32.mrb[18].mxu0  ;;  %v7743_v27 = vpop.f32.mrb[18].mxu1 }
 0x364   : > { %7890 = vst [vmem:[%s11663_s9 + $0x100] sm:$0xff] %v8603_v1  ;;  %7892 = vst [vmem:[%s11663_s9 + $0x110] sm:$0xff] %v8667_v10  ;;  %v8605_v47 = vadd.f32 %v6778_v17, %v11652_v23  ;;  %v8669_v8 = vadd.f32 %v7743_v27, %v11654_v42  ;;  %v6780_v25 = vpop.f32.mrb[19].mxu0  ;;  %v7745_v19 = vpop.f32.mrb[19].mxu1 }
 0x365   : > { %7891 = vst [vmem:[%s11663_s9 + $0x108] sm:$0xff] %v8604_v56  ;;  %7893 = vst [vmem:[%s11663_s9 + $0x118] sm:$0xff] %v8668_v28  ;;  %v8606_v0 = vadd.f32 %v6780_v25, %v11656_v40  ;;  %v8670_v6 = vadd.f32 %v7745_v19, %v11658_v60 }
 0x366   : > { %7894 = vst [vmem:[%s11663_s9 + $0x120] sm:$0xff] %v8605_v47  ;;  %7896 = vst [vmem:[%s11663_s9 + $0x130] sm:$0xff] %v8669_v8 }
 0x367   : > { %7895 = vst [vmem:[%s11663_s9 + $0x128] sm:$0xff] %v8606_v0  ;;  %7897 = vst [vmem:[%s11663_s9 + $0x138] sm:$0xff] %v8670_v6 }
 0x369   : > { %v6784_v4 = vpop.f32.mrb[20].mxu0  ;;  %v7749_v39 = vpop.f32.mrb[20].mxu1 }
 0x36a   : > { %v8607_v38 = vadd.f32 %v6784_v4, %v11652_v23  ;;  %v8671_v45 = vadd.f32 %v7749_v39, %v11654_v42  ;;  %v6786_v51 = vpop.f32.mrb[21].mxu0  ;;  %v7751_v24 = vpop.f32.mrb[21].mxu1 }
 0x36b   : > { %v8608_v30 = vadd.f32 %v6786_v51, %v11656_v40  ;;  %v8672_v29 = vadd.f32 %v7751_v24, %v11658_v60  ;;  %v6788_v36 = vpop.f32.mrb[22].mxu0  ;;  %v7753_v55 = vpop.f32.mrb[22].mxu1 }
 0x36c   : > { %7898 = vst [vmem:[%s11663_s9 + $0x140] sm:$0xff] %v8607_v38  ;;  %7900 = vst [vmem:[%s11663_s9 + $0x150] sm:$0xff] %v8671_v45  ;;  %v8609_v33 = vadd.f32 %v6788_v36, %v11652_v23  ;;  %v8673_v44 = vadd.f32 %v7753_v55, %v11654_v42  ;;  %v6790_v31 = vpop.f32.mrb[23].mxu0  ;;  %v7755_v21 = vpop.f32.mrb[23].mxu1 }
 0x36d   : > { %7899 = vst [vmem:[%s11663_s9 + $0x148] sm:$0xff] %v8608_v30  ;;  %7901 = vst [vmem:[%s11663_s9 + $0x158] sm:$0xff] %v8672_v29  ;;  %v8610_v46 = vadd.f32 %v6790_v31, %v11656_v40  ;;  %v8674_v48 = vadd.f32 %v7755_v21, %v11658_v60 }
 0x36e   : > { %7902 = vst [vmem:[%s11663_s9 + $0x160] sm:$0xff] %v8609_v33  ;;  %7904 = vst [vmem:[%s11663_s9 + $0x170] sm:$0xff] %v8673_v44 }
 0x36f   : > { %7903 = vst [vmem:[%s11663_s9 + $0x168] sm:$0xff] %v8610_v46  ;;  %7905 = vst [vmem:[%s11663_s9 + $0x178] sm:$0xff] %v8674_v48 }
 0x371   : > { %v6794_v63 = vpop.f32.mrb[24].mxu0  ;;  %v7759_v59 = vpop.f32.mrb[24].mxu1 }
 0x372   : > { %v8611_v61 = vadd.f32 %v6794_v63, %v11652_v23  ;;  %v8675_v53 = vadd.f32 %v7759_v59, %v11654_v42  ;;  %v6796_v54 = vpop.f32.mrb[25].mxu0  ;;  %v7761_v9 = vpop.f32.mrb[25].mxu1 }
 0x373   : > { %v8612_v52 = vadd.f32 %v6796_v54, %v11656_v40  ;;  %v8676_v35 = vadd.f32 %v7761_v9, %v11658_v60  ;;  %v6798_v58 = vpop.f32.mrb[26].mxu0  ;;  %v7763_v57 = vpop.f32.mrb[26].mxu1 }
 0x374   : > { %7906 = vst [vmem:[%s11663_s9 + $0x180] sm:$0xff] %v8611_v61  ;;  %7908 = vst [vmem:[%s11663_s9 + $0x190] sm:$0xff] %v8675_v53  ;;  %v8613_v15 = vadd.f32 %v6798_v58, %v11652_v23  ;;  %v8677_v11 = vadd.f32 %v7763_v57, %v11654_v42  ;;  %v6800_v16 = vpop.f32.mrb[27].mxu0  ;;  %v7765_v20 = vpop.f32.mrb[27].mxu1 }
 0x375   : > { %7907 = vst [vmem:[%s11663_s9 + $0x188] sm:$0xff] %v8612_v52  ;;  %7909 = vst [vmem:[%s11663_s9 + $0x198] sm:$0xff] %v8676_v35  ;;  %v8614_v18 = vadd.f32 %v6800_v16, %v11656_v40  ;;  %v8678_v5 = vadd.f32 %v7765_v20, %v11658_v60 }
 0x376   : > { %7910 = vst [vmem:[%s11663_s9 + $0x1a0] sm:$0xff] %v8613_v15  ;;  %7912 = vst [vmem:[%s11663_s9 + $0x1b0] sm:$0xff] %v8677_v11 }
 0x377   : > { %7911 = vst [vmem:[%s11663_s9 + $0x1a8] sm:$0xff] %v8614_v18  ;;  %7913 = vst [vmem:[%s11663_s9 + $0x1b8] sm:$0xff] %v8678_v5 }
 0x379   : > { %v6804_v26 = vpop.f32.mrb[28].mxu0  ;;  %v7769_v49 = vpop.f32.mrb[28].mxu1 }
 0x37a   : > { %v8615_v14 = vadd.f32 %v6804_v26, %v11652_v23  ;;  %v8679_v12 = vadd.f32 %v7769_v49, %v11654_v42  ;;  %v6806_v37 = vpop.f32.mrb[29].mxu0  ;;  %v7771_v2 = vpop.f32.mrb[29].mxu1 }
 0x37b   : > { %v8616_v32 = vadd.f32 %v6806_v37, %v11656_v40  ;;  %v8680_v50 = vadd.f32 %v7771_v2, %v11658_v60  ;;  %v6808_v7 = vpop.f32.mrb[30].mxu0  ;;  %v7773_v34 = vpop.f32.mrb[30].mxu1 }
 0x37c   : > { %7914 = vst [vmem:[%s11663_s9 + $0x1c0] sm:$0xff] %v8615_v14  ;;  %7916 = vst [vmem:[%s11663_s9 + $0x1d0] sm:$0xff] %v8679_v12  ;;  %v8617_v43 = vadd.f32 %v6808_v7, %v11652_v23  ;;  %v8681_v41 = vadd.f32 %v7773_v34, %v11654_v42  ;;  %v6810_v62 = vpop.f32.mrb[31].mxu0  ;;  %v7775_v22 = vpop.f32.mrb[31].mxu1 }
 0x37d   : > { %7915 = vst [vmem:[%s11663_s9 + $0x1c8] sm:$0xff] %v8616_v32  ;;  %7917 = vst [vmem:[%s11663_s9 + $0x1d8] sm:$0xff] %v8680_v50  ;;  %v8618_v1 = vadd.f32 %v6810_v62, %v11656_v40  ;;  %v8682_v10 = vadd.f32 %v7775_v22, %v11658_v60 }
 0x37e   : > { %7918 = vst [vmem:[%s11663_s9 + $0x1e0] sm:$0xff] %v8617_v43  ;;  %7920 = vst [vmem:[%s11663_s9 + $0x1f0] sm:$0xff] %v8681_v41 }
 0x37f   : > { %7919 = vst [vmem:[%s11663_s9 + $0x1e8] sm:$0xff] %v8618_v1  ;;  %7921 = vst [vmem:[%s11663_s9 + $0x1f8] sm:$0xff] %v8682_v10 }
 0x381   : > { %v6814_v13 = vpop.f32.mrb[32].mxu0  ;;  %v7779_v3 = vpop.f32.mrb[32].mxu1 }
 0x382   : > { %v8619_v56 = vadd.f32 %v6814_v13, %v11652_v23  ;;  %v8683_v28 = vadd.f32 %v7779_v3, %v11654_v42  ;;  %v6816_v17 = vpop.f32.mrb[33].mxu0  ;;  %v7781_v27 = vpop.f32.mrb[33].mxu1 }
 0x383   : > { %v8620_v47 = vadd.f32 %v6816_v17, %v11656_v40  ;;  %v8684_v8 = vadd.f32 %v7781_v27, %v11658_v60  ;;  %v6818_v25 = vpop.f32.mrb[34].mxu0  ;;  %v7783_v19 = vpop.f32.mrb[34].mxu1 }
 0x384   : > { %7922 = vst [vmem:[%s11663_s9 + $0x200] sm:$0xff] %v8619_v56  ;;  %7924 = vst [vmem:[%s11663_s9 + $0x210] sm:$0xff] %v8683_v28  ;;  %v8621_v0 = vadd.f32 %v6818_v25, %v11652_v23  ;;  %v8685_v6 = vadd.f32 %v7783_v19, %v11654_v42  ;;  %v6820_v4 = vpop.f32.mrb[35].mxu0  ;;  %v7785_v39 = vpop.f32.mrb[35].mxu1 }
 0x385   : > { %7923 = vst [vmem:[%s11663_s9 + $0x208] sm:$0xff] %v8620_v47  ;;  %7925 = vst [vmem:[%s11663_s9 + $0x218] sm:$0xff] %v8684_v8  ;;  %v8622_v38 = vadd.f32 %v6820_v4, %v11656_v40  ;;  %v8686_v45 = vadd.f32 %v7785_v39, %v11658_v60 }
 0x386   : > { %7926 = vst [vmem:[%s11663_s9 + $0x220] sm:$0xff] %v8621_v0  ;;  %7928 = vst [vmem:[%s11663_s9 + $0x230] sm:$0xff] %v8685_v6 }
 0x387   : > { %7927 = vst [vmem:[%s11663_s9 + $0x228] sm:$0xff] %v8622_v38  ;;  %7929 = vst [vmem:[%s11663_s9 + $0x238] sm:$0xff] %v8686_v45 }
 0x389   : > { %v6824_v51 = vpop.f32.mrb[36].mxu0  ;;  %v7789_v24 = vpop.f32.mrb[36].mxu1 }
 0x38a   : > { %v8623_v30 = vadd.f32 %v6824_v51, %v11652_v23  ;;  %v8687_v29 = vadd.f32 %v7789_v24, %v11654_v42  ;;  %v6826_v36 = vpop.f32.mrb[37].mxu0  ;;  %v7791_v55 = vpop.f32.mrb[37].mxu1 }
 0x38b   : > { %v8624_v33 = vadd.f32 %v6826_v36, %v11656_v40  ;;  %v8688_v44 = vadd.f32 %v7791_v55, %v11658_v60  ;;  %v6828_v31 = vpop.f32.mrb[38].mxu0  ;;  %v7793_v21 = vpop.f32.mrb[38].mxu1 }
 0x38c   : > { %7930 = vst [vmem:[%s11663_s9 + $0x240] sm:$0xff] %v8623_v30  ;;  %7932 = vst [vmem:[%s11663_s9 + $0x250] sm:$0xff] %v8687_v29  ;;  %v8625_v46 = vadd.f32 %v6828_v31, %v11652_v23  ;;  %v8689_v48 = vadd.f32 %v7793_v21, %v11654_v42  ;;  %v6830_v63 = vpop.f32.mrb[39].mxu0  ;;  %v7795_v59 = vpop.f32.mrb[39].mxu1 }
 0x38d   : > { %7931 = vst [vmem:[%s11663_s9 + $0x248] sm:$0xff] %v8624_v33  ;;  %7933 = vst [vmem:[%s11663_s9 + $0x258] sm:$0xff] %v8688_v44  ;;  %v8626_v61 = vadd.f32 %v6830_v63, %v11656_v40  ;;  %v8690_v53 = vadd.f32 %v7795_v59, %v11658_v60 }
 0x38e   : > { %7934 = vst [vmem:[%s11663_s9 + $0x260] sm:$0xff] %v8625_v46  ;;  %7936 = vst [vmem:[%s11663_s9 + $0x270] sm:$0xff] %v8689_v48 }
 0x38f   : > { %7935 = vst [vmem:[%s11663_s9 + $0x268] sm:$0xff] %v8626_v61  ;;  %7937 = vst [vmem:[%s11663_s9 + $0x278] sm:$0xff] %v8690_v53 }
 0x391   : > { %v6834_v54 = vpop.f32.mrb[40].mxu0  ;;  %v7799_v9 = vpop.f32.mrb[40].mxu1 }
 0x392   : > { %v8627_v52 = vadd.f32 %v6834_v54, %v11652_v23  ;;  %v8691_v35 = vadd.f32 %v7799_v9, %v11654_v42  ;;  %v6836_v58 = vpop.f32.mrb[41].mxu0  ;;  %v7801_v57 = vpop.f32.mrb[41].mxu1 }
 0x393   : > { %v8628_v15 = vadd.f32 %v6836_v58, %v11656_v40  ;;  %v8692_v11 = vadd.f32 %v7801_v57, %v11658_v60  ;;  %v6838_v16 = vpop.f32.mrb[42].mxu0  ;;  %v7803_v20 = vpop.f32.mrb[42].mxu1 }
 0x394   : > { %7938 = vst [vmem:[%s11663_s9 + $0x280] sm:$0xff] %v8627_v52  ;;  %7940 = vst [vmem:[%s11663_s9 + $0x290] sm:$0xff] %v8691_v35  ;;  %v8629_v18 = vadd.f32 %v6838_v16, %v11652_v23  ;;  %v8693_v5 = vadd.f32 %v7803_v20, %v11654_v42  ;;  %v6840_v26 = vpop.f32.mrb[43].mxu0  ;;  %v7805_v49 = vpop.f32.mrb[43].mxu1 }
 0x395   : > { %7939 = vst [vmem:[%s11663_s9 + $0x288] sm:$0xff] %v8628_v15  ;;  %7941 = vst [vmem:[%s11663_s9 + $0x298] sm:$0xff] %v8692_v11  ;;  %v8630_v14 = vadd.f32 %v6840_v26, %v11656_v40  ;;  %v8694_v12 = vadd.f32 %v7805_v49, %v11658_v60 }
 0x396   : > { %7942 = vst [vmem:[%s11663_s9 + $0x2a0] sm:$0xff] %v8629_v18  ;;  %7944 = vst [vmem:[%s11663_s9 + $0x2b0] sm:$0xff] %v8693_v5 }
 0x397   : > { %7943 = vst [vmem:[%s11663_s9 + $0x2a8] sm:$0xff] %v8630_v14  ;;  %7945 = vst [vmem:[%s11663_s9 + $0x2b8] sm:$0xff] %v8694_v12 }
 0x399   : > { %v6844_v37 = vpop.f32.mrb[44].mxu0  ;;  %v7809_v2 = vpop.f32.mrb[44].mxu1 }
 0x39a   : > { %v8631_v32 = vadd.f32 %v6844_v37, %v11652_v23  ;;  %v8695_v50 = vadd.f32 %v7809_v2, %v11654_v42  ;;  %v6846_v7 = vpop.f32.mrb[45].mxu0  ;;  %v7811_v34 = vpop.f32.mrb[45].mxu1 }
 0x39b   : > { %v8632_v43 = vadd.f32 %v6846_v7, %v11656_v40  ;;  %v8696_v41 = vadd.f32 %v7811_v34, %v11658_v60  ;;  %v6848_v62 = vpop.f32.mrb[46].mxu0  ;;  %v7813_v22 = vpop.f32.mrb[46].mxu1 }
 0x39c   : > { %7946 = vst [vmem:[%s11663_s9 + $0x2c0] sm:$0xff] %v8631_v32  ;;  %7948 = vst [vmem:[%s11663_s9 + $0x2d0] sm:$0xff] %v8695_v50  ;;  %v8633_v1 = vadd.f32 %v6848_v62, %v11652_v23  ;;  %v8697_v10 = vadd.f32 %v7813_v22, %v11654_v42  ;;  %v6850_v13 = vpop.f32.mrb[47].mxu0  ;;  %v7815_v3 = vpop.f32.mrb[47].mxu1 }
 0x39d   : > { %7947 = vst [vmem:[%s11663_s9 + $0x2c8] sm:$0xff] %v8632_v43  ;;  %7949 = vst [vmem:[%s11663_s9 + $0x2d8] sm:$0xff] %v8696_v41  ;;  %v8634_v56 = vadd.f32 %v6850_v13, %v11656_v40  ;;  %v8698_v28 = vadd.f32 %v7815_v3, %v11658_v60 }
 0x39e   : > { %7950 = vst [vmem:[%s11663_s9 + $0x2e0] sm:$0xff] %v8633_v1  ;;  %7952 = vst [vmem:[%s11663_s9 + $0x2f0] sm:$0xff] %v8697_v10 }
 0x39f   : > { %7951 = vst [vmem:[%s11663_s9 + $0x2e8] sm:$0xff] %v8634_v56  ;;  %7953 = vst [vmem:[%s11663_s9 + $0x2f8] sm:$0xff] %v8698_v28 }
 0x3a1   : > { %v6854_v17 = vpop.f32.mrb[48].mxu0  ;;  %v7819_v27 = vpop.f32.mrb[48].mxu1 }
 0x3a2   : > { %v8635_v47 = vadd.f32 %v6854_v17, %v11652_v23  ;;  %v8699_v8 = vadd.f32 %v7819_v27, %v11654_v42  ;;  %v6856_v25 = vpop.f32.mrb[49].mxu0  ;;  %v7821_v19 = vpop.f32.mrb[49].mxu1 }
 0x3a3   : > { %v8636_v0 = vadd.f32 %v6856_v25, %v11656_v40  ;;  %v8700_v6 = vadd.f32 %v7821_v19, %v11658_v60  ;;  %v6858_v4 = vpop.f32.mrb[50].mxu0  ;;  %v7823_v39 = vpop.f32.mrb[50].mxu1 }
 0x3a4   : > { %7954 = vst [vmem:[%s11663_s9 + $0x300] sm:$0xff] %v8635_v47  ;;  %7956 = vst [vmem:[%s11663_s9 + $0x310] sm:$0xff] %v8699_v8  ;;  %v8637_v38 = vadd.f32 %v6858_v4, %v11652_v23  ;;  %v8701_v45 = vadd.f32 %v7823_v39, %v11654_v42  ;;  %v6860_v51 = vpop.f32.mrb[51].mxu0  ;;  %v7825_v24 = vpop.f32.mrb[51].mxu1 }
 0x3a5   : > { %7955 = vst [vmem:[%s11663_s9 + $0x308] sm:$0xff] %v8636_v0  ;;  %7957 = vst [vmem:[%s11663_s9 + $0x318] sm:$0xff] %v8700_v6  ;;  %v8638_v30 = vadd.f32 %v6860_v51, %v11656_v40  ;;  %v8702_v29 = vadd.f32 %v7825_v24, %v11658_v60 }
 0x3a6   : > { %7958 = vst [vmem:[%s11663_s9 + $0x320] sm:$0xff] %v8637_v38  ;;  %7960 = vst [vmem:[%s11663_s9 + $0x330] sm:$0xff] %v8701_v45 }
 0x3a7   : > { %7959 = vst [vmem:[%s11663_s9 + $0x328] sm:$0xff] %v8638_v30  ;;  %7961 = vst [vmem:[%s11663_s9 + $0x338] sm:$0xff] %v8702_v29 }
 0x3a9   : > { %v6864_v36 = vpop.f32.mrb[52].mxu0  ;;  %v7829_v55 = vpop.f32.mrb[52].mxu1 }
 0x3aa   : > { %v8639_v33 = vadd.f32 %v6864_v36, %v11652_v23  ;;  %v8703_v44 = vadd.f32 %v7829_v55, %v11654_v42  ;;  %v6866_v31 = vpop.f32.mrb[53].mxu0  ;;  %v7831_v21 = vpop.f32.mrb[53].mxu1 }
 0x3ab   : > { %v8640_v46 = vadd.f32 %v6866_v31, %v11656_v40  ;;  %v8704_v48 = vadd.f32 %v7831_v21, %v11658_v60  ;;  %v6868_v63 = vpop.f32.mrb[54].mxu0  ;;  %v7833_v59 = vpop.f32.mrb[54].mxu1 }
 0x3ac   : > { %7962 = vst [vmem:[%s11663_s9 + $0x340] sm:$0xff] %v8639_v33  ;;  %7964 = vst [vmem:[%s11663_s9 + $0x350] sm:$0xff] %v8703_v44  ;;  %v8641_v61 = vadd.f32 %v6868_v63, %v11652_v23  ;;  %v8705_v53 = vadd.f32 %v7833_v59, %v11654_v42  ;;  %v6870_v54 = vpop.f32.mrb[55].mxu0  ;;  %v7835_v9 = vpop.f32.mrb[55].mxu1 }
 0x3ad   : > { %7963 = vst [vmem:[%s11663_s9 + $0x348] sm:$0xff] %v8640_v46  ;;  %7965 = vst [vmem:[%s11663_s9 + $0x358] sm:$0xff] %v8704_v48  ;;  %v8642_v52 = vadd.f32 %v6870_v54, %v11656_v40  ;;  %v8706_v35 = vadd.f32 %v7835_v9, %v11658_v60 }
 0x3ae   : > { %7966 = vst [vmem:[%s11663_s9 + $0x360] sm:$0xff] %v8641_v61  ;;  %7968 = vst [vmem:[%s11663_s9 + $0x370] sm:$0xff] %v8705_v53 }
 0x3af   : > { %7967 = vst [vmem:[%s11663_s9 + $0x368] sm:$0xff] %v8642_v52  ;;  %7969 = vst [vmem:[%s11663_s9 + $0x378] sm:$0xff] %v8706_v35 }
 0x3b1   : > { %v6874_v58 = vpop.f32.mrb[56].mxu0  ;;  %v7839_v57 = vpop.f32.mrb[56].mxu1 }
 0x3b2   : > { %v8643_v15 = vadd.f32 %v6874_v58, %v11652_v23  ;;  %v8707_v11 = vadd.f32 %v7839_v57, %v11654_v42  ;;  %v6876_v16 = vpop.f32.mrb[57].mxu0  ;;  %v7841_v20 = vpop.f32.mrb[57].mxu1 }
 0x3b3   : > { %v8644_v18 = vadd.f32 %v6876_v16, %v11656_v40  ;;  %v8708_v5 = vadd.f32 %v7841_v20, %v11658_v60  ;;  %v6878_v26 = vpop.f32.mrb[58].mxu0  ;;  %v7843_v49 = vpop.f32.mrb[58].mxu1 }
 0x3b4   : > { %7970 = vst [vmem:[%s11663_s9 + $0x380] sm:$0xff] %v8643_v15  ;;  %7972 = vst [vmem:[%s11663_s9 + $0x390] sm:$0xff] %v8707_v11  ;;  %v8645_v14 = vadd.f32 %v6878_v26, %v11652_v23  ;;  %v8709_v12 = vadd.f32 %v7843_v49, %v11654_v42  ;;  %v6880_v37 = vpop.f32.mrb[59].mxu0  ;;  %v7845_v2 = vpop.f32.mrb[59].mxu1 }
 0x3b5   : > { %7971 = vst [vmem:[%s11663_s9 + $0x388] sm:$0xff] %v8644_v18  ;;  %7973 = vst [vmem:[%s11663_s9 + $0x398] sm:$0xff] %v8708_v5  ;;  %v8646_v32 = vadd.f32 %v6880_v37, %v11656_v40  ;;  %v8710_v50 = vadd.f32 %v7845_v2, %v11658_v60 }
 0x3b6   : > { %7974 = vst [vmem:[%s11663_s9 + $0x3a0] sm:$0xff] %v8645_v14  ;;  %7976 = vst [vmem:[%s11663_s9 + $0x3b0] sm:$0xff] %v8709_v12 }
 0x3b7   : > { %7975 = vst [vmem:[%s11663_s9 + $0x3a8] sm:$0xff] %v8646_v32  ;;  %7977 = vst [vmem:[%s11663_s9 + $0x3b8] sm:$0xff] %v8710_v50 }
 0x3b9   : > { %v6884_v7 = vpop.f32.mrb[60].mxu0  ;;  %v7849_v34 = vpop.f32.mrb[60].mxu1 }
 0x3ba   : > { %v8647_v43 = vadd.f32 %v6884_v7, %v11652_v23  ;;  %v8711_v41 = vadd.f32 %v7849_v34, %v11654_v42  ;;  %v6886_v62 = vpop.f32.mrb[61].mxu0  ;;  %v7851_v22 = vpop.f32.mrb[61].mxu1 }
 0x3bb   : > { %v8648_v1 = vadd.f32 %v6886_v62, %v11656_v40  ;;  %v8712_v10 = vadd.f32 %v7851_v22, %v11658_v60  ;;  %v6888_v13 = vpop.f32.mrb[62].mxu0  ;;  %v7853_v3 = vpop.f32.mrb[62].mxu1 }
 0x3bc   : > { %7978 = vst [vmem:[%s11663_s9 + $0x3c0] sm:$0xff] %v8647_v43  ;;  %7980 = vst [vmem:[%s11663_s9 + $0x3d0] sm:$0xff] %v8711_v41  ;;  %v8649_v56 = vadd.f32 %v6888_v13, %v11652_v23  ;;  %v8713_v28 = vadd.f32 %v7853_v3, %v11654_v42  ;;  %v6890_v17 = vpop.f32.mrb[63].mxu0  ;;  %v7855_v27 = vpop.f32.mrb[63].mxu1 }
 0x3bd   : > { %7979 = vst [vmem:[%s11663_s9 + $0x3c8] sm:$0xff] %v8648_v1  ;;  %7981 = vst [vmem:[%s11663_s9 + $0x3d8] sm:$0xff] %v8712_v10  ;;  %v8650_v47 = vadd.f32 %v6890_v17, %v11656_v40  ;;  %v8714_v8 = vadd.f32 %v7855_v27, %v11658_v60 }
 0x3be   : > { %7982 = vst [vmem:[%s11663_s9 + $0x3e0] sm:$0xff] %v8649_v56  ;;  %7984 = vst [vmem:[%s11663_s9 + $0x3f0] sm:$0xff] %v8713_v28 }
 0x3bf   : > { %7983 = vst [vmem:[%s11663_s9 + $0x3e8] sm:$0xff] %v8650_v47  ;;  %7985 = vst [vmem:[%s11663_s9 + $0x3f8] sm:$0xff] %v8714_v8 }
 0x3c0 PF: > { %s13_s12 = sadd.s32 1, %s9722_s12  }
 0x3c1   : > { %p10_p5 = scmp.ge.s32.totalorder %s13_s12, 4  }
 0x3c3   :  { %12 = sbr.rel (!%p10_p5) target bundleno = 1 (0x1), region = 64 }

</bundles_post_ra>
